<compile_context>
chip_gen: v7x
topology: tpu7x:2x2x1
jax: 0.10.0
libtpu: 0.0.40
codegen_flags: <defaults>
</compile_context>

<pallas_src>
import functools

import jax
import jax.numpy as jnp
from jax.experimental import pallas as pl
from jax.experimental.pallas import tpu as pltpu

NBIT = 8


def _round_up(x, m):
    return (x + m - 1) // m * m


def _pick_tm(m, align, cap=1024, min_tiles=4):
    """Edge-row tile: multiple of `align` (= 8*Nbr), <= cap edge rows,
    prefer >= min_tiles grid steps so each megacore half still pipelines."""
    cap = max(align, (cap // align) * align)
    if m <= align:
        return align
    return min(cap, _round_up(pl.cdiv(m, min_tiles), align))


def _vmem_limit(*buffer_bytes, headroom=8 << 20):
    est = int(sum(buffer_bytes)) + headroom
    return int(min(max(est, 32 << 20), 64 << 20))


def _requant_consts(mn, mx, w_in_sum, nbit):
    """Quant/requant scalars + full bias row, precomputed in the wrapper."""
    nsplit = float(2 ** nbit - 1)
    scale = mx - mn
    # Guard mx == mn (constant input): torch reference would produce NaN here;
    # we choose 0 codes -> output equals the bias row instead.
    inv_scale = jnp.where(scale > 0, nsplit / scale, 0.0)
    out_scale = scale / nsplit
    scal = jnp.stack([mn, inv_scale, out_scale]).astype(jnp.float32)   # SMEM
    bias = (mn * w_in_sum).astype(jnp.float32)[None, :]                # (1, Fout)
    return scal, bias


def _const_spec(shape):
    """BlockSpec for an operand with a constant index map: single-buffered."""
    return pl.BlockSpec(shape, lambda i: (0,) * len(shape),
                        pipeline_mode=pl.Buffered(buffer_count=1))


# ----------------------------------------------------------------------------
# Kernel 1: layer-1 quantized matmul (node/edge split, per-bit accumulation),
#           re-quantization + ReLU, and per-tile min/max partials of h1.
# ----------------------------------------------------------------------------
def quant_linear1_kernel(scal_ref, node_ref, edge_ref, wn_ref, we_ref, bias_ref,
                         h1_ref, mn_ref, mx_ref, *, nbit, nbr, m_valid):
    nsplit = float(2 ** nbit - 1)
    mn = scal_ref[0]
    inv_scale = scal_ref[1]
    out_scale = scal_ref[2]

    # 8-bit codes; truncation toward zero matches torch's .type(torch.uint8).
    qn = jnp.clip((node_ref[...] - mn) * inv_scale, 0.0, nsplit).astype(jnp.int32)
    qe = jnp.clip((edge_ref[...] - mn) * inv_scale, 0.0, nsplit).astype(jnp.int32)

    rows = node_ref.shape[0]          # atoms in this tile
    tm = edge_ref.shape[0]            # rows * nbr edge rows in this tile
    f_out = wn_ref.shape[-1]

    # Per-bit K-accumulation (no lane-axis concat); 2**i is folded into the
    # per-bit noisy weights wrapper-side, so each plane is a 0/1 bf16 matrix.
    acc_n = jnp.zeros((rows, f_out), jnp.float32)
    acc_e = jnp.zeros((tm, f_out), jnp.float32)
    for i in range(nbit):
        pn = jnp.bitwise_and(jnp.right_shift(qn, i), 1).astype(jnp.bfloat16)
        pe = jnp.bitwise_and(jnp.right_shift(qe, i), 1).astype(jnp.bfloat16)
        acc_n = acc_n + jnp.dot(pn, wn_ref[i], preferred_element_type=jnp.float32)
        acc_e = acc_e + jnp.dot(pe, we_ref[i], preferred_element_type=jnp.float32)

    # node half computed once per atom, broadcast over its Nbr edge rows.
    acc = acc_e.reshape(rows, nbr, f_out) + acc_n[:, None, :]
    out = acc.reshape(tm, f_out) * out_scale + bias_ref[...]
    out = jnp.maximum(out, 0.0)                                   # ReLU
    h1_ref[...] = out

    # Per-tile min/max over valid (non-padded) rows only: avoids a second
    # full HBM pass over h1 in the wrapper.
    r0 = pl.program_id(0) * tm
    valid = (r0 + jax.lax.broadcasted_iota(jnp.int32, (tm, 1), 0)) < m_valid
    t_mn = jnp.min(jnp.where(valid, out, jnp.inf))
    t_mx = jnp.max(jnp.where(valid, out, -jnp.inf))
    mn_ref[...] = jnp.full((1, 8, 128), t_mn, jnp.float32)
    mx_ref[...] = jnp.full((1, 8, 128), t_mx, jnp.float32)


# ----------------------------------------------------------------------------
# Kernel 2: layer-2 quantized matmul (per-bit accumulation, gate/extract
#           weight halves -> no lane-offset chunk slice) with fused
#           sigmoid/tanh gating, neighbor mask and neighbor-sum epilogue.
# ----------------------------------------------------------------------------
def quant_gate_sum_kernel(scal_ref, h_ref, wg_ref, we_ref, bg_ref, be_ref,
                          mask_ref, o_ref, *, nbit, nbr):
    nsplit = float(2 ** nbit - 1)
    mn = scal_ref[0]
    inv_scale = scal_ref[1]
    out_scale = scal_ref[2]

    q = jnp.clip((h_ref[...] - mn) * inv_scale, 0.0, nsplit).astype(jnp.int32)

    tm = h_ref.shape[0]
    fn = wg_ref.shape[-1]
    acc_g = jnp.zeros((tm, fn), jnp.float32)
    acc_e = jnp.zeros((tm, fn), jnp.float32)
    for i in range(nbit):
        p = jnp.bitwise_and(jnp.right_shift(q, i), 1).astype(jnp.bfloat16)
        acc_g = acc_g + jnp.dot(p, wg_ref[i], preferred_element_type=jnp.float32)
        acc_e = acc_e + jnp.dot(p, we_ref[i], preferred_element_type=jnp.float32)

    gate = jax.nn.sigmoid(acc_g * out_scale + bg_ref[...])        # (TM, Fn)
    extract = jnp.tanh(acc_e * out_scale + be_ref[...])           # (TM, Fn)

    rows = tm // nbr
    s = (gate * extract).reshape(rows, nbr, fn) * mask_ref[...][..., None]
    o_ref[...] = jnp.sum(s, axis=1)                               # (rows, Fn)


# ----------------------------------------------------------------------------
# Kernel 3: BatchNorm1d normalize (stats precomputed in XLA) + residual + ReLU.
#           Gridded and megacore-parallel.
# ----------------------------------------------------------------------------
def bn_residual_kernel(node_ref, s_ref, stat_ref, o_ref):
    mean = stat_ref[0:1, :]                                       # (1, Fn)
    inv_std = stat_ref[1:2, :]                                    # (1, Fn)
    o_ref[...] = jnp.maximum(node_ref[...] + (s_ref[...] - mean) * inv_std, 0.0)


# ----------------------------------------------------------------------------
# Full NodeUpdate.forward
# ----------------------------------------------------------------------------
def node_update_forward(node, edge, nbr_mask, w1, w2, noise_key, nbit=NBIT):
    B, At, Nbr, Fe = edge.shape
    Fn = node.shape[-1]
    F1_in, F1_out = Fn + Fe, w1.shape[0]
    F2_in, F2_out = w2.shape[1], w2.shape[0]
    assert w1.shape[1] == F1_in and F2_in == F1_out and F2_out == 2 * Fn

    natoms = B * At
    M = natoms * Nbr
    align = 8 * Nbr                       # rows_tile multiple of 8 (sublane)
    tm = _pick_tm(M, align)
    M_pad = _round_up(M, tm)
    n_tiles = M_pad // tm
    rows_pad = M_pad // Nbr
    rows_tile = tm // Nbr

    node2d = node.reshape(natoms, Fn)
    edge2d = edge.reshape(M, Fe)
    mask2d = nbr_mask.reshape(natoms, Nbr).astype(jnp.float32)
    if rows_pad != natoms:
        node2d = jnp.pad(node2d, ((0, rows_pad - natoms), (0, 0)))
        mask2d = jnp.pad(mask2d, ((0, rows_pad - natoms), (0, 0)))
    if M_pad != M:
        edge2d = jnp.pad(edge2d, ((0, M_pad - M), (0, 0)))

    # --- per-bit conductance-fluctuation noise, generated directly in the
    #     transposed (nbit, in, out) layout; 2**i and bf16 cast folded in ----
    k1, k2 = jax.random.split(noise_key)
    bit_scale = (2.0 ** jnp.arange(nbit, dtype=jnp.float32))[:, None, None]
    w1_t = jnp.transpose(w1)                                # (F1_in, F1_out)
    w2_t = jnp.transpose(w2)                                # (F2_in, F2_out)
    noise1 = jax.random.normal(k1, (nbit, F1_in, F1_out), jnp.float32) \
        * jnp.abs(w1_t)[None] * 0.1
    noise2 = jax.random.normal(k2, (nbit, F2_in, F2_out), jnp.float32) \
        * jnp.abs(w2_t)[None] * 0.1
    w1_bits = ((w1_t[None] + noise1) * bit_scale).astype(jnp.bfloat16)
    w2_bits = ((w2_t[None] + noise2) * bit_scale).astype(jnp.bfloat16)
    w1n_bits = w1_bits[:, :Fn, :]                           # node-half K rows
    w1e_bits = w1_bits[:, Fn:, :]                           # edge-half K rows
    w2g_bits = w2_bits[:, :, :Fn]                           # gate-half N cols
    w2e_bits = w2_bits[:, :, Fn:]                           # extract-half N cols

    # --- layer-1 scalars (min/max of concat == min/max of node,edge exactly)
    mn1 = jnp.minimum(jnp.min(node), jnp.min(edge)).astype(jnp.float32)
    mx1 = jnp.maximum(jnp.max(node), jnp.max(edge)).astype(jnp.float32)
    # layer-1 re_quantization bias uses fc.weight AFTER the bit loop (last noisy W)
    scal1, bias1 = _requant_consts(mn1, mx1,
                                   jnp.sum(w1_t + noise1[-1], axis=0), nbit)

    vmem1 = _vmem_limit(
        2 * rows_tile * Fn * 4, 2 * tm * Fe * 4,
        nbit * Fn * F1_out * 2, nbit * Fe * F1_out * 2, F1_out * 4,
        2 * tm * F1_out * 4, 4 * 8 * 128 * 4,
        3 * tm * F1_out * 4)                                # in-kernel headroom

    h1, mn_part, mx_part = pl.pallas_call(
        functools.partial(quant_linear1_kernel, nbit=nbit, nbr=Nbr, m_valid=M),
        out_shape=(jax.ShapeDtypeStruct((M_pad, F1_out), jnp.float32),
                   jax.ShapeDtypeStruct((n_tiles, 8, 128), jnp.float32),
                   jax.ShapeDtypeStruct((n_tiles, 8, 128), jnp.float32)),
        grid=(n_tiles,),
        in_specs=[
            pl.BlockSpec(memory_space=pltpu.MemorySpace.SMEM),
            pl.BlockSpec((rows_tile, Fn), lambda i: (i, 0)),
            pl.BlockSpec((tm, Fe), lambda i: (i, 0)),
            _const_spec((nbit, Fn, F1_out)),
            _const_spec((nbit, Fe, F1_out)),
            _const_spec((1, F1_out)),
        ],
        out_specs=(
            pl.BlockSpec((tm, F1_out), lambda i: (i, 0)),
            pl.BlockSpec((1, 8, 128), lambda i: (i, 0, 0)),
            pl.BlockSpec((1, 8, 128), lambda i: (i, 0, 0)),
        ),
        compiler_params=pltpu.CompilerParams(
            dimension_semantics=("parallel",), vmem_limit_bytes=vmem1),
    )(scal1, node2d, edge2d, w1n_bits, w1e_bits, bias1)

    # --- layer-2 scalars from the per-tile partials (no h1 re-read) ---------
    mn2 = jnp.min(mn_part[:, 0, 0])
    mx2 = jnp.max(mx_part[:, 0, 0])
    # layer-2 re_quantization uses the clean conductance weight (conductance[1][-1])
    scal2, bias2 = _requant_consts(mn2, mx2, jnp.sum(w2, axis=1), nbit)
    bias2_g = bias2[:, :Fn]
    bias2_e = bias2[:, Fn:]

    vmem2 = _vmem_limit(
        2 * tm * F2_in * 4, 2 * nbit * F2_in * Fn * 2, 2 * Fn * 4,
        2 * rows_tile * Nbr * 4, 2 * rows_tile * Fn * 4,
        3 * tm * F2_in * 4, 2 * tm * Fn * 4)

    nbr_sumed = pl.pallas_call(
        functools.partial(quant_gate_sum_kernel, nbit=nbit, nbr=Nbr),
        out_shape=jax.ShapeDtypeStruct((rows_pad, Fn), jnp.float32),
        grid=(n_tiles,),
        in_specs=[
            pl.BlockSpec(memory_space=pltpu.MemorySpace.SMEM),
            pl.BlockSpec((tm, F2_in), lambda i: (i, 0)),
            _const_spec((nbit, F2_in, Fn)),
            _const_spec((nbit, F2_in, Fn)),
            _const_spec((1, Fn)),
            _const_spec((1, Fn)),
            pl.BlockSpec((rows_tile, Nbr), lambda i: (i, 0)),
        ],
        out_specs=pl.BlockSpec((rows_tile, Fn), lambda i: (i, 0)),
        compiler_params=pltpu.CompilerParams(
            dimension_semantics=("parallel",), vmem_limit_bytes=vmem2),
    )(scal2, h1, w2g_bits, w2e_bits, bias2_g, bias2_e, mask2d)

    # --- BatchNorm1d (train-mode batch stats, gamma=1/beta=0) ---------------
    # Mean/var are a tiny XLA reduction over the valid rows; normalize +
    # residual + ReLU stays a gridded Pallas kernel (scales with B*At).
    s_valid = nbr_sumed[:natoms]
    mean = jnp.mean(s_valid, axis=0)
    var = jnp.mean((s_valid - mean) ** 2, axis=0)          # biased variance
    stats = jnp.stack([mean, jax.lax.rsqrt(var + 1e-5)], axis=0)   # (2, Fn)

    out_pad = pl.pallas_call(
        bn_residual_kernel,
        out_shape=jax.ShapeDtypeStruct((rows_pad, Fn), jnp.float32),
        grid=(n_tiles,),
        in_specs=[
            pl.BlockSpec((rows_tile, Fn), lambda i: (i, 0)),
            pl.BlockSpec((rows_tile, Fn), lambda i: (i, 0)),
            _const_spec((2, Fn)),
        ],
        out_specs=pl.BlockSpec((rows_tile, Fn), lambda i: (i, 0)),
        compiler_params=pltpu.CompilerParams(
            dimension_semantics=("parallel",)),
    )(node2d, nbr_sumed, stats)

    return out_pad[:natoms].reshape(B, At, Fn)


if __name__ == "__main__":
    key = jax.random.PRNGKey(0)
    kn, ke, km, kw1, kw2, knoise = jax.random.split(key, 6)

    B, At, Nbr, Fn, Fe = 2, 8, 8, 32, 32
    node = jax.random.normal(kn, (B, At, Fn), jnp.float32)
    edge = jax.random.normal(ke, (B, At, Nbr, Fe), jnp.float32)
    nbr_mask = (jax.random.uniform(km, (B, At, Nbr)) < 0.8).astype(jnp.float32)

    # reservoir (fixed, non-trainable) weights, torch layout (out_feat, in_feat)
    w1 = jax.random.normal(kw1, (4 * Fn + 4 * Fe, Fn + Fe), jnp.float32) * 0.05
    w2 = jax.random.normal(kw2, (2 * Fn, 4 * Fn + 4 * Fe), jnp.float32) * 0.05

    fwd = jax.jit(node_update_forward)
    out = fwd(node, edge, nbr_mask, w1, w2, knoise)
    jax.block_until_ready(out)
    assert out.shape == (B, At, Fn) and out.dtype == jnp.float32
    assert bool(jnp.all(jnp.isfinite(out)))
    print("KERNEL_OK")
</pallas_src>

<mosaic_0001>
module attributes {stable_mosaic.version = 11 : i64} {
  func.func @quant_linear1_kernel(%arg0: i32, %arg1: memref<3xf32, #tpu.memory_space<smem>>, %arg2: memref<8x32xf32, #tpu.memory_space<vmem>>, %arg3: memref<64x32xf32, #tpu.memory_space<vmem>>, %arg4: memref<8x32x256xbf16, #tpu.memory_space<vmem>>, %arg5: memref<8x32x256xbf16, #tpu.memory_space<vmem>>, %arg6: memref<1x256xf32, #tpu.memory_space<vmem>>, %arg7: memref<64x256xf32, #tpu.memory_space<vmem>>, %arg8: memref<1x8x128xf32, #tpu.memory_space<vmem>>, %arg9: memref<1x8x128xf32, #tpu.memory_space<vmem>>) attributes {dimension_semantics = [#tpu.dimension_semantics<parallel>], iteration_bounds = array<i64: 2>, scalar_prefetch = 0 : i64, scratch_operands = 0 : i64, tpu.core_type = #tpu.core_type<tc>, window_params = [{transform_indices = @transform_0, window_bounds = array<i64: 3>}, {transform_indices = @transform_1, window_bounds = array<i64: 8, 32>}, {transform_indices = @transform_2, window_bounds = array<i64: 64, 32>}, {pipeline_mode = #tpu.pipeline_mode<synchronous>, transform_indices = @transform_3, window_bounds = array<i64: 8, 32, 256>}, {pipeline_mode = #tpu.pipeline_mode<synchronous>, transform_indices = @transform_4, window_bounds = array<i64: 8, 32, 256>}, {pipeline_mode = #tpu.pipeline_mode<synchronous>, transform_indices = @transform_5, window_bounds = array<i64: 1, 256>}, {transform_indices = @transform_6, window_bounds = array<i64: 64, 256>}, {transform_indices = @transform_7, window_bounds = array<i64: 1, 8, 128>}, {transform_indices = @transform_8, window_bounds = array<i64: 1, 8, 128>}]} {
    %c0 = arith.constant 0 : index
    %0 = memref.load %arg1[%c0] : memref<3xf32, #tpu.memory_space<smem>>
    %c1 = arith.constant 1 : index
    %1 = memref.load %arg1[%c1] : memref<3xf32, #tpu.memory_space<smem>>
    %c2 = arith.constant 2 : index
    %2 = memref.load %arg1[%c2] : memref<3xf32, #tpu.memory_space<smem>>
    %c0_0 = arith.constant 0 : index
    %c0_1 = arith.constant 0 : index
    %3 = vector.load %arg2[%c0_0, %c0_1] : memref<8x32xf32, #tpu.memory_space<vmem>>, vector<8x32xf32>
    %4 = vector.broadcast %0 : f32 to vector<8x32xf32>
    %5 = arith.subf %3, %4 : vector<8x32xf32>
    %6 = vector.broadcast %1 : f32 to vector<8x32xf32>
    %7 = arith.mulf %5, %6 : vector<8x32xf32>
    %cst = arith.constant 0.000000e+00 : f32
    %cst_2 = arith.constant 2.550000e+02 : f32
    %8 = vector.broadcast %cst : f32 to vector<8x32xf32>
    %9 = arith.maximumf %8, %7 : vector<8x32xf32>
    %10 = vector.broadcast %cst_2 : f32 to vector<8x32xf32>
    %11 = arith.minimumf %10, %9 : vector<8x32xf32>
    %12 = arith.fptosi %11 : vector<8x32xf32> to vector<8x32xi32>
    %c0_3 = arith.constant 0 : index
    %c0_4 = arith.constant 0 : index
    %13 = vector.load %arg3[%c0_3, %c0_4] : memref<64x32xf32, #tpu.memory_space<vmem>>, vector<64x32xf32>
    %14 = vector.broadcast %0 : f32 to vector<64x32xf32>
    %15 = arith.subf %13, %14 : vector<64x32xf32>
    %16 = vector.broadcast %1 : f32 to vector<64x32xf32>
    %17 = arith.mulf %15, %16 : vector<64x32xf32>
    %cst_5 = arith.constant 0.000000e+00 : f32
    %cst_6 = arith.constant 2.550000e+02 : f32
    %18 = vector.broadcast %cst_5 : f32 to vector<64x32xf32>
    %19 = arith.maximumf %18, %17 : vector<64x32xf32>
    %20 = vector.broadcast %cst_6 : f32 to vector<64x32xf32>
    %21 = arith.minimumf %20, %19 : vector<64x32xf32>
    %22 = arith.fptosi %21 : vector<64x32xf32> to vector<64x32xi32>
    %cst_7 = arith.constant 0.000000e+00 : f32
    %23 = vector.broadcast %cst_7 : f32 to vector<8x256xf32>
    %cst_8 = arith.constant 0.000000e+00 : f32
    %24 = vector.broadcast %cst_8 : f32 to vector<64x256xf32>
    %c0_i32 = arith.constant 0 : i32
    %25 = vector.broadcast %c0_i32 : i32 to vector<8x32xi32>
    %26 = arith.shrsi %12, %25 : vector<8x32xi32>
    %c1_i32 = arith.constant 1 : i32
    %27 = vector.broadcast %c1_i32 : i32 to vector<8x32xi32>
    %28 = arith.andi %26, %27 : vector<8x32xi32>
    %29 = arith.sitofp %28 : vector<8x32xi32> to vector<8x32xbf16>
    %c0_i32_9 = arith.constant 0 : i32
    %30 = vector.broadcast %c0_i32_9 : i32 to vector<64x32xi32>
    %31 = arith.shrsi %22, %30 : vector<64x32xi32>
    %c1_i32_10 = arith.constant 1 : i32
    %32 = vector.broadcast %c1_i32_10 : i32 to vector<64x32xi32>
    %33 = arith.andi %31, %32 : vector<64x32xi32>
    %34 = arith.sitofp %33 : vector<64x32xi32> to vector<64x32xbf16>
    %c0_11 = arith.constant 0 : index
    %c0_12 = arith.constant 0 : index
    %c0_13 = arith.constant 0 : index
    %35 = vector.load %arg4[%c0_11, %c0_12, %c0_13] : memref<8x32x256xbf16, #tpu.memory_space<vmem>>, vector<1x32x256xbf16>
    %36 = vector.shape_cast %35 : vector<1x32x256xbf16> to vector<32x256xbf16>
    %cst_14 = arith.constant dense<0.000000e+00> : vector<8x256xf32>
    %37 = tpu.matmul %29, %36, %cst_14 {dimension_numbers = #tpu.dot_dimension_numbers<[1], [0], [0], [1], [0, 0, 1, 1], [], []>} : vector<8x32xbf16>, vector<32x256xbf16>, vector<8x256xf32> -> vector<8x256xf32>
    %38 = arith.addf %23, %37 : vector<8x256xf32>
    %c0_15 = arith.constant 0 : index
    %c0_16 = arith.constant 0 : index
    %c0_17 = arith.constant 0 : index
    %39 = vector.load %arg5[%c0_15, %c0_16, %c0_17] : memref<8x32x256xbf16, #tpu.memory_space<vmem>>, vector<1x32x256xbf16>
    %40 = vector.shape_cast %39 : vector<1x32x256xbf16> to vector<32x256xbf16>
    %cst_18 = arith.constant dense<0.000000e+00> : vector<64x256xf32>
    %41 = tpu.matmul %34, %40, %cst_18 {dimension_numbers = #tpu.dot_dimension_numbers<[1], [0], [0], [1], [0, 0, 1, 1], [], []>} : vector<64x32xbf16>, vector<32x256xbf16>, vector<64x256xf32> -> vector<64x256xf32>
    %42 = arith.addf %24, %41 : vector<64x256xf32>
    %c1_i32_19 = arith.constant 1 : i32
    %43 = vector.broadcast %c1_i32_19 : i32 to vector<8x32xi32>
    %44 = arith.shrsi %12, %43 : vector<8x32xi32>
    %c1_i32_20 = arith.constant 1 : i32
    %45 = vector.broadcast %c1_i32_20 : i32 to vector<8x32xi32>
    %46 = arith.andi %44, %45 : vector<8x32xi32>
    %47 = arith.sitofp %46 : vector<8x32xi32> to vector<8x32xbf16>
    %c1_i32_21 = arith.constant 1 : i32
    %48 = vector.broadcast %c1_i32_21 : i32 to vector<64x32xi32>
    %49 = arith.shrsi %22, %48 : vector<64x32xi32>
    %c1_i32_22 = arith.constant 1 : i32
    %50 = vector.broadcast %c1_i32_22 : i32 to vector<64x32xi32>
    %51 = arith.andi %49, %50 : vector<64x32xi32>
    %52 = arith.sitofp %51 : vector<64x32xi32> to vector<64x32xbf16>
    %c1_23 = arith.constant 1 : index
    %c0_24 = arith.constant 0 : index
    %c0_25 = arith.constant 0 : index
    %53 = vector.load %arg4[%c1_23, %c0_24, %c0_25] : memref<8x32x256xbf16, #tpu.memory_space<vmem>>, vector<1x32x256xbf16>
    %54 = vector.shape_cast %53 : vector<1x32x256xbf16> to vector<32x256xbf16>
    %cst_26 = arith.constant dense<0.000000e+00> : vector<8x256xf32>
    %55 = tpu.matmul %47, %54, %cst_26 {dimension_numbers = #tpu.dot_dimension_numbers<[1], [0], [0], [1], [0, 0, 1, 1], [], []>} : vector<8x32xbf16>, vector<32x256xbf16>, vector<8x256xf32> -> vector<8x256xf32>
    %56 = arith.addf %38, %55 : vector<8x256xf32>
    %c1_27 = arith.constant 1 : index
    %c0_28 = arith.constant 0 : index
    %c0_29 = arith.constant 0 : index
    %57 = vector.load %arg5[%c1_27, %c0_28, %c0_29] : memref<8x32x256xbf16, #tpu.memory_space<vmem>>, vector<1x32x256xbf16>
    %58 = vector.shape_cast %57 : vector<1x32x256xbf16> to vector<32x256xbf16>
    %cst_30 = arith.constant dense<0.000000e+00> : vector<64x256xf32>
    %59 = tpu.matmul %52, %58, %cst_30 {dimension_numbers = #tpu.dot_dimension_numbers<[1], [0], [0], [1], [0, 0, 1, 1], [], []>} : vector<64x32xbf16>, vector<32x256xbf16>, vector<64x256xf32> -> vector<64x256xf32>
    %60 = arith.addf %42, %59 : vector<64x256xf32>
    %c2_i32 = arith.constant 2 : i32
    %61 = vector.broadcast %c2_i32 : i32 to vector<8x32xi32>
    %62 = arith.shrsi %12, %61 : vector<8x32xi32>
    %c1_i32_31 = arith.constant 1 : i32
    %63 = vector.broadcast %c1_i32_31 : i32 to vector<8x32xi32>
    %64 = arith.andi %62, %63 : vector<8x32xi32>
    %65 = arith.sitofp %64 : vector<8x32xi32> to vector<8x32xbf16>
    %c2_i32_32 = arith.constant 2 : i32
    %66 = vector.broadcast %c2_i32_32 : i32 to vector<64x32xi32>
    %67 = arith.shrsi %22, %66 : vector<64x32xi32>
    %c1_i32_33 = arith.constant 1 : i32
    %68 = vector.broadcast %c1_i32_33 : i32 to vector<64x32xi32>
    %69 = arith.andi %67, %68 : vector<64x32xi32>
    %70 = arith.sitofp %69 : vector<64x32xi32> to vector<64x32xbf16>
    %c2_34 = arith.constant 2 : index
    %c0_35 = arith.constant 0 : index
    %c0_36 = arith.constant 0 : index
    %71 = vector.load %arg4[%c2_34, %c0_35, %c0_36] : memref<8x32x256xbf16, #tpu.memory_space<vmem>>, vector<1x32x256xbf16>
    %72 = vector.shape_cast %71 : vector<1x32x256xbf16> to vector<32x256xbf16>
    %cst_37 = arith.constant dense<0.000000e+00> : vector<8x256xf32>
    %73 = tpu.matmul %65, %72, %cst_37 {dimension_numbers = #tpu.dot_dimension_numbers<[1], [0], [0], [1], [0, 0, 1, 1], [], []>} : vector<8x32xbf16>, vector<32x256xbf16>, vector<8x256xf32> -> vector<8x256xf32>
    %74 = arith.addf %56, %73 : vector<8x256xf32>
    %c2_38 = arith.constant 2 : index
    %c0_39 = arith.constant 0 : index
    %c0_40 = arith.constant 0 : index
    %75 = vector.load %arg5[%c2_38, %c0_39, %c0_40] : memref<8x32x256xbf16, #tpu.memory_space<vmem>>, vector<1x32x256xbf16>
    %76 = vector.shape_cast %75 : vector<1x32x256xbf16> to vector<32x256xbf16>
    %cst_41 = arith.constant dense<0.000000e+00> : vector<64x256xf32>
    %77 = tpu.matmul %70, %76, %cst_41 {dimension_numbers = #tpu.dot_dimension_numbers<[1], [0], [0], [1], [0, 0, 1, 1], [], []>} : vector<64x32xbf16>, vector<32x256xbf16>, vector<64x256xf32> -> vector<64x256xf32>
    %78 = arith.addf %60, %77 : vector<64x256xf32>
    %c3_i32 = arith.constant 3 : i32
    %79 = vector.broadcast %c3_i32 : i32 to vector<8x32xi32>
    %80 = arith.shrsi %12, %79 : vector<8x32xi32>
    %c1_i32_42 = arith.constant 1 : i32
    %81 = vector.broadcast %c1_i32_42 : i32 to vector<8x32xi32>
    %82 = arith.andi %80, %81 : vector<8x32xi32>
    %83 = arith.sitofp %82 : vector<8x32xi32> to vector<8x32xbf16>
    %c3_i32_43 = arith.constant 3 : i32
    %84 = vector.broadcast %c3_i32_43 : i32 to vector<64x32xi32>
    %85 = arith.shrsi %22, %84 : vector<64x32xi32>
    %c1_i32_44 = arith.constant 1 : i32
    %86 = vector.broadcast %c1_i32_44 : i32 to vector<64x32xi32>
    %87 = arith.andi %85, %86 : vector<64x32xi32>
    %88 = arith.sitofp %87 : vector<64x32xi32> to vector<64x32xbf16>
    %c3 = arith.constant 3 : index
    %c0_45 = arith.constant 0 : index
    %c0_46 = arith.constant 0 : index
    %89 = vector.load %arg4[%c3, %c0_45, %c0_46] : memref<8x32x256xbf16, #tpu.memory_space<vmem>>, vector<1x32x256xbf16>
    %90 = vector.shape_cast %89 : vector<1x32x256xbf16> to vector<32x256xbf16>
    %cst_47 = arith.constant dense<0.000000e+00> : vector<8x256xf32>
    %91 = tpu.matmul %83, %90, %cst_47 {dimension_numbers = #tpu.dot_dimension_numbers<[1], [0], [0], [1], [0, 0, 1, 1], [], []>} : vector<8x32xbf16>, vector<32x256xbf16>, vector<8x256xf32> -> vector<8x256xf32>
    %92 = arith.addf %74, %91 : vector<8x256xf32>
    %c3_48 = arith.constant 3 : index
    %c0_49 = arith.constant 0 : index
    %c0_50 = arith.constant 0 : index
    %93 = vector.load %arg5[%c3_48, %c0_49, %c0_50] : memref<8x32x256xbf16, #tpu.memory_space<vmem>>, vector<1x32x256xbf16>
    %94 = vector.shape_cast %93 : vector<1x32x256xbf16> to vector<32x256xbf16>
    %cst_51 = arith.constant dense<0.000000e+00> : vector<64x256xf32>
    %95 = tpu.matmul %88, %94, %cst_51 {dimension_numbers = #tpu.dot_dimension_numbers<[1], [0], [0], [1], [0, 0, 1, 1], [], []>} : vector<64x32xbf16>, vector<32x256xbf16>, vector<64x256xf32> -> vector<64x256xf32>
    %96 = arith.addf %78, %95 : vector<64x256xf32>
    %c4_i32 = arith.constant 4 : i32
    %97 = vector.broadcast %c4_i32 : i32 to vector<8x32xi32>
    %98 = arith.shrsi %12, %97 : vector<8x32xi32>
    %c1_i32_52 = arith.constant 1 : i32
    %99 = vector.broadcast %c1_i32_52 : i32 to vector<8x32xi32>
    %100 = arith.andi %98, %99 : vector<8x32xi32>
    %101 = arith.sitofp %100 : vector<8x32xi32> to vector<8x32xbf16>
    %c4_i32_53 = arith.constant 4 : i32
    %102 = vector.broadcast %c4_i32_53 : i32 to vector<64x32xi32>
    %103 = arith.shrsi %22, %102 : vector<64x32xi32>
    %c1_i32_54 = arith.constant 1 : i32
    %104 = vector.broadcast %c1_i32_54 : i32 to vector<64x32xi32>
    %105 = arith.andi %103, %104 : vector<64x32xi32>
    %106 = arith.sitofp %105 : vector<64x32xi32> to vector<64x32xbf16>
    %c4 = arith.constant 4 : index
    %c0_55 = arith.constant 0 : index
    %c0_56 = arith.constant 0 : index
    %107 = vector.load %arg4[%c4, %c0_55, %c0_56] : memref<8x32x256xbf16, #tpu.memory_space<vmem>>, vector<1x32x256xbf16>
    %108 = vector.shape_cast %107 : vector<1x32x256xbf16> to vector<32x256xbf16>
    %cst_57 = arith.constant dense<0.000000e+00> : vector<8x256xf32>
    %109 = tpu.matmul %101, %108, %cst_57 {dimension_numbers = #tpu.dot_dimension_numbers<[1], [0], [0], [1], [0, 0, 1, 1], [], []>} : vector<8x32xbf16>, vector<32x256xbf16>, vector<8x256xf32> -> vector<8x256xf32>
    %110 = arith.addf %92, %109 : vector<8x256xf32>
    %c4_58 = arith.constant 4 : index
    %c0_59 = arith.constant 0 : index
    %c0_60 = arith.constant 0 : index
    %111 = vector.load %arg5[%c4_58, %c0_59, %c0_60] : memref<8x32x256xbf16, #tpu.memory_space<vmem>>, vector<1x32x256xbf16>
    %112 = vector.shape_cast %111 : vector<1x32x256xbf16> to vector<32x256xbf16>
    %cst_61 = arith.constant dense<0.000000e+00> : vector<64x256xf32>
    %113 = tpu.matmul %106, %112, %cst_61 {dimension_numbers = #tpu.dot_dimension_numbers<[1], [0], [0], [1], [0, 0, 1, 1], [], []>} : vector<64x32xbf16>, vector<32x256xbf16>, vector<64x256xf32> -> vector<64x256xf32>
    %114 = arith.addf %96, %113 : vector<64x256xf32>
    %c5_i32 = arith.constant 5 : i32
    %115 = vector.broadcast %c5_i32 : i32 to vector<8x32xi32>
    %116 = arith.shrsi %12, %115 : vector<8x32xi32>
    %c1_i32_62 = arith.constant 1 : i32
    %117 = vector.broadcast %c1_i32_62 : i32 to vector<8x32xi32>
    %118 = arith.andi %116, %117 : vector<8x32xi32>
    %119 = arith.sitofp %118 : vector<8x32xi32> to vector<8x32xbf16>
    %c5_i32_63 = arith.constant 5 : i32
    %120 = vector.broadcast %c5_i32_63 : i32 to vector<64x32xi32>
    %121 = arith.shrsi %22, %120 : vector<64x32xi32>
    %c1_i32_64 = arith.constant 1 : i32
    %122 = vector.broadcast %c1_i32_64 : i32 to vector<64x32xi32>
    %123 = arith.andi %121, %122 : vector<64x32xi32>
    %124 = arith.sitofp %123 : vector<64x32xi32> to vector<64x32xbf16>
    %c5 = arith.constant 5 : index
    %c0_65 = arith.constant 0 : index
    %c0_66 = arith.constant 0 : index
    %125 = vector.load %arg4[%c5, %c0_65, %c0_66] : memref<8x32x256xbf16, #tpu.memory_space<vmem>>, vector<1x32x256xbf16>
    %126 = vector.shape_cast %125 : vector<1x32x256xbf16> to vector<32x256xbf16>
    %cst_67 = arith.constant dense<0.000000e+00> : vector<8x256xf32>
    %127 = tpu.matmul %119, %126, %cst_67 {dimension_numbers = #tpu.dot_dimension_numbers<[1], [0], [0], [1], [0, 0, 1, 1], [], []>} : vector<8x32xbf16>, vector<32x256xbf16>, vector<8x256xf32> -> vector<8x256xf32>
    %128 = arith.addf %110, %127 : vector<8x256xf32>
    %c5_68 = arith.constant 5 : index
    %c0_69 = arith.constant 0 : index
    %c0_70 = arith.constant 0 : index
    %129 = vector.load %arg5[%c5_68, %c0_69, %c0_70] : memref<8x32x256xbf16, #tpu.memory_space<vmem>>, vector<1x32x256xbf16>
    %130 = vector.shape_cast %129 : vector<1x32x256xbf16> to vector<32x256xbf16>
    %cst_71 = arith.constant dense<0.000000e+00> : vector<64x256xf32>
    %131 = tpu.matmul %124, %130, %cst_71 {dimension_numbers = #tpu.dot_dimension_numbers<[1], [0], [0], [1], [0, 0, 1, 1], [], []>} : vector<64x32xbf16>, vector<32x256xbf16>, vector<64x256xf32> -> vector<64x256xf32>
    %132 = arith.addf %114, %131 : vector<64x256xf32>
    %c6_i32 = arith.constant 6 : i32
    %133 = vector.broadcast %c6_i32 : i32 to vector<8x32xi32>
    %134 = arith.shrsi %12, %133 : vector<8x32xi32>
    %c1_i32_72 = arith.constant 1 : i32
    %135 = vector.broadcast %c1_i32_72 : i32 to vector<8x32xi32>
    %136 = arith.andi %134, %135 : vector<8x32xi32>
    %137 = arith.sitofp %136 : vector<8x32xi32> to vector<8x32xbf16>
    %c6_i32_73 = arith.constant 6 : i32
    %138 = vector.broadcast %c6_i32_73 : i32 to vector<64x32xi32>
    %139 = arith.shrsi %22, %138 : vector<64x32xi32>
    %c1_i32_74 = arith.constant 1 : i32
    %140 = vector.broadcast %c1_i32_74 : i32 to vector<64x32xi32>
    %141 = arith.andi %139, %140 : vector<64x32xi32>
    %142 = arith.sitofp %141 : vector<64x32xi32> to vector<64x32xbf16>
    %c6 = arith.constant 6 : index
    %c0_75 = arith.constant 0 : index
    %c0_76 = arith.constant 0 : index
    %143 = vector.load %arg4[%c6, %c0_75, %c0_76] : memref<8x32x256xbf16, #tpu.memory_space<vmem>>, vector<1x32x256xbf16>
    %144 = vector.shape_cast %143 : vector<1x32x256xbf16> to vector<32x256xbf16>
    %cst_77 = arith.constant dense<0.000000e+00> : vector<8x256xf32>
    %145 = tpu.matmul %137, %144, %cst_77 {dimension_numbers = #tpu.dot_dimension_numbers<[1], [0], [0], [1], [0, 0, 1, 1], [], []>} : vector<8x32xbf16>, vector<32x256xbf16>, vector<8x256xf32> -> vector<8x256xf32>
    %146 = arith.addf %128, %145 : vector<8x256xf32>
    %c6_78 = arith.constant 6 : index
    %c0_79 = arith.constant 0 : index
    %c0_80 = arith.constant 0 : index
    %147 = vector.load %arg5[%c6_78, %c0_79, %c0_80] : memref<8x32x256xbf16, #tpu.memory_space<vmem>>, vector<1x32x256xbf16>
    %148 = vector.shape_cast %147 : vector<1x32x256xbf16> to vector<32x256xbf16>
    %cst_81 = arith.constant dense<0.000000e+00> : vector<64x256xf32>
    %149 = tpu.matmul %142, %148, %cst_81 {dimension_numbers = #tpu.dot_dimension_numbers<[1], [0], [0], [1], [0, 0, 1, 1], [], []>} : vector<64x32xbf16>, vector<32x256xbf16>, vector<64x256xf32> -> vector<64x256xf32>
    %150 = arith.addf %132, %149 : vector<64x256xf32>
    %c7_i32 = arith.constant 7 : i32
    %151 = vector.broadcast %c7_i32 : i32 to vector<8x32xi32>
    %152 = arith.shrsi %12, %151 : vector<8x32xi32>
    %c1_i32_82 = arith.constant 1 : i32
    %153 = vector.broadcast %c1_i32_82 : i32 to vector<8x32xi32>
    %154 = arith.andi %152, %153 : vector<8x32xi32>
    %155 = arith.sitofp %154 : vector<8x32xi32> to vector<8x32xbf16>
    %c7_i32_83 = arith.constant 7 : i32
    %156 = vector.broadcast %c7_i32_83 : i32 to vector<64x32xi32>
    %157 = arith.shrsi %22, %156 : vector<64x32xi32>
    %c1_i32_84 = arith.constant 1 : i32
    %158 = vector.broadcast %c1_i32_84 : i32 to vector<64x32xi32>
    %159 = arith.andi %157, %158 : vector<64x32xi32>
    %160 = arith.sitofp %159 : vector<64x32xi32> to vector<64x32xbf16>
    %c7 = arith.constant 7 : index
    %c0_85 = arith.constant 0 : index
    %c0_86 = arith.constant 0 : index
    %161 = vector.load %arg4[%c7, %c0_85, %c0_86] : memref<8x32x256xbf16, #tpu.memory_space<vmem>>, vector<1x32x256xbf16>
    %162 = vector.shape_cast %161 : vector<1x32x256xbf16> to vector<32x256xbf16>
    %cst_87 = arith.constant dense<0.000000e+00> : vector<8x256xf32>
    %163 = tpu.matmul %155, %162, %cst_87 {dimension_numbers = #tpu.dot_dimension_numbers<[1], [0], [0], [1], [0, 0, 1, 1], [], []>} : vector<8x32xbf16>, vector<32x256xbf16>, vector<8x256xf32> -> vector<8x256xf32>
    %164 = arith.addf %146, %163 : vector<8x256xf32>
    %c7_88 = arith.constant 7 : index
    %c0_89 = arith.constant 0 : index
    %c0_90 = arith.constant 0 : index
    %165 = vector.load %arg5[%c7_88, %c0_89, %c0_90] : memref<8x32x256xbf16, #tpu.memory_space<vmem>>, vector<1x32x256xbf16>
    %166 = vector.shape_cast %165 : vector<1x32x256xbf16> to vector<32x256xbf16>
    %cst_91 = arith.constant dense<0.000000e+00> : vector<64x256xf32>
    %167 = tpu.matmul %160, %166, %cst_91 {dimension_numbers = #tpu.dot_dimension_numbers<[1], [0], [0], [1], [0, 0, 1, 1], [], []>} : vector<64x32xbf16>, vector<32x256xbf16>, vector<64x256xf32> -> vector<64x256xf32>
    %168 = arith.addf %150, %167 : vector<64x256xf32>
    %169 = vector.shape_cast %168 : vector<64x256xf32> to vector<8x8x256xf32>
    %170 = vector.shape_cast %164 : vector<8x256xf32> to vector<8x1x256xf32>
    %171 = vector.broadcast %170 : vector<8x1x256xf32> to vector<8x8x256xf32>
    %172 = arith.addf %169, %171 : vector<8x8x256xf32>
    %173 = vector.shape_cast %172 : vector<8x8x256xf32> to vector<64x256xf32>
    %174 = vector.broadcast %2 : f32 to vector<64x256xf32>
    %175 = arith.mulf %173, %174 : vector<64x256xf32>
    %c0_92 = arith.constant 0 : index
    %c0_93 = arith.constant 0 : index
    %176 = vector.load %arg6[%c0_92, %c0_93] : memref<1x256xf32, #tpu.memory_space<vmem>>, vector<1x256xf32>
    %177 = vector.broadcast %176 : vector<1x256xf32> to vector<64x256xf32>
    %178 = arith.addf %175, %177 : vector<64x256xf32>
    %cst_94 = arith.constant 0.000000e+00 : f32
    %179 = vector.broadcast %cst_94 : f32 to vector<64x256xf32>
    %180 = arith.maximumf %178, %179 : vector<64x256xf32>
    %c0_95 = arith.constant 0 : index
    %c0_96 = arith.constant 0 : index
    %181 = vector.load %arg7[%c0_95, %c0_96] : memref<64x256xf32, #tpu.memory_space<vmem>>, vector<64x256xf32>
    tpu.vector_store %arg7[%c0_95, %c0_96], %180 {strides = array<i32>} : memref<64x256xf32, #tpu.memory_space<vmem>>, vector<64x256xf32>,
    %c64_i32 = arith.constant 64 : i32
    %182 = arith.muli %arg0, %c64_i32 : i32
    %183 = tpu.iota {dimensions = array<i32: 0>} : vector<64x1xi32>
    %184 = vector.broadcast %182 : i32 to vector<64x1xi32>
    %185 = arith.addi %184, %183 : vector<64x1xi32>
    %c128_i32 = arith.constant 128 : i32
    %186 = vector.broadcast %c128_i32 : i32 to vector<64x1xi32>
    %187 = arith.cmpi slt, %185, %186 : vector<64x1xi32>
    %cst_97 = arith.constant 0x7F800000 : f32
    %188 = vector.shape_cast %187 : vector<64x1xi1> to vector<64x1xi1>
    %189 = vector.broadcast %188 : vector<64x1xi1> to vector<64x256xi1>
    %190 = vector.broadcast %cst_97 : f32 to vector<64x256xf32>
    %191 = arith.select %189, %180, %190 : vector<64x256xi1>, vector<64x256xf32>
    %192 = vector.shape_cast %191 : vector<64x256xf32> to vector<1x64x256xf32>
    %cst_98 = arith.constant dense<0x7F800000> : vector<1xf32>
    %193 = vector.multi_reduction <minimumf>, %192, %cst_98 [1, 2] : vector<1x64x256xf32> to vector<1xf32>
    %194 = vector.shape_cast %193 : vector<1xf32> to vector<1x1x1xf32>
    %195 = vector.extract %194[0, 0, 0] : f32 from vector<1x1x1xf32>
    %cst_99 = arith.constant 0xFF800000 : f32
    %196 = vector.shape_cast %187 : vector<64x1xi1> to vector<64x1xi1>
    %197 = vector.broadcast %196 : vector<64x1xi1> to vector<64x256xi1>
    %198 = vector.broadcast %cst_99 : f32 to vector<64x256xf32>
    %199 = arith.select %197, %180, %198 : vector<64x256xi1>, vector<64x256xf32>
    %200 = vector.shape_cast %199 : vector<64x256xf32> to vector<1x64x256xf32>
    %cst_100 = arith.constant dense<0xFF800000> : vector<1xf32>
    %201 = vector.multi_reduction <maximumf>, %200, %cst_100 [1, 2] : vector<1x64x256xf32> to vector<1xf32>
    %202 = vector.shape_cast %201 : vector<1xf32> to vector<1x1x1xf32>
    %203 = vector.extract %202[0, 0, 0] : f32 from vector<1x1x1xf32>
    %204 = vector.broadcast %195 : f32 to vector<1x8x128xf32>
    %c0_101 = arith.constant 0 : index
    %c0_102 = arith.constant 0 : index
    %c0_103 = arith.constant 0 : index
    %205 = vector.load %arg8[%c0_101, %c0_102, %c0_103] : memref<1x8x128xf32, #tpu.memory_space<vmem>>, vector<1x8x128xf32>
    tpu.vector_store %arg8[%c0_101, %c0_102, %c0_103], %204 {strides = array<i32>} : memref<1x8x128xf32, #tpu.memory_space<vmem>>, vector<1x8x128xf32>,
    %206 = vector.broadcast %203 : f32 to vector<1x8x128xf32>
    %c0_104 = arith.constant 0 : index
    %c0_105 = arith.constant 0 : index
    %c0_106 = arith.constant 0 : index
    %207 = vector.load %arg9[%c0_104, %c0_105, %c0_106] : memref<1x8x128xf32, #tpu.memory_space<vmem>>, vector<1x8x128xf32>
    tpu.vector_store %arg9[%c0_104, %c0_105, %c0_106], %206 {strides = array<i32>} : memref<1x8x128xf32, #tpu.memory_space<vmem>>, vector<1x8x128xf32>,
    return
  }
  func.func @transform_0(%arg0: i32) -> i32 {
    %c0_i32 = arith.constant 0 : i32
    %c0_i32_0 = arith.constant 0 : i32
    return %c0_i32 : i32
  }
  func.func @transform_1(%arg0: i32) -> (i32, i32) {
    %c0_i32 = arith.constant 0 : i32
    %c0_i32_0 = arith.constant 0 : i32
    return %arg0, %c0_i32 : i32, i32
  }
  func.func @transform_2(%arg0: i32) -> (i32, i32) {
    %c0_i32 = arith.constant 0 : i32
    %c0_i32_0 = arith.constant 0 : i32
    return %arg0, %c0_i32 : i32, i32
  }
  func.func @transform_3(%arg0: i32) -> (i32, i32, i32) {
    %c0_i32 = arith.constant 0 : i32
    %c0_i32_0 = arith.constant 0 : i32
    %c0_i32_1 = arith.constant 0 : i32
    %c0_i32_2 = arith.constant 0 : i32
    return %c0_i32, %c0_i32_0, %c0_i32_1 : i32, i32, i32
  }
  func.func @transform_4(%arg0: i32) -> (i32, i32, i32) {
    %c0_i32 = arith.constant 0 : i32
    %c0_i32_0 = arith.constant 0 : i32
    %c0_i32_1 = arith.constant 0 : i32
    %c0_i32_2 = arith.constant 0 : i32
    return %c0_i32, %c0_i32_0, %c0_i32_1 : i32, i32, i32
  }
  func.func @transform_5(%arg0: i32) -> (i32, i32) {
    %c0_i32 = arith.constant 0 : i32
    %c0_i32_0 = arith.constant 0 : i32
    %c0_i32_1 = arith.constant 0 : i32
    return %c0_i32, %c0_i32_0 : i32, i32
  }
  func.func @transform_6(%arg0: i32) -> (i32, i32) {
    %c0_i32 = arith.constant 0 : i32
    %c0_i32_0 = arith.constant 0 : i32
    return %arg0, %c0_i32 : i32, i32
  }
  func.func @transform_7(%arg0: i32) -> (i32, i32, i32) {
    %c0_i32 = arith.constant 0 : i32
    %c0_i32_0 = arith.constant 0 : i32
    %c0_i32_1 = arith.constant 0 : i32
    return %arg0, %c0_i32, %c0_i32_0 : i32, i32, i32
  }
  func.func @transform_8(%arg0: i32) -> (i32, i32, i32) {
    %c0_i32 = arith.constant 0 : i32
    %c0_i32_0 = arith.constant 0 : i32
    %c0_i32_1 = arith.constant 0 : i32
    return %arg0, %c0_i32, %c0_i32_0 : i32, i32, i32
  }
}

module attributes {stable_mosaic.version = 11 : i64} {
  func.func @quant_gate_sum_kernel(%arg0: i32, %arg1: memref<3xf32, #tpu.memory_space<smem>>, %arg2: memref<64x256xf32, #tpu.memory_space<vmem>>, %arg3: memref<8x256x32xbf16, #tpu.memory_space<vmem>>, %arg4: memref<8x256x32xbf16, #tpu.memory_space<vmem>>, %arg5: memref<1x32xf32, #tpu.memory_space<vmem>>, %arg6: memref<1x32xf32, #tpu.memory_space<vmem>>, %arg7: memref<8x8xf32, #tpu.memory_space<vmem>>, %arg8: memref<8x32xf32, #tpu.memory_space<vmem>>) attributes {dimension_semantics = [#tpu.dimension_semantics<parallel>], iteration_bounds = array<i64: 2>, scalar_prefetch = 0 : i64, scratch_operands = 0 : i64, tpu.core_type = #tpu.core_type<tc>, window_params = [{transform_indices = @transform_0, window_bounds = array<i64: 3>}, {transform_indices = @transform_1, window_bounds = array<i64: 64, 256>}, {pipeline_mode = #tpu.pipeline_mode<synchronous>, transform_indices = @transform_2, window_bounds = array<i64: 8, 256, 32>}, {pipeline_mode = #tpu.pipeline_mode<synchronous>, transform_indices = @transform_3, window_bounds = array<i64: 8, 256, 32>}, {pipeline_mode = #tpu.pipeline_mode<synchronous>, transform_indices = @transform_4, window_bounds = array<i64: 1, 32>}, {pipeline_mode = #tpu.pipeline_mode<synchronous>, transform_indices = @transform_5, window_bounds = array<i64: 1, 32>}, {transform_indices = @transform_6, window_bounds = array<i64: 8, 8>}, {transform_indices = @transform_7, window_bounds = array<i64: 8, 32>}]} {
    %c0 = arith.constant 0 : index
    %0 = memref.load %arg1[%c0] : memref<3xf32, #tpu.memory_space<smem>>
    %c1 = arith.constant 1 : index
    %1 = memref.load %arg1[%c1] : memref<3xf32, #tpu.memory_space<smem>>
    %c2 = arith.constant 2 : index
    %2 = memref.load %arg1[%c2] : memref<3xf32, #tpu.memory_space<smem>>
    %c0_0 = arith.constant 0 : index
    %c0_1 = arith.constant 0 : index
    %3 = vector.load %arg2[%c0_0, %c0_1] : memref<64x256xf32, #tpu.memory_space<vmem>>, vector<64x256xf32>
    %4 = vector.broadcast %0 : f32 to vector<64x256xf32>
    %5 = arith.subf %3, %4 : vector<64x256xf32>
    %6 = vector.broadcast %1 : f32 to vector<64x256xf32>
    %7 = arith.mulf %5, %6 : vector<64x256xf32>
    %cst = arith.constant 0.000000e+00 : f32
    %cst_2 = arith.constant 2.550000e+02 : f32
    %8 = vector.broadcast %cst : f32 to vector<64x256xf32>
    %9 = arith.maximumf %8, %7 : vector<64x256xf32>
    %10 = vector.broadcast %cst_2 : f32 to vector<64x256xf32>
    %11 = arith.minimumf %10, %9 : vector<64x256xf32>
    %12 = arith.fptosi %11 : vector<64x256xf32> to vector<64x256xi32>
    %cst_3 = arith.constant 0.000000e+00 : f32
    %13 = vector.broadcast %cst_3 : f32 to vector<64x32xf32>
    %cst_4 = arith.constant 0.000000e+00 : f32
    %14 = vector.broadcast %cst_4 : f32 to vector<64x32xf32>
    %c0_i32 = arith.constant 0 : i32
    %15 = vector.broadcast %c0_i32 : i32 to vector<64x256xi32>
    %16 = arith.shrsi %12, %15 : vector<64x256xi32>
    %c1_i32 = arith.constant 1 : i32
    %17 = vector.broadcast %c1_i32 : i32 to vector<64x256xi32>
    %18 = arith.andi %16, %17 : vector<64x256xi32>
    %19 = arith.sitofp %18 : vector<64x256xi32> to vector<64x256xbf16>
    %c0_5 = arith.constant 0 : index
    %c0_6 = arith.constant 0 : index
    %c0_7 = arith.constant 0 : index
    %20 = vector.load %arg3[%c0_5, %c0_6, %c0_7] : memref<8x256x32xbf16, #tpu.memory_space<vmem>>, vector<1x256x32xbf16>
    %21 = vector.shape_cast %20 : vector<1x256x32xbf16> to vector<256x32xbf16>
    %cst_8 = arith.constant dense<0.000000e+00> : vector<64x32xf32>
    %22 = tpu.matmul %19, %21, %cst_8 {dimension_numbers = #tpu.dot_dimension_numbers<[1], [0], [0], [1], [0, 0, 1, 1], [], []>} : vector<64x256xbf16>, vector<256x32xbf16>, vector<64x32xf32> -> vector<64x32xf32>
    %23 = arith.addf %13, %22 : vector<64x32xf32>
    %c0_9 = arith.constant 0 : index
    %c0_10 = arith.constant 0 : index
    %c0_11 = arith.constant 0 : index
    %24 = vector.load %arg4[%c0_9, %c0_10, %c0_11] : memref<8x256x32xbf16, #tpu.memory_space<vmem>>, vector<1x256x32xbf16>
    %25 = vector.shape_cast %24 : vector<1x256x32xbf16> to vector<256x32xbf16>
    %cst_12 = arith.constant dense<0.000000e+00> : vector<64x32xf32>
    %26 = tpu.matmul %19, %25, %cst_12 {dimension_numbers = #tpu.dot_dimension_numbers<[1], [0], [0], [1], [0, 0, 1, 1], [], []>} : vector<64x256xbf16>, vector<256x32xbf16>, vector<64x32xf32> -> vector<64x32xf32>
    %27 = arith.addf %14, %26 : vector<64x32xf32>
    %c1_i32_13 = arith.constant 1 : i32
    %28 = vector.broadcast %c1_i32_13 : i32 to vector<64x256xi32>
    %29 = arith.shrsi %12, %28 : vector<64x256xi32>
    %c1_i32_14 = arith.constant 1 : i32
    %30 = vector.broadcast %c1_i32_14 : i32 to vector<64x256xi32>
    %31 = arith.andi %29, %30 : vector<64x256xi32>
    %32 = arith.sitofp %31 : vector<64x256xi32> to vector<64x256xbf16>
    %c1_15 = arith.constant 1 : index
    %c0_16 = arith.constant 0 : index
    %c0_17 = arith.constant 0 : index
    %33 = vector.load %arg3[%c1_15, %c0_16, %c0_17] : memref<8x256x32xbf16, #tpu.memory_space<vmem>>, vector<1x256x32xbf16>
    %34 = vector.shape_cast %33 : vector<1x256x32xbf16> to vector<256x32xbf16>
    %cst_18 = arith.constant dense<0.000000e+00> : vector<64x32xf32>
    %35 = tpu.matmul %32, %34, %cst_18 {dimension_numbers = #tpu.dot_dimension_numbers<[1], [0], [0], [1], [0, 0, 1, 1], [], []>} : vector<64x256xbf16>, vector<256x32xbf16>, vector<64x32xf32> -> vector<64x32xf32>
    %36 = arith.addf %23, %35 : vector<64x32xf32>
    %c1_19 = arith.constant 1 : index
    %c0_20 = arith.constant 0 : index
    %c0_21 = arith.constant 0 : index
    %37 = vector.load %arg4[%c1_19, %c0_20, %c0_21] : memref<8x256x32xbf16, #tpu.memory_space<vmem>>, vector<1x256x32xbf16>
    %38 = vector.shape_cast %37 : vector<1x256x32xbf16> to vector<256x32xbf16>
    %cst_22 = arith.constant dense<0.000000e+00> : vector<64x32xf32>
    %39 = tpu.matmul %32, %38, %cst_22 {dimension_numbers = #tpu.dot_dimension_numbers<[1], [0], [0], [1], [0, 0, 1, 1], [], []>} : vector<64x256xbf16>, vector<256x32xbf16>, vector<64x32xf32> -> vector<64x32xf32>
    %40 = arith.addf %27, %39 : vector<64x32xf32>
    %c2_i32 = arith.constant 2 : i32
    %41 = vector.broadcast %c2_i32 : i32 to vector<64x256xi32>
    %42 = arith.shrsi %12, %41 : vector<64x256xi32>
    %c1_i32_23 = arith.constant 1 : i32
    %43 = vector.broadcast %c1_i32_23 : i32 to vector<64x256xi32>
    %44 = arith.andi %42, %43 : vector<64x256xi32>
    %45 = arith.sitofp %44 : vector<64x256xi32> to vector<64x256xbf16>
    %c2_24 = arith.constant 2 : index
    %c0_25 = arith.constant 0 : index
    %c0_26 = arith.constant 0 : index
    %46 = vector.load %arg3[%c2_24, %c0_25, %c0_26] : memref<8x256x32xbf16, #tpu.memory_space<vmem>>, vector<1x256x32xbf16>
    %47 = vector.shape_cast %46 : vector<1x256x32xbf16> to vector<256x32xbf16>
    %cst_27 = arith.constant dense<0.000000e+00> : vector<64x32xf32>
    %48 = tpu.matmul %45, %47, %cst_27 {dimension_numbers = #tpu.dot_dimension_numbers<[1], [0], [0], [1], [0, 0, 1, 1], [], []>} : vector<64x256xbf16>, vector<256x32xbf16>, vector<64x32xf32> -> vector<64x32xf32>
    %49 = arith.addf %36, %48 : vector<64x32xf32>
    %c2_28 = arith.constant 2 : index
    %c0_29 = arith.constant 0 : index
    %c0_30 = arith.constant 0 : index
    %50 = vector.load %arg4[%c2_28, %c0_29, %c0_30] : memref<8x256x32xbf16, #tpu.memory_space<vmem>>, vector<1x256x32xbf16>
    %51 = vector.shape_cast %50 : vector<1x256x32xbf16> to vector<256x32xbf16>
    %cst_31 = arith.constant dense<0.000000e+00> : vector<64x32xf32>
    %52 = tpu.matmul %45, %51, %cst_31 {dimension_numbers = #tpu.dot_dimension_numbers<[1], [0], [0], [1], [0, 0, 1, 1], [], []>} : vector<64x256xbf16>, vector<256x32xbf16>, vector<64x32xf32> -> vector<64x32xf32>
    %53 = arith.addf %40, %52 : vector<64x32xf32>
    %c3_i32 = arith.constant 3 : i32
    %54 = vector.broadcast %c3_i32 : i32 to vector<64x256xi32>
    %55 = arith.shrsi %12, %54 : vector<64x256xi32>
    %c1_i32_32 = arith.constant 1 : i32
    %56 = vector.broadcast %c1_i32_32 : i32 to vector<64x256xi32>
    %57 = arith.andi %55, %56 : vector<64x256xi32>
    %58 = arith.sitofp %57 : vector<64x256xi32> to vector<64x256xbf16>
    %c3 = arith.constant 3 : index
    %c0_33 = arith.constant 0 : index
    %c0_34 = arith.constant 0 : index
    %59 = vector.load %arg3[%c3, %c0_33, %c0_34] : memref<8x256x32xbf16, #tpu.memory_space<vmem>>, vector<1x256x32xbf16>
    %60 = vector.shape_cast %59 : vector<1x256x32xbf16> to vector<256x32xbf16>
    %cst_35 = arith.constant dense<0.000000e+00> : vector<64x32xf32>
    %61 = tpu.matmul %58, %60, %cst_35 {dimension_numbers = #tpu.dot_dimension_numbers<[1], [0], [0], [1], [0, 0, 1, 1], [], []>} : vector<64x256xbf16>, vector<256x32xbf16>, vector<64x32xf32> -> vector<64x32xf32>
    %62 = arith.addf %49, %61 : vector<64x32xf32>
    %c3_36 = arith.constant 3 : index
    %c0_37 = arith.constant 0 : index
    %c0_38 = arith.constant 0 : index
    %63 = vector.load %arg4[%c3_36, %c0_37, %c0_38] : memref<8x256x32xbf16, #tpu.memory_space<vmem>>, vector<1x256x32xbf16>
    %64 = vector.shape_cast %63 : vector<1x256x32xbf16> to vector<256x32xbf16>
    %cst_39 = arith.constant dense<0.000000e+00> : vector<64x32xf32>
    %65 = tpu.matmul %58, %64, %cst_39 {dimension_numbers = #tpu.dot_dimension_numbers<[1], [0], [0], [1], [0, 0, 1, 1], [], []>} : vector<64x256xbf16>, vector<256x32xbf16>, vector<64x32xf32> -> vector<64x32xf32>
    %66 = arith.addf %53, %65 : vector<64x32xf32>
    %c4_i32 = arith.constant 4 : i32
    %67 = vector.broadcast %c4_i32 : i32 to vector<64x256xi32>
    %68 = arith.shrsi %12, %67 : vector<64x256xi32>
    %c1_i32_40 = arith.constant 1 : i32
    %69 = vector.broadcast %c1_i32_40 : i32 to vector<64x256xi32>
    %70 = arith.andi %68, %69 : vector<64x256xi32>
    %71 = arith.sitofp %70 : vector<64x256xi32> to vector<64x256xbf16>
    %c4 = arith.constant 4 : index
    %c0_41 = arith.constant 0 : index
    %c0_42 = arith.constant 0 : index
    %72 = vector.load %arg3[%c4, %c0_41, %c0_42] : memref<8x256x32xbf16, #tpu.memory_space<vmem>>, vector<1x256x32xbf16>
    %73 = vector.shape_cast %72 : vector<1x256x32xbf16> to vector<256x32xbf16>
    %cst_43 = arith.constant dense<0.000000e+00> : vector<64x32xf32>
    %74 = tpu.matmul %71, %73, %cst_43 {dimension_numbers = #tpu.dot_dimension_numbers<[1], [0], [0], [1], [0, 0, 1, 1], [], []>} : vector<64x256xbf16>, vector<256x32xbf16>, vector<64x32xf32> -> vector<64x32xf32>
    %75 = arith.addf %62, %74 : vector<64x32xf32>
    %c4_44 = arith.constant 4 : index
    %c0_45 = arith.constant 0 : index
    %c0_46 = arith.constant 0 : index
    %76 = vector.load %arg4[%c4_44, %c0_45, %c0_46] : memref<8x256x32xbf16, #tpu.memory_space<vmem>>, vector<1x256x32xbf16>
    %77 = vector.shape_cast %76 : vector<1x256x32xbf16> to vector<256x32xbf16>
    %cst_47 = arith.constant dense<0.000000e+00> : vector<64x32xf32>
    %78 = tpu.matmul %71, %77, %cst_47 {dimension_numbers = #tpu.dot_dimension_numbers<[1], [0], [0], [1], [0, 0, 1, 1], [], []>} : vector<64x256xbf16>, vector<256x32xbf16>, vector<64x32xf32> -> vector<64x32xf32>
    %79 = arith.addf %66, %78 : vector<64x32xf32>
    %c5_i32 = arith.constant 5 : i32
    %80 = vector.broadcast %c5_i32 : i32 to vector<64x256xi32>
    %81 = arith.shrsi %12, %80 : vector<64x256xi32>
    %c1_i32_48 = arith.constant 1 : i32
    %82 = vector.broadcast %c1_i32_48 : i32 to vector<64x256xi32>
    %83 = arith.andi %81, %82 : vector<64x256xi32>
    %84 = arith.sitofp %83 : vector<64x256xi32> to vector<64x256xbf16>
    %c5 = arith.constant 5 : index
    %c0_49 = arith.constant 0 : index
    %c0_50 = arith.constant 0 : index
    %85 = vector.load %arg3[%c5, %c0_49, %c0_50] : memref<8x256x32xbf16, #tpu.memory_space<vmem>>, vector<1x256x32xbf16>
    %86 = vector.shape_cast %85 : vector<1x256x32xbf16> to vector<256x32xbf16>
    %cst_51 = arith.constant dense<0.000000e+00> : vector<64x32xf32>
    %87 = tpu.matmul %84, %86, %cst_51 {dimension_numbers = #tpu.dot_dimension_numbers<[1], [0], [0], [1], [0, 0, 1, 1], [], []>} : vector<64x256xbf16>, vector<256x32xbf16>, vector<64x32xf32> -> vector<64x32xf32>
    %88 = arith.addf %75, %87 : vector<64x32xf32>
    %c5_52 = arith.constant 5 : index
    %c0_53 = arith.constant 0 : index
    %c0_54 = arith.constant 0 : index
    %89 = vector.load %arg4[%c5_52, %c0_53, %c0_54] : memref<8x256x32xbf16, #tpu.memory_space<vmem>>, vector<1x256x32xbf16>
    %90 = vector.shape_cast %89 : vector<1x256x32xbf16> to vector<256x32xbf16>
    %cst_55 = arith.constant dense<0.000000e+00> : vector<64x32xf32>
    %91 = tpu.matmul %84, %90, %cst_55 {dimension_numbers = #tpu.dot_dimension_numbers<[1], [0], [0], [1], [0, 0, 1, 1], [], []>} : vector<64x256xbf16>, vector<256x32xbf16>, vector<64x32xf32> -> vector<64x32xf32>
    %92 = arith.addf %79, %91 : vector<64x32xf32>
    %c6_i32 = arith.constant 6 : i32
    %93 = vector.broadcast %c6_i32 : i32 to vector<64x256xi32>
    %94 = arith.shrsi %12, %93 : vector<64x256xi32>
    %c1_i32_56 = arith.constant 1 : i32
    %95 = vector.broadcast %c1_i32_56 : i32 to vector<64x256xi32>
    %96 = arith.andi %94, %95 : vector<64x256xi32>
    %97 = arith.sitofp %96 : vector<64x256xi32> to vector<64x256xbf16>
    %c6 = arith.constant 6 : index
    %c0_57 = arith.constant 0 : index
    %c0_58 = arith.constant 0 : index
    %98 = vector.load %arg3[%c6, %c0_57, %c0_58] : memref<8x256x32xbf16, #tpu.memory_space<vmem>>, vector<1x256x32xbf16>
    %99 = vector.shape_cast %98 : vector<1x256x32xbf16> to vector<256x32xbf16>
    %cst_59 = arith.constant dense<0.000000e+00> : vector<64x32xf32>
    %100 = tpu.matmul %97, %99, %cst_59 {dimension_numbers = #tpu.dot_dimension_numbers<[1], [0], [0], [1], [0, 0, 1, 1], [], []>} : vector<64x256xbf16>, vector<256x32xbf16>, vector<64x32xf32> -> vector<64x32xf32>
    %101 = arith.addf %88, %100 : vector<64x32xf32>
    %c6_60 = arith.constant 6 : index
    %c0_61 = arith.constant 0 : index
    %c0_62 = arith.constant 0 : index
    %102 = vector.load %arg4[%c6_60, %c0_61, %c0_62] : memref<8x256x32xbf16, #tpu.memory_space<vmem>>, vector<1x256x32xbf16>
    %103 = vector.shape_cast %102 : vector<1x256x32xbf16> to vector<256x32xbf16>
    %cst_63 = arith.constant dense<0.000000e+00> : vector<64x32xf32>
    %104 = tpu.matmul %97, %103, %cst_63 {dimension_numbers = #tpu.dot_dimension_numbers<[1], [0], [0], [1], [0, 0, 1, 1], [], []>} : vector<64x256xbf16>, vector<256x32xbf16>, vector<64x32xf32> -> vector<64x32xf32>
    %105 = arith.addf %92, %104 : vector<64x32xf32>
    %c7_i32 = arith.constant 7 : i32
    %106 = vector.broadcast %c7_i32 : i32 to vector<64x256xi32>
    %107 = arith.shrsi %12, %106 : vector<64x256xi32>
    %c1_i32_64 = arith.constant 1 : i32
    %108 = vector.broadcast %c1_i32_64 : i32 to vector<64x256xi32>
    %109 = arith.andi %107, %108 : vector<64x256xi32>
    %110 = arith.sitofp %109 : vector<64x256xi32> to vector<64x256xbf16>
    %c7 = arith.constant 7 : index
    %c0_65 = arith.constant 0 : index
    %c0_66 = arith.constant 0 : index
    %111 = vector.load %arg3[%c7, %c0_65, %c0_66] : memref<8x256x32xbf16, #tpu.memory_space<vmem>>, vector<1x256x32xbf16>
    %112 = vector.shape_cast %111 : vector<1x256x32xbf16> to vector<256x32xbf16>
    %cst_67 = arith.constant dense<0.000000e+00> : vector<64x32xf32>
    %113 = tpu.matmul %110, %112, %cst_67 {dimension_numbers = #tpu.dot_dimension_numbers<[1], [0], [0], [1], [0, 0, 1, 1], [], []>} : vector<64x256xbf16>, vector<256x32xbf16>, vector<64x32xf32> -> vector<64x32xf32>
    %114 = arith.addf %101, %113 : vector<64x32xf32>
    %c7_68 = arith.constant 7 : index
    %c0_69 = arith.constant 0 : index
    %c0_70 = arith.constant 0 : index
    %115 = vector.load %arg4[%c7_68, %c0_69, %c0_70] : memref<8x256x32xbf16, #tpu.memory_space<vmem>>, vector<1x256x32xbf16>
    %116 = vector.shape_cast %115 : vector<1x256x32xbf16> to vector<256x32xbf16>
    %cst_71 = arith.constant dense<0.000000e+00> : vector<64x32xf32>
    %117 = tpu.matmul %110, %116, %cst_71 {dimension_numbers = #tpu.dot_dimension_numbers<[1], [0], [0], [1], [0, 0, 1, 1], [], []>} : vector<64x256xbf16>, vector<256x32xbf16>, vector<64x32xf32> -> vector<64x32xf32>
    %118 = arith.addf %105, %117 : vector<64x32xf32>
    %119 = vector.broadcast %2 : f32 to vector<64x32xf32>
    %120 = arith.mulf %114, %119 : vector<64x32xf32>
    %c0_72 = arith.constant 0 : index
    %c0_73 = arith.constant 0 : index
    %121 = vector.load %arg5[%c0_72, %c0_73] : memref<1x32xf32, #tpu.memory_space<vmem>>, vector<1x32xf32>
    %122 = vector.broadcast %121 : vector<1x32xf32> to vector<64x32xf32>
    %123 = arith.addf %120, %122 : vector<64x32xf32>
    %124 = arith.negf %123 : vector<64x32xf32>
    %125 = math.exp %124 : vector<64x32xf32>
    %cst_74 = arith.constant 1.000000e+00 : f32
    %126 = vector.broadcast %cst_74 : f32 to vector<64x32xf32>
    %127 = arith.addf %126, %125 : vector<64x32xf32>
    %128 = arith.divf %126, %127 : vector<64x32xf32>
    %129 = vector.broadcast %2 : f32 to vector<64x32xf32>
    %130 = arith.mulf %118, %129 : vector<64x32xf32>
    %c0_75 = arith.constant 0 : index
    %c0_76 = arith.constant 0 : index
    %131 = vector.load %arg6[%c0_75, %c0_76] : memref<1x32xf32, #tpu.memory_space<vmem>>, vector<1x32xf32>
    %132 = vector.broadcast %131 : vector<1x32xf32> to vector<64x32xf32>
    %133 = arith.addf %130, %132 : vector<64x32xf32>
    %134 = math.tanh %133 : vector<64x32xf32>
    %135 = arith.mulf %128, %134 : vector<64x32xf32>
    %136 = vector.shape_cast %135 : vector<64x32xf32> to vector<8x8x32xf32>
    %c0_77 = arith.constant 0 : index
    %c0_78 = arith.constant 0 : index
    %137 = vector.load %arg7[%c0_77, %c0_78] : memref<8x8xf32, #tpu.memory_space<vmem>>, vector<8x8xf32>
    %138 = vector.shape_cast %137 : vector<8x8xf32> to vector<8x8x1xf32>
    %139 = vector.broadcast %138 : vector<8x8x1xf32> to vector<8x8x32xf32>
    %140 = arith.mulf %136, %139 : vector<8x8x32xf32>
    %cst_79 = arith.constant dense<0.000000e+00> : vector<8x32xf32>
    %141 = vector.multi_reduction <add>, %140, %cst_79 [1] : vector<8x8x32xf32> to vector<8x32xf32>
    %c0_80 = arith.constant 0 : index
    %c0_81 = arith.constant 0 : index
    %142 = vector.load %arg8[%c0_80, %c0_81] : memref<8x32xf32, #tpu.memory_space<vmem>>, vector<8x32xf32>
    tpu.vector_store %arg8[%c0_80, %c0_81], %141 {strides = array<i32>} : memref<8x32xf32, #tpu.memory_space<vmem>>, vector<8x32xf32>,
    return
  }
  func.func @transform_0(%arg0: i32) -> i32 {
    %c0_i32 = arith.constant 0 : i32
    %c0_i32_0 = arith.constant 0 : i32
    return %c0_i32 : i32
  }
  func.func @transform_1(%arg0: i32) -> (i32, i32) {
    %c0_i32 = arith.constant 0 : i32
    %c0_i32_0 = arith.constant 0 : i32
    return %arg0, %c0_i32 : i32, i32
  }
  func.func @transform_2(%arg0: i32) -> (i32, i32, i32) {
    %c0_i32 = arith.constant 0 : i32
    %c0_i32_0 = arith.constant 0 : i32
    %c0_i32_1 = arith.constant 0 : i32
    %c0_i32_2 = arith.constant 0 : i32
    return %c0_i32, %c0_i32_0, %c0_i32_1 : i32, i32, i32
  }
  func.func @transform_3(%arg0: i32) -> (i32, i32, i32) {
    %c0_i32 = arith.constant 0 : i32
    %c0_i32_0 = arith.constant 0 : i32
    %c0_i32_1 = arith.constant 0 : i32
    %c0_i32_2 = arith.constant 0 : i32
    return %c0_i32, %c0_i32_0, %c0_i32_1 : i32, i32, i32
  }
  func.func @transform_4(%arg0: i32) -> (i32, i32) {
    %c0_i32 = arith.constant 0 : i32
    %c0_i32_0 = arith.constant 0 : i32
    %c0_i32_1 = arith.constant 0 : i32
    return %c0_i32, %c0_i32_0 : i32, i32
  }
  func.func @transform_5(%arg0: i32) -> (i32, i32) {
    %c0_i32 = arith.constant 0 : i32
    %c0_i32_0 = arith.constant 0 : i32
    %c0_i32_1 = arith.constant 0 : i32
    return %c0_i32, %c0_i32_0 : i32, i32
  }
  func.func @transform_6(%arg0: i32) -> (i32, i32) {
    %c0_i32 = arith.constant 0 : i32
    %c0_i32_0 = arith.constant 0 : i32
    return %arg0, %c0_i32 : i32, i32
  }
  func.func @transform_7(%arg0: i32) -> (i32, i32) {
    %c0_i32 = arith.constant 0 : i32
    %c0_i32_0 = arith.constant 0 : i32
    return %arg0, %c0_i32 : i32, i32
  }
}

module attributes {stable_mosaic.version = 11 : i64} {
  func.func @bn_residual_kernel(%arg0: i32, %arg1: memref<8x32xf32, #tpu.memory_space<vmem>>, %arg2: memref<8x32xf32, #tpu.memory_space<vmem>>, %arg3: memref<2x32xf32, #tpu.memory_space<vmem>>, %arg4: memref<8x32xf32, #tpu.memory_space<vmem>>) attributes {dimension_semantics = [#tpu.dimension_semantics<parallel>], iteration_bounds = array<i64: 2>, scalar_prefetch = 0 : i64, scratch_operands = 0 : i64, tpu.core_type = #tpu.core_type<tc>, window_params = [{transform_indices = @transform_0, window_bounds = array<i64: 8, 32>}, {transform_indices = @transform_1, window_bounds = array<i64: 8, 32>}, {pipeline_mode = #tpu.pipeline_mode<synchronous>, transform_indices = @transform_2, window_bounds = array<i64: 2, 32>}, {transform_indices = @transform_3, window_bounds = array<i64: 8, 32>}]} {
    %c0 = arith.constant 0 : index
    %c0_0 = arith.constant 0 : index
    %0 = vector.load %arg3[%c0, %c0_0] : memref<2x32xf32, #tpu.memory_space<vmem>>, vector<1x32xf32>
    %c1 = arith.constant 1 : index
    %c0_1 = arith.constant 0 : index
    %1 = vector.load %arg3[%c1, %c0_1] : memref<2x32xf32, #tpu.memory_space<vmem>>, vector<1x32xf32>
    %c0_2 = arith.constant 0 : index
    %c0_3 = arith.constant 0 : index
    %2 = vector.load %arg1[%c0_2, %c0_3] : memref<8x32xf32, #tpu.memory_space<vmem>>, vector<8x32xf32>
    %c0_4 = arith.constant 0 : index
    %c0_5 = arith.constant 0 : index
    %3 = vector.load %arg2[%c0_4, %c0_5] : memref<8x32xf32, #tpu.memory_space<vmem>>, vector<8x32xf32>
    %4 = vector.broadcast %0 : vector<1x32xf32> to vector<8x32xf32>
    %5 = arith.subf %3, %4 : vector<8x32xf32>
    %6 = vector.broadcast %1 : vector<1x32xf32> to vector<8x32xf32>
    %7 = arith.mulf %5, %6 : vector<8x32xf32>
    %8 = arith.addf %2, %7 : vector<8x32xf32>
    %cst = arith.constant 0.000000e+00 : f32
    %9 = vector.broadcast %cst : f32 to vector<8x32xf32>
    %10 = arith.maximumf %8, %9 : vector<8x32xf32>
    %c0_6 = arith.constant 0 : index
    %c0_7 = arith.constant 0 : index
    %11 = vector.load %arg4[%c0_6, %c0_7] : memref<8x32xf32, #tpu.memory_space<vmem>>, vector<8x32xf32>
    tpu.vector_store %arg4[%c0_6, %c0_7], %10 {strides = array<i32>} : memref<8x32xf32, #tpu.memory_space<vmem>>, vector<8x32xf32>,
    return
  }
  func.func @transform_0(%arg0: i32) -> (i32, i32) {
    %c0_i32 = arith.constant 0 : i32
    %c0_i32_0 = arith.constant 0 : i32
    return %arg0, %c0_i32 : i32, i32
  }
  func.func @transform_1(%arg0: i32) -> (i32, i32) {
    %c0_i32 = arith.constant 0 : i32
    %c0_i32_0 = arith.constant 0 : i32
    return %arg0, %c0_i32 : i32, i32
  }
  func.func @transform_2(%arg0: i32) -> (i32, i32) {
    %c0_i32 = arith.constant 0 : i32
    %c0_i32_0 = arith.constant 0 : i32
    %c0_i32_1 = arith.constant 0 : i32
    return %c0_i32, %c0_i32_0 : i32, i32
  }
  func.func @transform_3(%arg0: i32) -> (i32, i32) {
    %c0_i32 = arith.constant 0 : i32
    %c0_i32_0 = arith.constant 0 : i32
    return %arg0, %c0_i32 : i32, i32
  }
}

</mosaic_0001>

<bundles_post_ra>
// kernel: node_update_forward.5
= control target key start
LH: loop header
LB: loop body
LE: loop exit
PB: predicated region body
PF: predicated region fallthrough
CT: control target
= control target key end

     0   :  { %14 = vsyncpa [#allocation3], 0  ;;  %s3240_s27 = smov 0   ;;  %s4052_s0 = inlined_call_operand.vmem [shape: f32[3], index: 0, kind: input, shape index: {}]   ;;  %s4053_s1 = inlined_call_operand.vmem [shape: f32[16,32], index: 1, kind: input, shape index: {}]   ;;  %s4054_s2 = inlined_call_operand.vmem [shape: f32[128,32], index: 2, kind: input, shape index: {}]   ;;  %s4055_s3 = inlined_call_operand.vmem [shape: bf16[8,32,256], index: 3, kind: input, shape index: {}]   ;;  %s4056_s4 = inlined_call_operand.vmem [shape: bf16[8,32,256], index: 4, kind: input, shape index: {}]   ;;  %s4057_s5 = inlined_call_operand.vmem [shape: f32[1,256], index: 5, kind: input, shape index: {}]   ;;  %s4058_s6 = inlined_call_operand.vmem [shape: f32[128,256], index: 6, kind: output, shape index: {0}]   ;;  %s4059_s7 = inlined_call_operand.vmem [shape: f32[2,8,128], index: 7, kind: output, shape index: {1}]   ;;  %s4060_s8 = inlined_call_operand.vmem [shape: f32[2,8,128], index: 8, kind: output, shape index: {2}]  }
   0x1 LB: > { %s3246_s28 = sadd.s32 4294967295, %s3190_s27   ;;  %p2707_p0 = scmp.ge.s32.totalorder %s3190_s27, 1  ;;  %s3190_s27 = sphi %s3240_s27, %s20_s27  }
   0x2   : > { %p239_p1 = scmp.lt.s32.totalorder %s3190_s27, 3  ;;  %s252_s9 = sshll.u32 %s4052_s0, 4  ;;  %s253_s9 = int_to_ptr.vmem [resolvable:$true] %s252_s9 }
   0x3   : > { %p3056_p3 = scmp.eq.s32.totalorder %s3246_s28, 0  ;;  %s3165_s11 = scalar_lea.vmem %s253_s9, 16 }
   0x4   : > { %p3253_p2 = pnand %p2707_p0, %p239_p1  ;;  %p3166_p6 = scmp.ne.s32.totalorder %s253_s9, %s3165_s11 }
   0x5   : > { %p3173_p10 = scmp.lt.s32.totalorder %s253_s9, %s253_s9  ;;  %p3174_p11 = scmp.lt.s32.totalorder %s3165_s11, %s3165_s11 }
   0x6   : > { %p3052_p4 = pneg %p3253_p2 }
   0x7   : > { %p3175_p12 = por %p3174_p11, %p3173_p10 }
   0x8   : > { %p3053_p5 = pnand %p3056_p3, %p3052_p4 }
   0xa   : > { %p3167_p7 = pneg %p3053_p5 }
   0xc   : > { %p3168_p8 = pnand %p3167_p7, %p3166_p6 }
   0xe   : > { %p3169_p9 = pneg %p3168_p8 }
  0x10   : > { %p3176_p13 = pnand %p3175_p12, %p3169_p9 }
  0x12   : > { %3179 = shalt.err (!%p3176_p13)
}
  0x13   : > { %s3192_s12 = smov [#allocation2]   ;;  %290 = sbr.rel (%p3253_p2) target bundleno = 696 (0x2b8), region = 44 }
  0x14   : > { %3055 = dma.vmem_to_smem (!%p3053_p5), %s253_s9, 16, %s3192_s12, [#allocation3]  }
  0x1a   : > { %3185 = dma.done.wait (%p3056_p3), [#allocation3], 16  }
  0x1b   : > { %3187 = vsyncadd (%p3056_p3), [#allocation3], 4294967280 }
  0x1c   : > { %296 = sfence }
  0x1d   : > { %v3069_v0 = vld [vmem:[%s4055_s3 + $0x24] ss:$8 sps:$4 sm:$0xff]   ;;  %p338_p0 = scmp.lt.s32.totalorder %s3246_s28, 1  ;;  %v3071_v1 = vld [vmem:[%s4055_s3 + $0x20] ss:$8 sps:$4 sm:$0xff]   ;;  %v3193_v2 = vmov 0  }
  0x1e   : > { %547 = vmatprep.mubr.bf16.mxu0 %v3193_v2  ;;  %s364_s17 = sld [smem:[#allocation2]]  ;;  %1236 = vmatprep.mubr.bf16.mxu1 %v3193_v2  ;;  %v3072_v3 = vld [vmem:[%s4056_s4 + $0x64] ss:$8 sps:$4 sm:$0xff]   ;;  %v3074_v4 = vld [vmem:[%s4056_s4 + $0x60] ss:$8 sps:$4 sm:$0xff]   ;;  %s2713_s10 = sshll.u32 %s3246_s28, 3 }
  0x1f   : > { %515 = vmatprep.subr.bf16.mxu0 %v3069_v0  ;;  %s339_s22 = scalar_select %p338_p0, %s3246_s28, 1  ;;  %v3075_v5 = vld [vmem:[%s4055_s3 + $0x34] ss:$8 sps:$4 sm:$0xff]   ;;  %v3077_v6 = vld [vmem:[%s4055_s3 + $0x30] ss:$8 sps:$4 sm:$0xff]   ;;  %1204 = vmatprep.subr.bf16.mxu1 %v3072_v3  ;;  %vm511_vm0 = vcmask 261120  }
  0x20   : > { %516 = vmatpush1.bf16.msra.mxu0 %v3071_v1  ;;  %v3078_v7 = vld [vmem:[%s4056_s4 + $0x74] ss:$8 sps:$4 sm:$0xff]   ;;  %1205 = vmatpush1.bf16.msra.mxu1 %v3074_v4  ;;  %v3080_v8 = vld [vmem:[%s4056_s4 + $0x70] ss:$8 sps:$4 sm:$0xff]   ;;  %s2720_s16 = sld [smem:[#allocation2 + $0x1]]  ;;  %p343_p1 = scmp.lt.s32.totalorder %s2713_s10, 15 }
  0x21   : > { %s3293_s9 = sshll.u32 %s339_s22, 3  ;;  %517 = vmatprep.subr.bf16.mxu0 %v3075_v5  ;;  %1206 = vmatprep.subr.bf16.mxu1 %v3078_v7  ;;  %v3083_v9 = vld [vmem:[%s4055_s3 + $0x4] ss:$8 sps:$4 sm:$0xff]   ;;  %s2721_s25 = sld [smem:[#allocation2 + $0x2]] }
  0x22   : > { %s341_s15 = scalar_lea.vmem %s4053_s1, %s3293_s9  ;;  %s4063_s10 = smov (!%p343_p1, %s2713_s10), 15  ;;  %v3098_v35 = vld [vmem:[%s4056_s4 + $0x84] ss:$8 sps:$4 sm:$0xff]  }
  0x23   : > { %v367_v10 = vld [vmem:[%s341_s15] sm:$0xff]  ;;  %s2714_s20 = sshll.u32 %s4063_s10, 3  ;;  %s2882_s26 = sshll.u32 %s3246_s28, 6 }
  0x24   : > { %518 = vmatpush1.bf16.msra.mxu0 %v3077_v6  ;;  %v3306_v11 = vstv %s364_s17  ;;  %1207 = vmatpush1.bf16.msra.mxu1 %v3080_v8  ;;  %s3317_s23 = scalar_lea.vmem %s4054_s2, %s2714_s20  ;;  %s2885_s28 = sshll.u32 %s4063_s10, 4 }
  0x25   : > { %579 = vmatprep.subr.bf16.mxu0 %v3083_v9  ;;  %v369_v12 = vsub.f32 %v367_v10, %v3306_v11  ;;  %v375_v15 = vld [vmem:[%s3317_s23] sm:$0xff]  ;;  %v376_v16 = vld [vmem:[%s3317_s23 + $0x8] sm:$0xff]  ;;  %v377_v17 = vld [vmem:[%s3317_s23 + $0x10] sm:$0xff]  ;;  %1433 = vmatprep.subr.bf16.mxu1 %v3098_v35  ;;  %s3887_s12 = scalar_lea.vmem %s4058_s6, %s2885_s28  ;;  %s358_s15 = scalar_lea.vmem %s4059_s7, %s3293_s9 }
  0x26   : > { %v3312_v13 = vstv %s2720_s16  ;;  %v383_v18 = vsub.f32 %v375_v15, %v3306_v11  ;;  %v384_v19 = vsub.f32 %v376_v16, %v3306_v11  ;;  %v378_v20 = vld [vmem:[%s3317_s23 + $0x18] sm:$0xff]  ;;  %v385_v21 = vsub.f32 %v377_v17, %v3306_v11  ;;  %v379_v22 = vld [vmem:[%s3317_s23 + $0x20] sm:$0xff]  ;;  %v380_v23 = vld [vmem:[%s3317_s23 + $0x28] sm:$0xff]  ;;  %s362_s20 = scalar_lea.vmem %s4060_s8, %s3293_s9 }
  0x27   : > { %v371_v14 = vmul.f32 %v3312_v13, %v369_v12  ;;  %v386_v25 = vsub.f32 %v378_v20, %v3306_v11  ;;  %v387_v26 = vsub.f32 %v379_v22, %v3306_v11  ;;  %v388_v27 = vsub.f32 %v380_v23, %v3306_v11  ;;  %v381_v46 = vld [vmem:[%s3317_s23 + $0x30] sm:$0xff]  ;;  %v382_v47 = vld [vmem:[%s3317_s23 + $0x38] sm:$0xff]  ;;  %v3081_v9 = vld [vmem:[%s4055_s3] ss:$8 sps:$4 sm:$0xff]  }
  0x28   : > { %v391_v28 = vmul.f32 %v383_v18, %v3312_v13  ;;  %v392_v29 = vmul.f32 %v384_v19, %v3312_v13  ;;  %v393_v30 = vmul.f32 %v385_v21, %v3312_v13  ;;  %v389_v57 = vsub.f32 %v381_v46, %v3306_v11  ;;  %v3086_v16 = vld [vmem:[%s4055_s3 + $0x14] ss:$8 sps:$4 sm:$0xff]   ;;  %v3084_v22 = vld [vmem:[%s4055_s3 + $0x10] ss:$8 sps:$4 sm:$0xff]   ;;  %v3096_v23 = vld [vmem:[%s4056_s4 + $0x80] ss:$8 sps:$4 sm:$0xff]  }
  0x29   : > { %v372_v24 = vmax.f32 %v371_v14, 0.0  ;;  %v394_v32 = vmul.f32 %v386_v25, %v3312_v13  ;;  %v395_v33 = vmul.f32 %v387_v26, %v3312_v13  ;;  %v396_v34 = vmul.f32 %v388_v27, %v3312_v13 }
  0x2a   : > { %v399_v36 = vmax.f32 %v391_v28, 0.0  ;;  %v400_v37 = vmax.f32 %v392_v29, 0.0  ;;  %v401_v38 = vmax.f32 %v393_v30, 0.0  ;;  %v390_v58 = vsub.f32 %v382_v47, %v3306_v11 }
  0x2b   : > { %v373_v31 = vmin.f32 %v372_v24, 255.0  ;;  %v402_v40 = vmax.f32 %v394_v32, 0.0  ;;  %v403_v41 = vmax.f32 %v395_v33, 0.0  ;;  %v404_v42 = vmax.f32 %v396_v34, 0.0  ;;  %v3101_v24 = vld [vmem:[%s4056_s4 + $0x94] ss:$8 sps:$4 sm:$0xff]  }
  0x2c   : > { %v407_v43 = vmin.f32 %v399_v36, 255.0  ;;  %v408_v44 = vmin.f32 %v400_v37, 255.0  ;;  %v409_v45 = vmin.f32 %v401_v38, 255.0  ;;  %v397_v8 = vmul.f32 %v389_v57, %v3312_v13  ;;  %v3099_v38 = vld [vmem:[%s4056_s4 + $0x90] ss:$8 sps:$4 sm:$0xff]  }
  0x2d   : > { %v3026_v39 = vtrunc.f32 %v373_v31  ;;  %v410_v49 = vmin.f32 %v402_v40, 255.0  ;;  %v411_v50 = vmin.f32 %v403_v41, 255.0  ;;  %v412_v51 = vmin.f32 %v404_v42, 255.0  ;;  %v3089_v31 = vld [vmem:[%s4056_s4 + $0x24] ss:$8 sps:$4 sm:$0xff]  }
  0x2e   : > { %v3028_v52 = vtrunc.f32 %v407_v43  ;;  %v3030_v53 = vtrunc.f32 %v408_v44  ;;  %v3032_v54 = vtrunc.f32 %v409_v45  ;;  %v398_v14 = vmul.f32 %v390_v58, %v3312_v13  ;;  %v3110_v42 = vld [vmem:[%s4056_s4 + $0xa4] ss:$8 sps:$4 sm:$0xff]  }
  0x2f   : > { %v3343_v48 = vcvt.f32.s32 %v3026_v39  ;;  %v3034_v56 = vtrunc.f32 %v410_v49  ;;  %v3036_v62 = vtrunc.f32 %v411_v50  ;;  %v3038_v1 = vtrunc.f32 %v412_v51 }
  0x30   : > { %v3348_v59 = vcvt.f32.s32 %v3028_v52  ;;  %v3350_v60 = vcvt.f32.s32 %v3030_v53  ;;  %v3352_v61 = vcvt.f32.s32 %v3032_v54  ;;  %v405_v27 = vmax.f32 %v397_v8, 0.0  ;;  %v3087_v52 = vld [vmem:[%s4056_s4 + $0x20] ss:$8 sps:$4 sm:$0xff]   ;;  %v3090_v8 = vld [vmem:[%s4056_s4 + $0x30] ss:$8 sps:$4 sm:$0xff]  }
  0x31   : > { %v454_v55 = vshra.s32 %v3343_v48, 1  ;;  %v3354_v0 = vcvt.f32.s32 %v3034_v56  ;;  %v3364_v12 = vcvt.f32.s32 %v3036_v62  ;;  %v3370_v19 = vcvt.f32.s32 %v3038_v1  ;;  %v3092_v62 = vld [vmem:[%s4056_s4 + $0x34] ss:$8 sps:$4 sm:$0xff]  }
  0x32   : > { %v1068_v3 = vshra.s32 %v3348_v59, 3  ;;  %v1069_v4 = vshra.s32 %v3350_v60, 3  ;;  %v1070_v5 = vshra.s32 %v3352_v61, 3  ;;  %v423_v13 = vand.u32 1, %v3343_v48 }
  0x33   : > { %v455_v63 = vand.u32 1, %v454_v55  ;;  %v1071_v7 = vshra.s32 %v3354_v0, 3  ;;  %v1072_v26 = vshra.s32 %v3364_v12, 3  ;;  %v406_v28 = vmax.f32 %v398_v14, 0.0 }
  0x34   : > { %v1076_v10 = vand.u32 1, %v1068_v3  ;;  %v1077_v11 = vand.u32 1, %v1069_v4  ;;  %v1078_v17 = vand.u32 1, %v1070_v5  ;;  %v1073_v32 = vshra.s32 %v3370_v19, 3 }
  0x35   : > { %v456_v6 = vcvt.s32.f32 %v455_v63  ;;  %v1079_v18 = vand.u32 1, %v1071_v7  ;;  %v413_v33 = vmin.f32 %v405_v27, 255.0  ;;  %v414_v34 = vmin.f32 %v406_v28, 255.0 }
  0x36   : > { %v1084_v20 = vcvt.s32.f32 %v1076_v10  ;;  %v1085_v21 = vcvt.s32.f32 %v1077_v11  ;;  %v1086_v29 = vcvt.s32.f32 %v1078_v17  ;;  %v424_v35 = vcvt.s32.f32 %v423_v13 }
  0x37   : > { %v457_v15 = vpack.c.bf16 %v456_v6, %v456_v6  ;;  %v1087_v30 = vcvt.s32.f32 %v1079_v18  ;;  %v458_v36 = vshra.s32 %v3348_v59, 1  ;;  %v459_v37 = vshra.s32 %v3350_v60, 1 }
  0x38   : > { %v1092_v25 = vpack.c.bf16 %v1085_v21, %v1084_v20  ;;  %v1080_v39 = vand.u32 1, %v1072_v26  ;;  %v3040_v40 = vtrunc.f32 %v413_v33  ;;  %v3042_v41 = vtrunc.f32 %v414_v34 }
  0x39   : > { %2730 = vmatmul.mubr.msk.bf16.vlgmr.msra.gmra.mrb[0].mxu0 %vm511_vm0, %v457_v15  ;;  %v1093_v43 = vpack.c.bf16 %v1087_v30, %v1086_v29  ;;  %v1081_v44 = vand.u32 1, %v1073_v32  ;;  %v460_v45 = vshra.s32 %v3352_v61, 1  ;;  %v461_v46 = vshra.s32 %v3354_v0, 1  ;;  %v3095_v15 = vld [vmem:[%s4056_s4 + $0x4] ss:$8 sps:$4 sm:$0xff]  }
  0x3a   : > { %580 = vmatpush1.bf16.msra.mxu0 %v3081_v9  ;;  %611 = vmatprep.mubr.bf16.mxu0 %v3193_v2  ;;  %v3401_v47 = vcvt.f32.s32 %v3040_v40  ;;  %v3403_v49 = vcvt.f32.s32 %v3042_v41  ;;  %v1297_v50 = vshra.s32 %v3348_v59, 4  ;;  %v1298_v51 = vshra.s32 %v3350_v60, 4 }
  0x3b   : > { %581 = vmatprep.subr.bf16.mxu0 %v3086_v16  ;;  %2794 = vmatmul.mubr.msk.bf16.vlgmr.msra.gmra.mrb[0].mxu1 %vm511_vm0, %v1092_v25  ;;  %v425_v53 = vpack.c.bf16 %v424_v35, %v424_v35  ;;  %v466_v54 = vand.u32 1, %v458_v36  ;;  %v467_v55 = vand.u32 1, %v459_v37  ;;  %v1088_v56 = vcvt.s32.f32 %v1080_v39  ;;  %v3104_v36 = vld [vmem:[%s4056_s4 + $0x14] ss:$8 sps:$4 sm:$0xff]  }
  0x3c   : > { %1246 = vmatprep.mubr.bf16.mxu1 %v3193_v2  ;;  %1434 = vmatpush1.bf16.msra.mxu1 %v3096_v23  ;;  %v462_v57 = vshra.s32 %v3364_v12, 1  ;;  %v463_v58 = vshra.s32 %v3370_v19, 1  ;;  %v1089_v63 = vcvt.s32.f32 %v1081_v44  ;;  %v1074_v1 = vshra.s32 %v3401_v47, 3  ;;  %v3093_v23 = vld [vmem:[%s4056_s4] ss:$8 sps:$4 sm:$0xff]  }
  0x3d   : > { %1435 = vmatprep.subr.bf16.mxu1 %v3101_v24  ;;  %v1075_v3 = vshra.s32 %v3403_v49, 3  ;;  %v468_v4 = vand.u32 1, %v460_v45  ;;  %v469_v5 = vand.u32 1, %v461_v46  ;;  %v1305_v6 = vand.u32 1, %v1297_v50  ;;  %v3102_v45 = vld [vmem:[%s4056_s4 + $0x10] ss:$8 sps:$4 sm:$0xff]  }
  0x3e   : > { %582 = vmatpush1.bf16.msra.mxu0 %v3084_v22  ;;  %v1306_v7 = vand.u32 1, %v1298_v51  ;;  %v474_v9 = vcvt.s32.f32 %v466_v54  ;;  %v475_v10 = vcvt.s32.f32 %v467_v55  ;;  %v1299_v11 = vshra.s32 %v3352_v61, 4  ;;  %v3107_v54 = vld [vmem:[%s4055_s3 + $0x44] ss:$8 sps:$4 sm:$0xff]  }
  0x3f   : > { %657 = vmatprep.subr.bf16.mxu0 %v3089_v31  ;;  %v1300_v14 = vshra.s32 %v3354_v0, 4  ;;  %v470_v16 = vand.u32 1, %v462_v57  ;;  %v471_v17 = vand.u32 1, %v463_v58  ;;  %v1094_v18 = vpack.c.bf16 %v1089_v63, %v1088_v56 }
  0x40   : > { %1436 = vmatpush1.bf16.msra.mxu1 %v3099_v38  ;;  %v1082_v20 = vand.u32 1, %v1074_v1  ;;  %v1083_v21 = vand.u32 1, %v1075_v3  ;;  %v476_v22 = vcvt.s32.f32 %v468_v4  ;;  %v477_v13 = vcvt.s32.f32 %v469_v5 }
  0x41   : > { %1662 = vmatprep.subr.bf16.mxu1 %v3110_v42  ;;  %v1313_v24 = vcvt.s32.f32 %v1305_v6  ;;  %v1314_v25 = vcvt.s32.f32 %v1306_v7  ;;  %v464_v26 = vshra.s32 %v3401_v47, 1  ;;  %v482_v27 = vpack.c.bf16 %v475_v10, %v474_v9 }
  0x42   : > { %v1307_v28 = vand.u32 1, %v1299_v11  ;;  %v1308_v29 = vand.u32 1, %v1300_v14  ;;  %v465_v30 = vshra.s32 %v3403_v49, 1  ;;  %v478_v31 = vcvt.s32.f32 %v470_v16 }
  0x43   : > { %2795 = vmatmul.mubr.msk.bf16.gmra.mrb[4].mxu1 %vm511_vm0, %v1093_v43  ;;  %v479_v32 = vcvt.s32.f32 %v471_v17  ;;  %v1301_v33 = vshra.s32 %v3364_v12, 4  ;;  %v1090_v34 = vcvt.s32.f32 %v1082_v20  ;;  %v1091_v35 = vcvt.s32.f32 %v1083_v21 }
  0x44   : > { %1256 = vmatprep.mubr.bf16.mxu1 %v3193_v2  ;;  %v483_v37 = vpack.c.bf16 %v477_v13, %v476_v22  ;;  %v3439_v38 = vpack.c.bf16 %v1314_v25, %v1313_v24  ;;  %v472_v39 = vand.u32 1, %v464_v26  ;;  %v1526_v40 = vshra.s32 %v3348_v59, 5 }
  0x45   : > { %2735 = vmatmul.mubr.msk.bf16.vlgmr.msra.gmra.mrb[0].mxu0 %vm511_vm0, %v425_v53  ;;  %v1315_v41 = vcvt.s32.f32 %v1307_v28  ;;  %v1316_v42 = vcvt.s32.f32 %v1308_v29  ;;  %v473_v43 = vand.u32 1, %v465_v30  ;;  %v1527_v44 = vshra.s32 %v3350_v60, 5 }
  0x46   : > { %658 = vmatpush1.bf16.msra.mxu0 %v3087_v52  ;;  %689 = vmatprep.mubr.bf16.mxu0 %v3193_v2  ;;  %v3449_v46 = vpack.c.bf16 %v479_v32, %v478_v31  ;;  %v1302_v50 = vshra.s32 %v3370_v19, 4  ;;  %v3452_v51 = vand.u32 1, %v1301_v33  ;;  %v1534_v52 = vand.u32 1, %v1526_v40 }
  0x47   : > { %659 = vmatprep.subr.bf16.mxu0 %v3092_v62  ;;  %v1095_v53 = vpack.c.bf16 %v1091_v35, %v1090_v34  ;;  %v426_v55 = vand.u32 1, %v3348_v59  ;;  %v1535_v56 = vand.u32 1, %v1527_v44  ;;  %v1528_v57 = vshra.s32 %v3352_v61, 5 }
  0x48   : > { %v480_v58 = vcvt.s32.f32 %v472_v39  ;;  %v427_v62 = vand.u32 1, %v3350_v60  ;;  %v1542_v63 = vcvt.s32.f32 %v1534_v52  ;;  %v1529_v1 = vshra.s32 %v3354_v0, 5 }
  0x49   : > { %v3461_v3 = vpack.c.bf16 %v1316_v42, %v1315_v41  ;;  %v481_v4 = vcvt.s32.f32 %v473_v43  ;;  %v1543_v5 = vcvt.s32.f32 %v1535_v56  ;;  %v1536_v6 = vand.u32 1, %v1528_v57  ;;  %v3108_v42 = vld [vmem:[%s4056_s4 + $0xa0] ss:$8 sps:$4 sm:$0xff]  }
  0x4a   : > { %660 = vmatpush1.bf16.msra.mxu0 %v3090_v8  ;;  %v3463_v7 = vand.u32 1, %v1302_v50  ;;  %v1537_v8 = vand.u32 1, %v1529_v1  ;;  %v1530_v9 = vshra.s32 %v3364_v12, 5  ;;  %v1531_v10 = vshra.s32 %v3370_v19, 5 }
  0x4b   : > { %762 = vmatprep.subr.bf16.mxu0 %v3095_v15  ;;  %2796 = vmatmul.mubr.msk.bf16.gmra.mrb[8].mxu1 %vm511_vm0, %v1094_v18  ;;  %v1317_v11 = vcvt.s32.f32 %v3452_v51  ;;  %v3468_v14 = vcvt.s32.f32 %v426_v55  ;;  %v3470_v15 = vpack.c.bf16 %v1543_v5, %v1542_v63  ;;  %v1544_v16 = vcvt.s32.f32 %v1536_v6  ;;  %v3105_v51 = vld [vmem:[%s4055_s3 + $0x40] ss:$8 sps:$4 sm:$0xff]  }
  0x4c   : > { %1266 = vmatprep.mubr.bf16.mxu1 %v3193_v2  ;;  %v3473_v17 = vcvt.s32.f32 %v427_v62  ;;  %v1545_v18 = vcvt.s32.f32 %v1537_v8  ;;  %v1538_v20 = vand.u32 1, %v1530_v9  ;;  %v1539_v21 = vand.u32 1, %v1531_v10 }
  0x4d   : > { %2744 = vmatmul.mubr.msk.bf16.vlgmr.msra.gmra.mrb[4].mxu0 %vm511_vm0, %v482_v27  ;;  %v1303_v22 = vshra.s32 %v3401_v47, 4  ;;  %v1533_v13 = vshra.s32 %v3403_v49, 5  ;;  %v839_v24 = vshra.s32 %v3348_v59, 2  ;;  %v1304_v25 = vshra.s32 %v3403_v49, 4 }
  0x4e   : > { %763 = vmatpush1.bf16.msra.mxu0 %v3093_v23  ;;  %699 = vmatprep.mubr.bf16.mxu0 %v3193_v2  ;;  %v1532_v23 = vshra.s32 %v3401_v47, 5  ;;  %v3483_v26 = vpack.c.bf16 %v1545_v18, %v1544_v16  ;;  %v1546_v27 = vcvt.s32.f32 %v1538_v20  ;;  %v1547_v28 = vcvt.s32.f32 %v1539_v21  ;;  %v3125_v16 = vld [vmem:[%s4056_s4 + $0xc4] ss:$8 sps:$4 sm:$0xff]  }
  0x4f   : > { %764 = vmatprep.subr.bf16.mxu0 %v3104_v36  ;;  %v3485_v29 = vpack.c.bf16 %v481_v4, %v480_v58  ;;  %v1541_v31 = vand.u32 1, %v1533_v13  ;;  %v840_v32 = vshra.s32 %v3350_v60, 2  ;;  %v847_v34 = vand.u32 1, %v839_v24 }
  0x50   : > { %v1540_v30 = vand.u32 1, %v1532_v23  ;;  %v3488_v33 = vpack.c.bf16 %v1547_v28, %v1546_v27  ;;  %v1755_v35 = vshra.s32 %v3348_v59, 6  ;;  %v1756_v36 = vshra.s32 %v3350_v60, 6 }
  0x51   : > { %v1549_v40 = vcvt.s32.f32 %v1541_v31  ;;  %v848_v41 = vand.u32 1, %v840_v32  ;;  %v855_v43 = vcvt.s32.f32 %v847_v34  ;;  %v841_v50 = vshra.s32 %v3352_v61, 2 }
  0x52   : > { %765 = vmatpush1.bf16.msra.mxu0 %v3102_v45  ;;  %v1548_v39 = vcvt.s32.f32 %v1540_v30  ;;  %v1763_v44 = vand.u32 1, %v1755_v35  ;;  %v1764_v45 = vand.u32 1, %v1756_v36  ;;  %v428_v52 = vand.u32 1, %v3352_v61 }
  0x53   : > { %895 = vmatprep.subr.bf16.mxu0 %v3107_v54  ;;  %2797 = vmatmul.mubr.msk.bf16.gmra.mrb[12].mxu1 %vm511_vm0, %v1095_v53  ;;  %v3113_v53 = vld [vmem:[%s4056_s4 + $0xb4] ss:$8 sps:$4 sm:$0xff]   ;;  %v856_v55 = vcvt.s32.f32 %v848_v41  ;;  %v842_v56 = vshra.s32 %v3354_v0, 2  ;;  %v849_v62 = vand.u32 1, %v841_v50  ;;  %v1757_v63 = vshra.s32 %v3352_v61, 6 }
  0x54   : > { %1465 = vmatprep.mubr.bf16.mxu1 %v3193_v2  ;;  %v3501_v54 = vpack.c.bf16 %v1549_v40, %v1548_v39  ;;  %v1771_v57 = vcvt.s32.f32 %v1763_v44  ;;  %v1772_v58 = vcvt.s32.f32 %v1764_v45  ;;  %v1758_v5 = vshra.s32 %v3354_v0, 6 }
  0x55   : > { %2745 = vmatmul.mubr.msk.bf16.gmra.mrb[8].mxu0 %vm511_vm0, %v483_v37  ;;  %v1318_v37 = vcvt.s32.f32 %v3463_v7  ;;  %v3510_v1 = vpack.c.bf16 %v856_v55, %v855_v43  ;;  %v850_v4 = vand.u32 1, %v842_v56  ;;  %v843_v6 = vshra.s32 %v3364_v12, 2 }
  0x56   : > { %709 = vmatprep.mubr.bf16.mxu0 %v3193_v2  ;;  %v3518_v8 = vpack.c.bf16 %v1772_v58, %v1771_v57  ;;  %v857_v9 = vcvt.s32.f32 %v849_v62  ;;  %v844_v10 = vshra.s32 %v3370_v19, 2  ;;  %v1766_v20 = vand.u32 1, %v1758_v5 }
  0x57   : > { %v858_v18 = vcvt.s32.f32 %v850_v4  ;;  %v851_v21 = vand.u32 1, %v843_v6  ;;  %v1759_v23 = vshra.s32 %v3364_v12, 6  ;;  %v1760_v27 = vshra.s32 %v3370_v19, 6 }
  0x58   : > { %v852_v24 = vand.u32 1, %v844_v10  ;;  %v845_v28 = vshra.s32 %v3401_v47, 2  ;;  %v1774_v31 = vcvt.s32.f32 %v1766_v20  ;;  %v846_v39 = vshra.s32 %v3403_v49, 2 }
  0x59   : > { %v3527_v30 = vpack.c.bf16 %v858_v18, %v857_v9  ;;  %v859_v32 = vcvt.s32.f32 %v851_v21  ;;  %v1767_v34 = vand.u32 1, %v1759_v23  ;;  %v1768_v36 = vand.u32 1, %v1760_v27 }
  0x5a   : > { %v860_v35 = vcvt.s32.f32 %v852_v24  ;;  %v853_v40 = vand.u32 1, %v845_v28  ;;  %v1761_v43 = vshra.s32 %v3401_v47, 6  ;;  %v1762_v44 = vshra.s32 %v3403_v49, 6 }
  0x5b   : > { %2815 = vmatmul.mubr.msk.bf16.vlgmr.msra.gmra.mrb[0].mxu1 %vm511_vm0, %v3439_v38  ;;  %v3111_v38 = vld [vmem:[%s4056_s4 + $0xb0] ss:$8 sps:$4 sm:$0xff]   ;;  %v1776_v50 = vcvt.s32.f32 %v1768_v36  ;;  %v429_v56 = vand.u32 1, %v3354_v0  ;;  %v1984_v62 = vshra.s32 %v3348_v59, 7  ;;  %v1985_v5 = vshra.s32 %v3350_v60, 7 }
  0x5c   : > { %1475 = vmatprep.mubr.bf16.mxu1 %v3193_v2  ;;  %1663 = vmatpush1.bf16.msra.mxu1 %v3108_v42  ;;  %v1775_v42 = vcvt.s32.f32 %v1767_v34  ;;  %v3536_v45 = vpack.c.bf16 %v860_v35, %v859_v32  ;;  %v861_v55 = vcvt.s32.f32 %v853_v40  ;;  %v1769_v57 = vand.u32 1, %v1761_v43  ;;  %v3114_v32 = vld [vmem:[%s4055_s3 + $0x50] ss:$8 sps:$4 sm:$0xff]   ;;  %v3119_v36 = vld [vmem:[%s4056_s4 + $0x44] ss:$8 sps:$4 sm:$0xff]  }
  0x5d   : > { %2746 = vmatmul.mubr.msk.bf16.gmra.mrb[12].mxu0 %vm511_vm0, %v3449_v46  ;;  %v1765_v46 = vand.u32 1, %v1757_v63  ;;  %1664 = vmatprep.subr.bf16.mxu1 %v3113_v53  ;;  %v854_v53 = vand.u32 1, %v846_v39  ;;  %v1770_v58 = vand.u32 1, %v1762_v44  ;;  %v1992_v9 = vand.u32 1, %v1984_v62 }
  0x5e   : > { %719 = vmatprep.mubr.bf16.mxu0 %v3193_v2  ;;  %v3546_v63 = vpack.c.bf16 %v1776_v50, %v1775_v42  ;;  %v1777_v6 = vcvt.s32.f32 %v1769_v57  ;;  %v1323_v59 = vpack.c.bf16 %v1318_v37, %v1317_v11  ;;  %v1993_v10 = vand.u32 1, %v1985_v5 }
  0x5f   : > { %v1773_v13 = vcvt.s32.f32 %v1765_v46  ;;  %v862_v4 = vcvt.s32.f32 %v854_v53  ;;  %v2000_v18 = vcvt.s32.f32 %v1992_v9  ;;  %v1988_v11 = vshra.s32 %v3364_v12, 7 }
  0x60   : > { %1665 = vmatpush1.bf16.msra.mxu1 %v3111_v38  ;;  %v1778_v38 = vcvt.s32.f32 %v1770_v58  ;;  %v2001_v20 = vcvt.s32.f32 %v1993_v10  ;;  %v436_v21 = vcvt.s32.f32 %v428_v52  ;;  %v1989_v23 = vshra.s32 %v3370_v19, 7 }
  0x61   : > { %1891 = vmatprep.subr.bf16.mxu1 %v3125_v16  ;;  %v3530_v41 = vpack.c.bf16 %v1774_v31, %v1773_v13  ;;  %v3555_v46 = vpack.c.bf16 %v862_v4, %v861_v55  ;;  %v442_v16 = vpack.c.bf16 %v3473_v17, %v3468_v14  ;;  %v3116_v14 = vld [vmem:[%s4055_s3 + $0x54] ss:$8 sps:$4 sm:$0xff]   ;;  %v1996_v27 = vand.u32 1, %v1988_v11  ;;  %v3140_v11 = vld [vmem:[%s4055_s3 + $0x84] ss:$8 sps:$4 sm:$0xff]  }
  0x62   : > { %v3560_v60 = vpack.c.bf16 %v1778_v38, %v1777_v6  ;;  %v3574_v13 = vpack.c.bf16 %v2001_v20, %v2000_v18  ;;  %v1997_v28 = vand.u32 1, %v1989_v23  ;;  %v1990_v31 = vshra.s32 %v3401_v47, 7  ;;  %v3131_v6 = vld [vmem:[%s4056_s4 + $0xd4] ss:$8 sps:$4 sm:$0xff]   ;;  %v3117_v18 = vld [vmem:[%s4056_s4 + $0x40] ss:$8 sps:$4 sm:$0xff]  }
  0x63   : > { %2816 = vmatmul.mubr.msk.bf16.gmra.mrb[4].mxu1 %vm511_vm0, %v3461_v3  ;;  %v1311_v3 = vand.u32 1, %v1303_v22  ;;  %v1986_v22 = vshra.s32 %v3352_v61, 7  ;;  %v437_v61 = vcvt.s32.f32 %v429_v56  ;;  %v2004_v34 = vcvt.s32.f32 %v1996_v27  ;;  %v3134_v20 = vld [vmem:[%s4055_s3 + $0x74] ss:$8 sps:$4 sm:$0xff]   ;;  %v3149_v23 = vld [vmem:[%s4055_s3 + $0xa4] ss:$8 sps:$4 sm:$0xff]  }
  0x64   : > { %1485 = vmatprep.mubr.bf16.mxu1 %v3193_v2  ;;  %v1991_v35 = vshra.s32 %v3403_v49, 7  ;;  %v2005_v40 = vcvt.s32.f32 %v1997_v28  ;;  %v1998_v42 = vand.u32 1, %v1990_v31  ;;  %v430_v44 = vand.u32 1, %v3364_v12  ;;  %v3147_v27 = vld [vmem:[%s4055_s3 + $0xa0] ss:$8 sps:$4 sm:$0xff]  }
  0x65   : > { %2747 = vmatmul.mubr.msk.bf16.gmra.mrb[16].mxu0 %vm511_vm0, %v3485_v29  ;;  %v1312_v29 = vand.u32 1, %v1304_v25  ;;  %v1987_v25 = vshra.s32 %v3354_v0, 7  ;;  %v1994_v7 = vand.u32 1, %v1986_v22  ;;  %v1319_v37 = vcvt.s32.f32 %v1311_v3  ;;  %v3155_v28 = vld [vmem:[%s4055_s3 + $0xc4] ss:$8 sps:$4 sm:$0xff]  }
  0x66   : > { %794 = vmatprep.mubr.bf16.mxu0 %v3193_v2  ;;  %v1999_v50 = vand.u32 1, %v1991_v35  ;;  %v443_v53 = vpack.c.bf16 %v437_v61, %v436_v21  ;;  %v431_v55 = vand.u32 1, %v3370_v19  ;;  %v3591_v56 = vpack.c.bf16 %v2005_v40, %v2004_v34  ;;  %v3152_v61 = vld [vmem:[%s4055_s3 + $0xb4] ss:$8 sps:$4 sm:$0xff]   ;;  %v3153_v35 = vld [vmem:[%s4055_s3 + $0xc0] ss:$8 sps:$4 sm:$0xff]  }
  0x67   : > { %v1995_v17 = vand.u32 1, %v1987_v25  ;;  %v1320_v0 = vcvt.s32.f32 %v1312_v29  ;;  %v2002_v24 = vcvt.s32.f32 %v1994_v7  ;;  %v2006_v57 = vcvt.s32.f32 %v1998_v42  ;;  %v3123_v29 = vld [vmem:[%s4056_s4 + $0xc0] ss:$8 sps:$4 sm:$0xff]   ;;  %v3122_v25 = vld [vmem:[%s4056_s4 + $0x54] ss:$8 sps:$4 sm:$0xff]  }
  0x68   : > { %v2007_v58 = vcvt.s32.f32 %v1999_v50  ;;  %v438_v3 = vcvt.s32.f32 %v430_v44  ;;  %v439_v12 = vcvt.s32.f32 %v431_v55  ;;  %v432_v19 = vand.u32 1, %v3401_v47  ;;  %v3132_v7 = vld [vmem:[%s4055_s3 + $0x70] ss:$8 sps:$4 sm:$0xff]   ;;  %v3161_v42 = vld [vmem:[%s4055_s3 + $0xe4] ss:$8 sps:$4 sm:$0xff]  }
  0x69   : > { %v2003_v52 = vcvt.s32.f32 %v1995_v17  ;;  %v1324_v43 = vpack.c.bf16 %v1320_v0, %v1319_v37  ;;  %v433_v5 = vand.u32 1, %v3403_v49  ;;  %v835_v47 = vshra.s32 %v3343_v48, 2  ;;  %v3129_v49 = vld [vmem:[%s4056_s4 + $0xd0] ss:$8 sps:$4 sm:$0xff]   ;;  %v3146_v17 = vld [vmem:[%s4055_s3 + $0x94] ss:$8 sps:$4 sm:$0xff]  }
  0x6a   : > { %v3594_v62 = vpack.c.bf16 %v2007_v58, %v2006_v57  ;;  %v444_v4 = vpack.c.bf16 %v439_v12, %v438_v3  ;;  %v440_v38 = vcvt.s32.f32 %v432_v19  ;;  %v3141_v37 = vld [vmem:[%s4056_s4 + $0xf0] ss:$8 sps:$4 sm:$0xff]   ;;  %v1751_v34 = vshra.s32 %v3343_v48, 6  ;;  %v3164_v55 = vld [vmem:[%s4055_s3 + $0xf4] ss:$8 sps:$4 sm:$0xff]  }
  0x6b   : > { %2817 = vmatmul.mubr.msk.bf16.gmra.mrb[8].mxu1 %vm511_vm0, %v1323_v59  ;;  %v3587_v39 = vpack.c.bf16 %v2003_v52, %v2002_v24  ;;  %v441_v9 = vcvt.s32.f32 %v433_v5  ;;  %v836_v10 = vand.u32 1, %v835_v47  ;;  %v1522_v24 = vshra.s32 %v3343_v48, 5  ;;  %v3156_v40 = vld [vmem:[%s4055_s3 + $0xd0] ss:$8 sps:$4 sm:$0xff]  }
  0x6c   : > { %1495 = vmatprep.mubr.bf16.mxu1 %v3193_v2  ;;  %v1980_v50 = vshra.s32 %v3343_v48, 7  ;;  %v3162_v57 = vld [vmem:[%s4055_s3 + $0xf0] ss:$8 sps:$4 sm:$0xff]  }
  0x6d   : > { %2752 = vmatmul.mubr.msk.bf16.vlgmr.msra.gmra.mrb[4].mxu0 %vm511_vm0, %v442_v16  ;;  %v445_v59 = vpack.c.bf16 %v441_v9, %v440_v38  ;;  %v837_v22 = vcvt.s32.f32 %v836_v10  ;;  %v1523_v52 = vand.u32 1, %v1522_v24 }
  0x6e   : > { %896 = vmatpush1.bf16.msra.mxu0 %v3105_v51  ;;  %804 = vmatprep.mubr.bf16.mxu0 %v3193_v2  ;;  %v3128_v51 = vld [vmem:[%s4055_s3 + $0x64] ss:$8 sps:$4 sm:$0xff]  }
  0x6f   : > { %897 = vmatprep.subr.bf16.mxu0 %v3116_v14  ;;  %v838_v16 = vpack.c.bf16 %v837_v22, %v837_v22  ;;  %v3138_v14 = vld [vmem:[%s4055_s3 + $0x80] ss:$8 sps:$4 sm:$0xff]   ;;  %v1524_v31 = vcvt.s32.f32 %v1523_v52 }
  0x72   : > { %898 = vmatpush1.bf16.msra.mxu0 %v3114_v32  ;;  %v1525_v32 = vpack.c.bf16 %v1524_v31, %v1524_v31 }
  0x73   : > { %975 = vmatprep.subr.bf16.mxu0 %v3119_v36  ;;  %2818 = vmatmul.mubr.msk.bf16.gmra.mrb[12].mxu1 %vm511_vm0, %v1324_v43  ;;  %v3158_v36 = vld [vmem:[%s4055_s3 + $0xd4] ss:$8 sps:$4 sm:$0xff]  }
  0x74   : > { %1694 = vmatprep.mubr.bf16.mxu1 %v3193_v2 }
  0x75   : > { %2753 = vmatmul.mubr.msk.bf16.gmra.mrb[8].mxu0 %vm511_vm0, %v443_v53  ;;  %v3159_v53 = vld [vmem:[%s4055_s3 + $0xe0] ss:$8 sps:$4 sm:$0xff]  }
  0x76   : > { %814 = vmatprep.mubr.bf16.mxu0 %v3193_v2 }
  0x7b   : > { %2836 = vmatmul.mubr.msk.bf16.vlgmr.msra.gmra.mrb[0].mxu1 %vm511_vm0, %v3470_v15  ;;  %v3137_v15 = vld [vmem:[%s4056_s4 + $0xe4] ss:$8 sps:$4 sm:$0xff]  }
  0x7c   : > { %1704 = vmatprep.mubr.bf16.mxu1 %v3193_v2  ;;  %1892 = vmatpush1.bf16.msra.mxu1 %v3123_v29 }
  0x7d   : > { %2754 = vmatmul.mubr.msk.bf16.gmra.mrb[12].mxu0 %vm511_vm0, %v444_v4  ;;  %1893 = vmatprep.subr.bf16.mxu1 %v3131_v6 }
  0x7e   : > { %824 = vmatprep.mubr.bf16.mxu0 %v3193_v2 }
  0x80   : > { %1894 = vmatpush1.bf16.msra.mxu1 %v3129_v49 }
  0x81   : > { %2120 = vmatprep.subr.bf16.mxu1 %v3137_v15 }
  0x83   : > { %2837 = vmatmul.mubr.msk.bf16.gmra.mrb[4].mxu1 %vm511_vm0, %v3483_v26  ;;  %v3120_v26 = vld [vmem:[%s4056_s4 + $0x50] ss:$8 sps:$4 sm:$0xff]  }
  0x84   : > { %1714 = vmatprep.mubr.bf16.mxu1 %v3193_v2 }
  0x85   : > { %2755 = vmatmul.mubr.msk.bf16.gmra.mrb[16].mxu0 %vm511_vm0, %v445_v59 }
  0x86   : > { %927 = vmatprep.mubr.bf16.mxu0 %v3193_v2 }
  0x8b   : > { %2838 = vmatmul.mubr.msk.bf16.gmra.mrb[8].mxu1 %vm511_vm0, %v3488_v33  ;;  %v3126_v33 = vld [vmem:[%s4055_s3 + $0x60] ss:$8 sps:$4 sm:$0xff]  }
  0x8c   : > { %1724 = vmatprep.mubr.bf16.mxu1 %v3193_v2 }
  0x8d   : > { %2764 = vmatmul.mubr.msk.bf16.vlgmr.msra.gmra.mrb[0].mxu0 %vm511_vm0, %v838_v16 }
  0x8e   : > { %976 = vmatpush1.bf16.msra.mxu0 %v3117_v18  ;;  %1007 = vmatprep.mubr.bf16.mxu0 %v3193_v2 }
  0x8f   : > { %977 = vmatprep.subr.bf16.mxu0 %v3122_v25 }
  0x92   : > { %978 = vmatpush1.bf16.msra.mxu0 %v3120_v26 }
  0x93   : > { %1124 = vmatprep.subr.bf16.mxu0 %v3128_v51  ;;  %2839 = vmatmul.mubr.msk.bf16.gmra.mrb[12].mxu1 %vm511_vm0, %v3501_v54  ;;  %v3135_v54 = vld [vmem:[%s4056_s4 + $0xe0] ss:$8 sps:$4 sm:$0xff]  }
  0x94   : > { %1923 = vmatprep.mubr.bf16.mxu1 %v3193_v2 }
  0x95   : > { %2773 = vmatmul.mubr.msk.bf16.vlgmr.msra.gmra.mrb[4].mxu0 %vm511_vm0, %v3510_v1  ;;  %v3143_v1 = vld [vmem:[%s4056_s4 + $0xf4] ss:$8 sps:$4 sm:$0xff]  }
  0x96   : > { %1125 = vmatpush1.bf16.msra.mxu0 %v3126_v33  ;;  %1017 = vmatprep.mubr.bf16.mxu0 %v3193_v2 }
  0x97   : > { %1126 = vmatprep.subr.bf16.mxu0 %v3134_v20 }
  0x9a   : > { %1127 = vmatpush1.bf16.msra.mxu0 %v3132_v7 }
  0x9b   : > { %1353 = vmatprep.subr.bf16.mxu0 %v3140_v11  ;;  %2857 = vmatmul.mubr.msk.bf16.vlgmr.msra.gmra.mrb[0].mxu1 %vm511_vm0, %v3518_v8  ;;  %v1064_v8 = vshra.s32 %v3343_v48, 3 }
  0x9c   : > { %1933 = vmatprep.mubr.bf16.mxu1 %v3193_v2  ;;  %2121 = vmatpush1.bf16.msra.mxu1 %v3135_v54 }
  0x9d   : > { %2774 = vmatmul.mubr.msk.bf16.gmra.mrb[8].mxu0 %vm511_vm0, %v3527_v30  ;;  %2122 = vmatprep.subr.bf16.mxu1 %v3143_v1  ;;  %v1065_v30 = vand.u32 1, %v1064_v8 }
  0x9e   : > { %1027 = vmatprep.mubr.bf16.mxu0 %v3193_v2 }
  0x9f   : > { %v1066_v21 = vcvt.s32.f32 %v1065_v30 }
  0xa0   : > { %2123 = vmatpush1.bf16.msra.mxu1 %v3141_v37 }
  0xa3   : > { %2858 = vmatmul.mubr.msk.bf16.gmra.mrb[4].mxu1 %vm511_vm0, %v3530_v41  ;;  %v1067_v41 = vpack.c.bf16 %v1066_v21, %v1066_v21 }
  0xa4   : > { %1943 = vmatprep.mubr.bf16.mxu1 %v3193_v2 }
  0xa5   : > { %2775 = vmatmul.mubr.msk.bf16.gmra.mrb[12].mxu0 %vm511_vm0, %v3536_v45  ;;  %v1293_v45 = vshra.s32 %v3343_v48, 4 }
  0xa6   : > { %1037 = vmatprep.mubr.bf16.mxu0 %v3193_v2 }
  0xab   : > { %2859 = vmatmul.mubr.msk.bf16.gmra.mrb[8].mxu1 %vm511_vm0, %v3546_v63  ;;  %v1294_v63 = vand.u32 1, %v1293_v45 }
  0xac   : > { %1953 = vmatprep.mubr.bf16.mxu1 %v3193_v2 }
  0xad   : > { %2776 = vmatmul.mubr.msk.bf16.gmra.mrb[16].mxu0 %vm511_vm0, %v3555_v46  ;;  %v3144_v46 = vld [vmem:[%s4055_s3 + $0x90] ss:$8 sps:$4 sm:$0xff]   ;;  %v1295_v0 = vcvt.s32.f32 %v1294_v63 }
  0xae   : > { %1156 = vmatprep.mubr.bf16.mxu0 %v3193_v2 }
  0xb3   : > { %2860 = vmatmul.mubr.msk.bf16.gmra.mrb[12].mxu1 %vm511_vm0, %v3560_v60  ;;  %v1296_v60 = vpack.c.bf16 %v1295_v0, %v1295_v0 }
  0xb4   : > { %2152 = vmatprep.mubr.bf16.mxu1 %v3193_v2 }
  0xb5   : > { %2785 = vmatmul.mubr.msk.bf16.vlgmr.msra.gmra.mrb[0].mxu0 %vm511_vm0, %v1067_v41 }
  0xb6   : > { %1354 = vmatpush1.bf16.msra.mxu0 %v3138_v14  ;;  %1385 = vmatprep.mubr.bf16.mxu0 %v3193_v2 }
  0xb7   : > { %1355 = vmatprep.subr.bf16.mxu0 %v3146_v17 }
  0xba   : > { %1356 = vmatpush1.bf16.msra.mxu0 %v3144_v46 }
  0xbb   : > { %1582 = vmatprep.subr.bf16.mxu0 %v3149_v23  ;;  %2878 = vmatmul.mubr.msk.bf16.vlgmr.msra.gmra.mrb[0].mxu1 %vm511_vm0, %v3574_v13  ;;  %v3150_v13 = vld [vmem:[%s4055_s3 + $0xb0] ss:$8 sps:$4 sm:$0xff]  }
  0xbc   : > { %2162 = vmatprep.mubr.bf16.mxu1 %v3193_v2 }
  0xc1   : > { %2806 = vmatmul.mubr.msk.bf16.vlgmr.msra.gmra.mrb[0].mxu0 %vm511_vm0, %v1296_v60 }
  0xc2   : > { %1583 = vmatpush1.bf16.msra.mxu0 %v3147_v27  ;;  %1614 = vmatprep.mubr.bf16.mxu0 %v3193_v2 }
  0xc3   : > { %1584 = vmatprep.subr.bf16.mxu0 %v3152_v61  ;;  %2879 = vmatmul.mubr.msk.bf16.gmra.mrb[4].mxu1 %vm511_vm0, %v3587_v39  ;;  %v1752_v39 = vand.u32 1, %v1751_v34 }
  0xc4   : > { %2172 = vmatprep.mubr.bf16.mxu1 %v3193_v2 }
  0xc5   : > { %v1753_v43 = vcvt.s32.f32 %v1752_v39 }
  0xc6   : > { %1585 = vmatpush1.bf16.msra.mxu0 %v3150_v13 }
  0xc7   : > { %1811 = vmatprep.subr.bf16.mxu0 %v3155_v28  ;;  %v1754_v44 = vpack.c.bf16 %v1753_v43, %v1753_v43 }
  0xcb   : > { %2880 = vmatmul.mubr.msk.bf16.gmra.mrb[8].mxu1 %vm511_vm0, %v3591_v56  ;;  %v1981_v56 = vand.u32 1, %v1980_v50 }
  0xcc   : > { %2182 = vmatprep.mubr.bf16.mxu1 %v3193_v2 }
  0xcd   : > { %2827 = vmatmul.mubr.msk.bf16.vlgmr.msra.gmra.mrb[0].mxu0 %vm511_vm0, %v1525_v32  ;;  %v1982_v48 = vcvt.s32.f32 %v1981_v56  ;;  %v3194_v32 = vmov 1966171168  }
  0xce   : > { %1812 = vmatpush1.bf16.msra.mxu0 %v3153_v35  ;;  %1843 = vmatprep.mubr.bf16.mxu0 %v3193_v2  ;;  %v2214_v34 = vunpack.c.l.s4 %v3194_v32  ;;  %v2216_v35 = vlaneseq }
  0xcf   : > { %1813 = vmatprep.subr.bf16.mxu0 %v3158_v36  ;;  %v1983_v58 = vpack.c.bf16 %v1982_v48, %v1982_v48 }
  0xd0   : > { %v2215_v36 = vunpack.c.0.s8 %v2214_v34  ;;  %v2217_v39 = vshrl.u32 %v2216_v35, 7 }
  0xd2   : > { %1814 = vmatpush1.bf16.msra.mxu0 %v3156_v40  ;;  %v3792_v43 = vsub.s32 0, %v2217_v39  ;;  %v2438_v56 = vadd.s32 16, %v2217_v39 }
  0xd3   : > { %2040 = vmatprep.subr.bf16.mxu0 %v3161_v42  ;;  %2881 = vmatmul.mubr.msk.bf16.gmra.mrb[12].mxu1 %vm511_vm0, %v3594_v62  ;;  %v2218_v42 = vsub.s32 %v2215_v36, %v2217_v39 }
  0xd9   : > { %2848 = vmatmul.mubr.msk.bf16.vlgmr.msra.gmra.mrb[0].mxu0 %vm511_vm0, %v1754_v44  ;;  %v3794_v44 = vsub.s32 1, %v2217_v39 }
  0xda   : > { %2041 = vmatpush1.bf16.msra.mxu0 %v3159_v53  ;;  %2072 = vmatprep.mubr.bf16.mxu0 %v3193_v2  ;;  %v2374_v53 = vld [vmem:[%s4057_s5] sm:$0x3] }
  0xdb   : > { %2042 = vmatprep.subr.bf16.mxu0 %v3164_v55  ;;  %v2437_v55 = vadd.s32 8, %v2217_v39 }
  0xde   : > { %2043 = vmatpush1.bf16.msra.mxu0 %v3162_v57  ;;  %v2440_v57 = vadd.s32 32, %v2217_v39 }
  0xe5   : > { %2869 = vmatmul.mubr.msk.bf16.vlgmr.msra.gmra.mrb[0].mxu0 %vm511_vm0, %v1983_v58 }
 0x168   : > { %v1009_v62 = vpop.f32.mrb[4].mxu0 }
 0x169   : > { %v1011_v3 = vpop.f32.mrb[5].mxu0 }
 0x16a   : > { %v1013_v12 = vpop.f32.mrb[6].mxu0 }
 0x16b   : > { %v1015_v4 = vpop.f32.mrb[7].mxu0 }
 0x170   : > { %v1019_v19 = vpop.f32.mrb[8].mxu0 }
 0x171   : > { %v1021_v5 = vpop.f32.mrb[9].mxu0 }
 0x172   : > { %v1023_v29 = vpop.f32.mrb[10].mxu0 }
 0x173   : > { %v1025_v6 = vpop.f32.mrb[11].mxu0 }
 0x178   : > { %v1029_v38 = vpop.f32.mrb[12].mxu0 }
 0x179   : > { %v1031_v9 = vpop.f32.mrb[13].mxu0 }
 0x17a   : > { %v1033_v47 = vpop.f32.mrb[14].mxu0 }
 0x17b   : > { %v1035_v49 = vpop.f32.mrb[15].mxu0 }
 0x180   : > { %v1039_v15 = vpop.f32.mrb[16].mxu0 }
 0x181   : > { %v1041_v2 = vpop.f32.mrb[17].mxu0 }
 0x182   : > { %v1043_v59 = vpop.f32.mrb[18].mxu0 }
 0x183   : > { %v1045_v10 = vpop.f32.mrb[19].mxu0 }
 0x18e   : > { %v2154_v22 = vpop.f32.mrb[0].mxu1 }
 0x18f   : > { %v3759_v16 = vadd.f32 %v2154_v22, %v1009_v62  ;;  %v2156_v18 = vpop.f32.mrb[1].mxu1  ;;  %v3799_v62 = vstv %s2721_s25 }
 0x190   : > { %v3761_v25 = vadd.f32 %v2156_v18, %v1011_v3  ;;  %v2158_v26 = vpop.f32.mrb[2].mxu1 }
 0x191   : > { %v3763_v51 = vadd.f32 %v2158_v26, %v1013_v12  ;;  %v2160_v33 = vpop.f32.mrb[3].mxu1  ;;  %v2444_v12 = vstv %s2882_s26 }
 0x192   : > { %v3765_v20 = vadd.f32 %v2160_v33, %v1015_v4 }
 0x196   : > { %v2164_v7 = vpop.f32.mrb[4].mxu1 }
 0x197   : > { %v3767_v11 = vadd.f32 %v2164_v7, %v1019_v19  ;;  %v2166_v54 = vpop.f32.mrb[5].mxu1  ;;  %v2439_v19 = vadd.s32 24, %v2217_v39 }
 0x198   : > { %v3769_v1 = vadd.f32 %v2166_v54, %v1021_v5  ;;  %v2168_v37 = vpop.f32.mrb[6].mxu1  ;;  %v2441_v5 = vadd.s32 40, %v2217_v39 }
 0x199   : > { %v3771_v8 = vadd.f32 %v2168_v37, %v1023_v29  ;;  %v2170_v30 = vpop.f32.mrb[7].mxu1  ;;  %v2442_v29 = vadd.s32 48, %v2217_v39  ;;  %v3815_v7 = vadd.s32 %v2444_v12, %v2439_v19 }
 0x19a   : > { %v3773_v21 = vadd.f32 %v2170_v30, %v1025_v6  ;;  %v2443_v6 = vadd.s32 56, %v2217_v39  ;;  %v3817_v54 = vadd.s32 %v2444_v12, %v2441_v5 }
 0x19b   : > { %v3819_v37 = vadd.s32 %v2444_v12, %v2442_v29  ;;  %vm2456_vm2 = vcmp.lt.s32.totalorder %v3815_v7, 128 }
 0x19c   : > { %v3821_v30 = vadd.s32 %v2444_v12, %v2443_v6  ;;  %vm2458_vm6 = vcmp.lt.s32.totalorder %v3817_v54, 128 }
 0x19d   : > { %vm2459_vm7 = vcmp.lt.s32.totalorder %v3819_v37, 128 }
 0x19e   : > { %v2174_v41 = vpop.f32.mrb[8].mxu1  ;;  %vm2460_vm8 = vcmp.lt.s32.totalorder %v3821_v30, 128 }
 0x19f   : > { %v3775_v45 = vadd.f32 %v2174_v41, %v1029_v38  ;;  %v2176_v14 = vpop.f32.mrb[9].mxu1 }
 0x1a0   : > { %v3777_v17 = vadd.f32 %v2176_v14, %v1031_v9  ;;  %v2178_v63 = vpop.f32.mrb[10].mxu1 }
 0x1a1   : > { %v3779_v46 = vadd.f32 %v2178_v63, %v1033_v47  ;;  %v2180_v23 = vpop.f32.mrb[11].mxu1  ;;  %v3802_v47 = vrot.slane %v2374_v53, %v3792_v43 }
 0x1a2   : > { %v3781_v0 = vadd.f32 %v2180_v23, %v1035_v49  ;;  %v3805_v49 = vrot.slane %v2374_v53, %v3794_v44 }
 0x1a6   : > { %v2184_v60 = vpop.f32.mrb[12].mxu1 }
 0x1a7   : > { %v3783_v24 = vadd.f32 %v2184_v60, %v1039_v15  ;;  %v2186_v27 = vpop.f32.mrb[13].mxu1  ;;  %v3807_v15 = vadd.s32 %v2444_v12, %v2217_v39 }
 0x1a8   : > { %v3785_v61 = vadd.f32 %v2186_v27, %v1041_v2  ;;  %v2188_v52 = vpop.f32.mrb[14].mxu1  ;;  %v3809_v2 = vadd.s32 %v2444_v12, %v2437_v55 }
 0x1a9   : > { %v3787_v13 = vadd.f32 %v2188_v52, %v1043_v59  ;;  %v2190_v28 = vpop.f32.mrb[15].mxu1  ;;  %v3811_v59 = vadd.s32 %v2444_v12, %v2438_v56  ;;  %vm2453_vm3 = vcmp.lt.s32.totalorder %v3807_v15, 128 }
 0x1aa   : > { %v3789_v31 = vadd.f32 %v2190_v28, %v1045_v10  ;;  %v3813_v10 = vadd.s32 %v2444_v12, %v2440_v57  ;;  %vm2454_vm4 = vcmp.lt.s32.totalorder %v3809_v2, 128 }
 0x1ab   : > { %vm2455_vm1 = vcmp.lt.s32.totalorder %v3811_v59, 128 }
 0x1ac   : > { %vm2457_vm5 = vcmp.lt.s32.totalorder %v3813_v10, 128 }
 0x1b8   : > { %v2074_v40 = vpop.f32.mrb[0].mxu0 }
 0x1b9   : > { %v2076_v50 = vpop.f32.mrb[1].mxu0 }
 0x1ba   : > { %v2211_v48 = vcombine.low %v2074_v40, %v2076_v50  ;;  %v2212_v58 = vcombine.high %v2074_v40, %v2076_v50  ;;  %v2078_v3 = vpop.f32.mrb[2].mxu0 }
 0x1bb   : > { %v2079_v4 = vpop.f32.mrb[3].mxu0 }
 0x1bc   : > { %v2219_v38 = vrot.slane %v2211_v48, %v2218_v42  ;;  %v2226_v9 = vrot.slane %v2212_v58, %v2218_v42 }
 0x1be   : > { %v2227_v22 = vcombine.high %v2219_v38, %v2219_v38  ;;  %v2228_v18 = vcombine.high %v2226_v9, %v2226_v9  ;;  %v2235_v26 = vrot.slane %v2219_v38, %v2218_v42  ;;  %v2242_v33 = vrot.slane %v2226_v9, %v2218_v42 }
 0x1c0   : > { %v2249_v41 = vrot.slane %v2227_v22, %v2218_v42  ;;  %v2256_v14 = vrot.slane %v2228_v18, %v2218_v42  ;;  %v2257_v63 = vcombine.high %v2235_v26, %v2235_v26  ;;  %v2258_v23 = vcombine.high %v2242_v33, %v2242_v33 }
 0x1c1   : > { %v2264_v60 = vrot.slane %v2235_v26, %v3792_v43  ;;  %v2268_v27 = vrot.slane %v2235_v26, %v3794_v44  ;;  %v2296_v52 = vrot.slane %v2242_v33, %v3792_v43  ;;  %v2300_v28 = vrot.slane %v2242_v33, %v3794_v44 }
 0x1c2   : > { %v2259_v32 = vcombine.high %v2249_v41, %v2249_v41  ;;  %v2260_v34 = vcombine.high %v2256_v14, %v2256_v14  ;;  %v2272_v35 = vrot.slane %v2249_v41, %v3792_v43  ;;  %v2276_v36 = vrot.slane %v2249_v41, %v3794_v44 }
 0x1c3   : > { %v2280_v39 = vrot.slane %v2257_v63, %v3792_v43  ;;  %v2284_v40 = vrot.slane %v2257_v63, %v3794_v44  ;;  %v2304_v42 = vrot.slane %v2256_v14, %v3792_v43  ;;  %v2308_v50 = vrot.slane %v2256_v14, %v3794_v44 }
 0x1c4   : > { %v2288_v53 = vrot.slane %v2259_v32, %v3792_v43  ;;  %v2292_v55 = vrot.slane %v2259_v32, %v3794_v44  ;;  %v2312_v56 = vrot.slane %v2258_v23, %v3792_v43  ;;  %v2316_v57 = vrot.slane %v2258_v23, %v3794_v44 }
 0x1c5   : > { %v2320_v48 = vrot.slane %v2260_v34, %v3792_v43  ;;  %v2324_v58 = vrot.slane %v2260_v34, %v3794_v44  ;;  %v2341_v3 = vadd.f32 %v3759_v16, %v2264_v60  ;;  %v2342_v12 = vadd.f32 %v3761_v25, %v2268_v27 }
 0x1c6   : > { %v2343_v4 = vadd.f32 %v3763_v51, %v2272_v35  ;;  %v2344_v19 = vadd.f32 %v3765_v20, %v2276_v36  ;;  %v2345_v5 = vadd.f32 %v3767_v11, %v2280_v39  ;;  %v2346_v29 = vadd.f32 %v3769_v1, %v2284_v40 }
 0x1c7   : > { %v2347_v6 = vadd.f32 %v3771_v8, %v2288_v53  ;;  %v2348_v38 = vadd.f32 %v3773_v21, %v2292_v55  ;;  %v2349_v43 = vadd.f32 %v3775_v45, %v2296_v52  ;;  %v2350_v44 = vadd.f32 %v3777_v17, %v2300_v28 }
 0x1c8   : > { %v2351_v16 = vadd.f32 %v3779_v46, %v2304_v42  ;;  %v2352_v25 = vadd.f32 %v3781_v0, %v2308_v50  ;;  %v2358_v51 = vmul.f32 %v3799_v62, %v2341_v3  ;;  %v2359_v20 = vmul.f32 %v3799_v62, %v2342_v12 }
 0x1c9   : > { %v2353_v11 = vadd.f32 %v3783_v24, %v2312_v56  ;;  %v2354_v1 = vadd.f32 %v3785_v61, %v2316_v57  ;;  %v2355_v8 = vadd.f32 %v3787_v13, %v2320_v48  ;;  %v2356_v21 = vadd.f32 %v3789_v31, %v2324_v58 }
 0x1ca   : > { %v2360_v45 = vmul.f32 %v3799_v62, %v2343_v4  ;;  %v2361_v17 = vmul.f32 %v3799_v62, %v2344_v19  ;;  %v2362_v46 = vmul.f32 %v3799_v62, %v2345_v5  ;;  %v2363_v0 = vmul.f32 %v3799_v62, %v2346_v29 }
 0x1cb   : > { %v2364_v9 = vmul.f32 %v3799_v62, %v2347_v6  ;;  %v2365_v22 = vmul.f32 %v3799_v62, %v2348_v38  ;;  %v2366_v24 = vmul.f32 %v3799_v62, %v2349_v43  ;;  %v2367_v61 = vmul.f32 %v3799_v62, %v2350_v44 }
 0x1cc   : > { %v2368_v13 = vmul.f32 %v3799_v62, %v2351_v16  ;;  %v2369_v31 = vmul.f32 %v3799_v62, %v2352_v25  ;;  %v2370_v18 = vmul.f32 %v3799_v62, %v2353_v11  ;;  %v2371_v26 = vmul.f32 %v3799_v62, %v2354_v1 }
 0x1cd   : > { %v2372_v33 = vmul.f32 %v3799_v62, %v2355_v8  ;;  %v2373_v41 = vmul.f32 %v3799_v62, %v2356_v21  ;;  %v2386_v14 = vadd.f32 %v3802_v47, %v2358_v51  ;;  %v2387_v63 = vadd.f32 %v3805_v49, %v2359_v20 }
 0x1ce   : > { %v2388_v23 = vadd.f32 %v3802_v47, %v2360_v45  ;;  %v2389_v60 = vadd.f32 %v3805_v49, %v2361_v17  ;;  %v2390_v27 = vadd.f32 %v3802_v47, %v2362_v46  ;;  %v2391_v52 = vadd.f32 %v3805_v49, %v2363_v0 }
 0x1cf   : > { %v2392_v28 = vadd.f32 %v3802_v47, %v2364_v9  ;;  %v2393_v32 = vadd.f32 %v3805_v49, %v2365_v22  ;;  %v2394_v34 = vadd.f32 %v3802_v47, %v2366_v24  ;;  %v2395_v62 = vadd.f32 %v3805_v49, %v2367_v61 }
 0x1d0   : > { %v2396_v35 = vadd.f32 %v3802_v47, %v2368_v13  ;;  %v2397_v36 = vadd.f32 %v3805_v49, %v2369_v31  ;;  %v2398_v39 = vadd.f32 %v3802_v47, %v2370_v18  ;;  %v2399_v40 = vadd.f32 %v3805_v49, %v2371_v26 }
 0x1d1   : > { %v2400_v42 = vadd.f32 %v3802_v47, %v2372_v33  ;;  %v2401_v50 = vadd.f32 %v3805_v49, %v2373_v41  ;;  %v3895_v53 = vmax.f32 %v2386_v14, 0.0  ;;  %v3897_v55 = vmax.f32 %v2387_v63, 0.0 }
 0x1d2   : > { %v3899_v56 = vmax.f32 %v2388_v23, 0.0  ;;  %v3901_v57 = vmax.f32 %v2389_v60, 0.0  ;;  %v2406_v48 = vmax.f32 %v2390_v27, 0.0  ;;  %v2407_v58 = vmax.f32 %v2391_v52, 0.0 }
 0x1d3   : > { %v2408_v3 = vmax.f32 %v2392_v28, 0.0  ;;  %v2409_v12 = vmax.f32 %v2393_v32, 0.0  ;;  %v3903_v47 = vmax.f32 %v2394_v34, 0.0  ;;  %v3905_v49 = vmax.f32 %v2395_v62, 0.0  ;;  %2418 = vst [vmem:[%s3887_s12] sm:$0xff] %v3895_v53  ;;  %2419 = vst [vmem:[%s3887_s12 + $0x8] sm:$0xff] %v3897_v55 }
 0x1d4   : > { %v3911_v4 = vmax.f32 %v2396_v35, 0.0  ;;  %v3913_v19 = vmax.f32 %v2397_v36, 0.0  ;;  %v3915_v5 = vmax.f32 %v2398_v39, 0.0  ;;  %v3917_v29 = vmax.f32 %v2399_v40, 0.0  ;;  %2420 = vst [vmem:[%s3887_s12 + $0x10] sm:$0xff] %v3899_v56  ;;  %2421 = vst [vmem:[%s3887_s12 + $0x18] sm:$0xff] %v3901_v57 }
 0x1d5   : > { %2422 = vst [vmem:[%s3887_s12 + $0x20] sm:$0xff] %v2406_v48  ;;  %2423 = vst [vmem:[%s3887_s12 + $0x28] sm:$0xff] %v2407_v58  ;;  %v3925_v6 = vmax.f32 %v2400_v42, 0.0  ;;  %v3927_v38 = vmax.f32 %v2401_v50, 0.0  ;;  %v2481_v43 = vsel %vm2455_vm1, %v2406_v48, inf  ;;  %v2482_v44 = vsel %vm2455_vm1, %v2407_v58, inf }
 0x1d6   : > { %2425 = vst [vmem:[%s3887_s12 + $0x38] sm:$0xff] %v2409_v12  ;;  %2426 = vst [vmem:[%s3887_s12 + $0x40] sm:$0xff] %v3903_v47  ;;  %v2483_v16 = vsel %vm2456_vm2, %v2408_v3, inf  ;;  %v2484_v25 = vsel %vm2456_vm2, %v2409_v12, inf  ;;  %v2477_v51 = vsel %vm2453_vm3, %v3895_v53, inf  ;;  %v2478_v20 = vsel %vm2453_vm3, %v3897_v55, inf }
 0x1d7   : > { %2427 = vst [vmem:[%s3887_s12 + $0x48] sm:$0xff] %v3905_v49  ;;  %2424 = vst [vmem:[%s3887_s12 + $0x30] sm:$0xff] %v2408_v3  ;;  %v2479_v11 = vsel %vm2454_vm4, %v3899_v56, inf  ;;  %v2480_v1 = vsel %vm2454_vm4, %v3901_v57, inf  ;;  %v2485_v8 = vsel %vm2457_vm5, %v3903_v47, inf  ;;  %v2486_v21 = vsel %vm2457_vm5, %v3905_v49, inf }
 0x1d8   : > { %2428 = vst [vmem:[%s3887_s12 + $0x50] sm:$0xff] %v3911_v4  ;;  %2429 = vst [vmem:[%s3887_s12 + $0x58] sm:$0xff] %v3913_v19  ;;  %v2493_v45 = vmin.f32 %v2477_v51, %v2481_v43  ;;  %v2494_v17 = vmin.f32 %v2478_v20, %v2482_v44  ;;  %v2487_v46 = vsel %vm2458_vm6, %v3911_v4, inf  ;;  %v2488_v0 = vsel %vm2458_vm6, %v3913_v19, inf }
 0x1d9   : > { %2430 = vst [vmem:[%s3887_s12 + $0x60] sm:$0xff] %v3915_v5  ;;  %2431 = vst [vmem:[%s3887_s12 + $0x68] sm:$0xff] %v3917_v29  ;;  %v2495_v9 = vmin.f32 %v2479_v11, %v2483_v16  ;;  %v2496_v22 = vmin.f32 %v2480_v1, %v2484_v25  ;;  %v2489_v24 = vsel %vm2459_vm7, %v3915_v5, inf  ;;  %v2490_v61 = vsel %vm2459_vm7, %v3917_v29, inf }
 0x1da   : > { %2432 = vst [vmem:[%s3887_s12 + $0x70] sm:$0xff] %v3925_v6  ;;  %2433 = vst [vmem:[%s3887_s12 + $0x78] sm:$0xff] %v3927_v38  ;;  %v2497_v13 = vmin.f32 %v2493_v45, %v2485_v8  ;;  %v2498_v31 = vmin.f32 %v2494_v17, %v2486_v21  ;;  %v2491_v18 = vsel %vm2460_vm8, %v3925_v6, inf  ;;  %v2492_v26 = vsel %vm2460_vm8, %v3927_v38, inf }
 0x1db   : > { %v2499_v33 = vmin.f32 %v2495_v9, %v2487_v46  ;;  %v2500_v41 = vmin.f32 %v2496_v22, %v2488_v0  ;;  %v2521_v23 = vsel %vm2455_vm1, %v2406_v48, -inf  ;;  %v2522_v60 = vsel %vm2455_vm1, %v2407_v58, -inf }
 0x1dc   : > { %v2501_v14 = vmin.f32 %v2497_v13, %v2489_v24  ;;  %v2502_v63 = vmin.f32 %v2498_v31, %v2490_v61  ;;  %v2523_v28 = vsel %vm2456_vm2, %v2408_v3, -inf  ;;  %v2524_v32 = vsel %vm2456_vm2, %v2409_v12, -inf }
 0x1dd   : > { %v2503_v27 = vmin.f32 %v2499_v33, %v2491_v18  ;;  %v2504_v52 = vmin.f32 %v2500_v41, %v2492_v26  ;;  %v2517_v62 = vsel %vm2453_vm3, %v3895_v53, -inf  ;;  %v2518_v35 = vsel %vm2453_vm3, %v3897_v55, -inf }
 0x1de   : > { %v2505_v34 = vmin.f32 %v2501_v14, %v2502_v63  ;;  %v2519_v59 = vsel %vm2454_vm4, %v3899_v56, -inf  ;;  %v2520_v39 = vsel %vm2454_vm4, %v3901_v57, -inf  ;;  %v2525_v7 = vsel %vm2457_vm5, %v3903_v47, -inf }
 0x1df   : > { %v2506_v36 = vmin.f32 %v2503_v27, %v2504_v52  ;;  %v2533_v40 = vmax.f32 %v2517_v62, %v2521_v23  ;;  %v2534_v42 = vmax.f32 %v2518_v35, %v2522_v60  ;;  %v2535_v50 = vmax.f32 %v2519_v59, %v2523_v28 }
 0x1e0   : > { %v2536_v53 = vmax.f32 %v2520_v39, %v2524_v32  ;;  %v2526_v15 = vsel %vm2457_vm5, %v3905_v49, -inf  ;;  %v2527_v55 = vsel %vm2458_vm6, %v3911_v4, -inf  ;;  %v2528_v2 = vsel %vm2458_vm6, %v3913_v19, -inf }
 0x1e1   : > { %v2507_v48 = vmin.f32 %v2505_v34, %v2506_v36  ;;  %v2537_v56 = vmax.f32 %v2533_v40, %v2525_v7  ;;  %v2538_v57 = vmax.f32 %v2534_v42, %v2526_v15  ;;  %v2539_v58 = vmax.f32 %v2535_v50, %v2527_v55 }
 0x1e2   : > { %v2540_v3 = vmax.f32 %v2536_v53, %v2528_v2  ;;  %v2529_v12 = vsel %vm2459_vm7, %v3915_v5, -inf  ;;  %v2530_v10 = vsel %vm2459_vm7, %v3917_v29, -inf  ;;  %v2531_v47 = vsel %vm2460_vm8, %v3925_v6, -inf }
 0x1e3   : > { %2508 = vmin.xlane.f32.xlu0 %v2507_v48  ;;  %v2532_v54 = vsel %vm2460_vm8, %v3927_v38, -inf  ;;  %v2541_v49 = vmax.f32 %v2537_v56, %v2529_v12  ;;  %v2542_v4 = vmax.f32 %v2538_v57, %v2530_v10  ;;  %v2543_v19 = vmax.f32 %v2539_v58, %v2531_v47 }
 0x1e4   : > { %v2544_v43 = vmax.f32 %v2540_v3, %v2532_v54 }
 0x1e5   : > { %v2545_v44 = vmax.f32 %v2541_v49, %v2542_v4 }
 0x1e6   : > { %v2546_v16 = vmax.f32 %v2543_v19, %v2544_v43 }
 0x1e8   : > { %v2547_v25 = vmax.f32 %v2545_v44, %v2546_v16 }
 0x1ea   : > { %2548 = vmax.xlane.f32.xlu0 %v2547_v25 }
 0x270   : > { %v2509_v5 = vpop.xlane.xlu0 %2508 }
 0x271   : > { %v2510_v37 = vrot.slane %v2509_v5, 4 }
 0x273   : > { %v2511_v29 = vmin.f32 %v2509_v5, %v2510_v37 }
 0x275   : > { %v2512_v51 = vrot.slane %v2511_v29, 2 }
 0x277   : > { %v2549_v20 = vpop.xlane.xlu0 %2548  ;;  %v2513_v6 = vmin.f32 %v2511_v29, %v2512_v51 }
 0x278   : > { %v2550_v11 = vrot.slane %v2549_v20, 4 }
 0x279   : > { %v2514_v1 = vrot.slane %v2513_v6, 1 }
 0x27a   : > { %v2551_v30 = vmax.f32 %v2549_v20, %v2550_v11 }
 0x27b   : > { %v2515_v38 = vmin.f32 %v2513_v6, %v2514_v1 }
 0x27c   : > { %v2552_v8 = vrot.slane %v2551_v30, 2 }
 0x27d   : > { %3044 = vpush %v2515_v38 }
 0x27e   : > { %v2553_v21 = vmax.f32 %v2551_v30, %v2552_v8 }
 0x280   : > { %v2554_v45 = vrot.slane %v2553_v21, 1 }
 0x282   : > { %v2555_v17 = vmax.f32 %v2553_v21, %v2554_v45 }
 0x284   : > { %3046 = vpush %v2555_v17 }
 0x2ae   : > { %s3045_s16 = spop %3044 }
 0x2af   : > { %v2557_v46 = vstv %s3045_s16 }
 0x2b0   : > { %2558 = vst [vmem:[%s358_s15] sm:$0xff] %v2557_v46 }
 0x2b5   : > { %s3047_s21 = spop %3046 }
 0x2b6   : > { %v2559_v0 = vstv %s3047_s21 }
 0x2b7   : > { %2560 = vst [vmem:[%s362_s20] sm:$0xff] %v2559_v0 }
 0x2b8 PF: > { %s20_s27 = sadd.s32 1, %s3190_s27  }
 0x2b9   : > { %p17_p2 = scmp.ge.s32.totalorder %s20_s27, 4  }
 0x2bb   :  { %19 = sbr.rel (!%p17_p2) target bundleno = 1 (0x1), region = 120 }
 0x2c2   :  { %2613 = vsyncpa [#allocation3], 1 }
 0x2c3   :  { %2615 = vsyncpa [#allocation3 + $0x1], 1 }

// kernel: node_update_forward.7
= control target key start
LH: loop header
LB: loop body
LE: loop exit
PB: predicated region body
PF: predicated region fallthrough
CT: control target
= control target key end

     0   :  { %8 = vsyncpa [#allocation3], 0  ;;  %s532_s0 = inlined_call_operand.vmem [shape: f32[16,32], index: 0, kind: input, shape index: {}]   ;;  %s533_s1 = inlined_call_operand.vmem [shape: f32[16,32], index: 1, kind: input, shape index: {}]   ;;  %s534_s2 = inlined_call_operand.vmem [shape: f32[2,32], index: 2, kind: input, shape index: {}]   ;;  %s535_s3 = inlined_call_operand.hbm [shape: f32[16,32], index: 3, kind: output, shape index: {}]  }
   0x1   :  { %10 = vsyncpa [#allocation3 + $0x1], 0  ;;  %s423_s12 = smov 0   ;;  %s425_s13 = smov 0  }
   0x2   :  { %s427_s14 = smov 0   ;;  %s429_s15 = smov 0  }
   0x3 LB: > { %s444_s16 = sadd.s32 4294967295, %s400_s15   ;;  %s286_s17 = sadd.s32 4294967294, %s400_s15   ;;  %s400_s15 = sphi %s429_s15, %s541_s15   ;;  %s396_s14 = sphi %s427_s14, %s540_s14   ;;  %s392_s13 = sphi %s425_s13, %s539_s13   ;;  %s388_s12 = sphi %s423_s12, %s538_s12  }
   0x4   : > { %s448_s18 = sadd.s32 1, %s400_s15   ;;  %s96_s19 = sadd.s32 1, %s396_s14 }
   0x5   : > { %s93_s20 = ssub.s32 %s400_s15, %s448_s18  ;;  %p106_p0 = scmp.ne.s32.totalorder %s396_s14, %s392_s13 }
   0x6   : > { %p94_p1 = scmp.eq.s32.totalorder %s93_s20, 0  ;;  %p107_p2 = scmp.eq.s32.totalorder %s444_s16, 1 }
   0x7   : > { %p112_p3 = scmp.ne.s32.totalorder %s392_s13, %s388_s12  ;;  %p113_p4 = scmp.eq.s32.totalorder %s286_s17, 1 }
   0x8   : > { %s459_s21 = scalar_select %p94_p1, %s396_s14, %s96_s19  }
   0x9   : > { %p461_p5 = por %p107_p2, %p106_p0  ;;  %p465_p6 = por %p113_p4, %p112_p3 }
   0xa   : > { %p289_p7 = scmp.ge.s32.totalorder %s400_s15, 1  ;;  %p148_p8 = scmp.lt.s32.totalorder %s400_s15, 3 }
   0xc   : > { %p149_p9 = pnand %p289_p7, %p148_p8 }
   0xd   : > { %p175_p10 = scmp.lt.s32.totalorder (!%p149_p9), %s444_s16, 1  ;;  %s172_s24 = sand.u32 (!%p149_p9), 1, %s392_s13   ;;  %v293_v0 = vld [vmem:[%s534_s2] ss:$0 sm:$0xff] (!%p149_p9)  ;;  %v294_v1 = vld [vmem:[%s534_s2 + $0x1] ss:$0 sm:$0xff] (!%p149_p9) }
   0xe   : > { %152 = sbr.rel (%p149_p9) target bundleno = 48 (0x30), region = 32  ;;  %s290_s26 = sshll.u32 (!%p149_p9), %s172_s24, 3  ;;  %vm199_vm0 = vcmask (!%p149_p9), 261120  }
   0xf   : > { %s174_s11 = scalar_lea.vmem (!%p149_p9), [#allocation2], %s290_s26  ;;  %s296_s19 = sshll.u32 (!%p149_p9), %s444_s16, 7 }
  0x10   : > { %s215_s17 = sshll.u32 (!%p149_p9), %s174_s11, 4  ;;  %s202_s28 = scalar_lea.sflag (!%p149_p9), [#allocation3], %s172_s24  ;;  %s487_s17 = int_to_ptr.vmem [resolvable:$true] %s215_s17 }
  0x11   : > { %s338_s29 = scalar_lea.vmem (!%p149_p9), %s487_s17, 128 }
  0x12   : > { %p339_p11 = scmp.ne.s32.totalorder (!%p149_p9), %s487_s17, %s338_s29 }
  0x14   : > { %p340_p12 = pnand (!%p149_p9), %p339_p11, %p461_p5 }
  0x15   : > { %s176_s25 = scalar_select %p175_p10, %s444_s16, 1 }
  0x16   : > { %p341_p13 = pneg %p340_p12  ;;  %s402_s16 = smov [#allocation2]  }
  0x17   : > { %s291_s27 = sshll.u32 %s176_s25, 3  ;;  %s342_s26 = sshll.u32 %s402_s16, 4  ;;  %s343_s26 = int_to_ptr.vmem [resolvable:$false] %s342_s26 }
  0x18   : > { %s178_s5 = scalar_lea.vmem %s532_s0, %s291_s27  ;;  %s182_s8 = scalar_lea.vmem %s533_s1, %s291_s27 }
  0x19   : > { %v186_v2 = vld [vmem:[%s182_s8] sm:$0xff]  ;;  %s492_s27 = scalar_lea.hbm %s535_s3, %s296_s19  ;;  %s344_s30 = scalar_lea.vmem %s343_s26, 256 }
  0x1a   : > { %v191_v3 = vsub.f32 %v186_v2, %v293_v0  ;;  %v185_v4 = vld [vmem:[%s178_s5] sm:$0xff]  ;;  %p345_p0 = scmp.lt.s32.totalorder %s487_s17, %s343_s26  ;;  %p346_p1 = scmp.lt.s32.totalorder %s344_s30, %s338_s29 }
  0x1c   : > { %v196_v5 = vmul.f32 %v294_v1, %v191_v3  ;;  %p347_p2 = por %p346_p1, %p345_p0 }
  0x1e   : > { %v197_v6 = vadd.f32 %v196_v5, %v185_v4  ;;  %p348_p3 = pnand %p347_p2, %p341_p13 }
  0x20   : > { %v198_v7 = vmax.f32 %v197_v6, 0.0 }
  0x22   : > { %200 = vst.msk [vmem:[%s174_s11] sm:$0xff] %vm199_vm0, %v198_v7 }
  0x23   : > { %351 = shalt.err (!%p348_p3)
}
  0x24   : > { %s352_s24 = scalar_lea.hbm %s492_s27, 128  ;;  %s356_s6 = scalar_lea.hbm %s535_s3, 256 }
  0x25   : > { %p353_p4 = scmp.ne.s32.totalorder %s492_s27, %s352_s24  ;;  %p357_p9 = scmp.lt.u32.totalorder %s492_s27, %s535_s3 }
  0x26   : > { %p358_p10 = scmp.lt.u32.totalorder %s356_s6, %s352_s24  ;;  %p360_p12 = scmp.lt.u32.totalorder %s352_s24, %s492_s27 }
  0x27   : > { %p354_p7 = pnand %p353_p4, %p461_p5 }
  0x28   : > { %p359_p11 = por %p358_p10, %p357_p9 }
  0x29   : > { %p355_p8 = pneg %p354_p7 }
  0x2a   : > { %p361_p13 = por %p360_p12, %p359_p11 }
  0x2c   : > { %p362_p0 = pnand %p361_p13, %p355_p8 }
  0x2e   : > { %365 = shalt.err (!%p362_p0)
}
  0x2f   : > { %299 = dma.vmem_to_hbm [thread:$0]  (%p461_p5), %s487_s17, 128, %s492_s27, %s202_s28  }
  0x30 PF: > { %p305_p1 = scmp.ge.s32.totalorder %s400_s15, 2  ;;  %s227_s9 = sand.u32 1, %s388_s12  }
  0x31   : > { %s228_s10 = scalar_lea.sflag [#allocation3], %s227_s9 }
  0x32   : > { %p302_p2 = pnand %p305_p1, %p465_p6 }
  0x34   : > { %383 = dma.done.wait (!%p302_p2), %s228_s10, 128  }
  0x35   : > { %385 = vsyncadd (!%p302_p2), %s228_s10, 4294967168  ;;  %p13_p3 = scmp.ge.s32.totalorder %s448_s18, 4   ;;  %s538_s12 = smov %s392_s13 }
  0x36   : > { %s539_s13 = smov %s396_s14  ;;  %s540_s14 = smov %s459_s21 }
  0x37   : > { %s541_s15 = smov %s448_s18  ;;  %15 = sbr.rel (!%p13_p3) target bundleno = 3 (0x3), region = 70 }
  0x3e   :  { %233 = vsyncpa [#allocation3], 1 }
  0x3f   :  { %235 = vsyncpa [#allocation3 + $0x1], 1 }

// kernel: node_update_forward.6
= control target key start
LH: loop header
LB: loop body
LE: loop exit
PB: predicated region body
PF: predicated region fallthrough
CT: control target
= control target key end

     0   :  { %12 = vsyncpa [#allocation3], 0  ;;  %s6173_s24 = smov 0   ;;  %s7612_s0 = inlined_call_operand.vmem [shape: f32[3], index: 0, kind: input, shape index: {}]   ;;  %s7613_s1 = inlined_call_operand.vmem [shape: f32[128,256], index: 1, kind: input, shape index: {}]   ;;  %s7614_s2 = inlined_call_operand.vmem [shape: bf16[8,256,32], index: 2, kind: input, shape index: {}]   ;;  %s7615_s3 = inlined_call_operand.vmem [shape: bf16[8,256,32], index: 3, kind: input, shape index: {}]   ;;  %s7616_s4 = inlined_call_operand.vmem [shape: f32[1,32], index: 4, kind: input, shape index: {}]   ;;  %s7617_s5 = inlined_call_operand.vmem [shape: f32[1,32], index: 5, kind: input, shape index: {}]   ;;  %s7618_s6 = inlined_call_operand.vmem [shape: f32[16,8], index: 6, kind: input, shape index: {}]   ;;  %s7619_s7 = inlined_call_operand.vmem [shape: f32[16,32], index: 7, kind: output, shape index: {}]  }
   0x1 LB: > { %s6179_s25 = sadd.s32 4294967295, %s6130_s24   ;;  %p4381_p0 = scmp.ge.s32.totalorder %s6130_s24, 1  ;;  %s6130_s24 = sphi %s6173_s24, %s18_s24  }
   0x2   : > { %p206_p1 = scmp.lt.s32.totalorder %s6130_s24, 3  ;;  %s219_s28 = sshll.u32 %s7612_s0, 4  ;;  %s220_s28 = int_to_ptr.vmem [resolvable:$true] %s219_s28 }
   0x3   : > { %p5790_p3 = scmp.eq.s32.totalorder %s6179_s25, 0  ;;  %s6105_s30 = scalar_lea.vmem %s220_s28, 16 }
   0x4   : > { %p6186_p2 = pnand %p4381_p0, %p206_p1  ;;  %p6106_p6 = scmp.ne.s32.totalorder %s220_s28, %s6105_s30 }
   0x5   : > { %p6113_p10 = scmp.lt.s32.totalorder %s220_s28, %s220_s28  ;;  %p6114_p11 = scmp.lt.s32.totalorder %s6105_s30, %s6105_s30 }
   0x6   : > { %p5786_p4 = pneg %p6186_p2 }
   0x7   : > { %p6115_p12 = por %p6114_p11, %p6113_p10 }
   0x8   : > { %p5787_p5 = pnand %p5790_p3, %p5786_p4 }
   0xa   : > { %p6107_p7 = pneg %p5787_p5 }
   0xc   : > { %p6108_p8 = pnand %p6107_p7, %p6106_p6 }
   0xe   : > { %p6109_p9 = pneg %p6108_p8 }
  0x10   : > { %p6116_p13 = pnand %p6115_p12, %p6109_p9 }
  0x12   : > { %6119 = shalt.err (!%p6116_p13)
}
  0x13   : > { %s6132_s8 = smov [#allocation2]   ;;  %261 = sbr.rel (%p6186_p2) target bundleno = 591 (0x24f), region = 48 }
  0x14   : > { %5789 = dma.vmem_to_smem (!%p5787_p5), %s220_s28, 16, %s6132_s8, [#allocation3]  }
  0x1a   : > { %6125 = dma.done.wait (%p5790_p3), [#allocation3], 16  }
  0x1b   : > { %6127 = vsyncadd (%p5790_p3), [#allocation3], 4294967280 }
  0x1c   : > { %267 = sfence }
  0x1d   : > { %v5801_v0 = vld [vmem:[%s7614_s2 + $0xc0] sm:$0xff]   ;;  %v5805_v4 = vld [vmem:[%s7614_s2 + $0xc8] sm:$0xff]   ;;  %v5809_v8 = vld [vmem:[%s7614_s2 + $0xd0] sm:$0xff]   ;;  %s4386_s26 = sshll.u32 %s6179_s25, 3  ;;  %s4391_s16 = sld [smem:[#allocation2 + $0x1]]  ;;  %vm4221_vm0 = vcmask 261120  }
  0x1e   : > { %v5802_v1 = vld [vmem:[%s7614_s2 + $0x40] sm:$0xff]   ;;  %5110 = vmatprep.subr.bf16.mxu0 %v5801_v0  ;;  %v5806_v5 = vld [vmem:[%s7614_s2 + $0x48] sm:$0xff]   ;;  %v5810_v9 = vld [vmem:[%s7614_s2 + $0x50] sm:$0xff]   ;;  %p299_p0 = scmp.lt.s32.totalorder %s4386_s26, 15  ;;  %p305_p1 = scmp.lt.s32.totalorder %s6179_s25, 1  ;;  %vm4286_vm1 = vcmask 1041409  }
  0x1f   : > { %v5803_v2 = vld [vmem:[%s7614_s2 + $0x80] sm:$0xff]   ;;  %5150 = vmatprep.subr.bf16.mxu1 %v5802_v1  ;;  %v5807_v6 = vld [vmem:[%s7614_s2 + $0x88] sm:$0xff]   ;;  %v5811_v10 = vld [vmem:[%s7614_s2 + $0x90] sm:$0xff]   ;;  %s4392_s9 = sld [smem:[#allocation2 + $0x2]]  ;;  %vm4288_vm2 = vcmask 1042434   ;;  %vm4290_vm3 = vcmask 1043459  }
  0x20   : > { %v5804_v3 = vld [vmem:[%s7614_s2] sm:$0xff]   ;;  %5111 = vmatpush3.bf16.msra.mxu0 %v5803_v2  ;;  %v5808_v7 = vld [vmem:[%s7614_s2 + $0x8] sm:$0xff]   ;;  %v5812_v11 = vld [vmem:[%s7614_s2 + $0x10] sm:$0xff]   ;;  %s7622_s26 = smov (!%p299_p0, %s4386_s26), 15  ;;  %s7624_s25 = smov (!%p305_p1, %s6179_s25), 1  ;;  %vm4292_vm4 = vcmask 1044484  }
  0x21   : > { %5151 = vmatpush3.bf16.msra.mxu1 %v5804_v3  ;;  %5112 = vmatprep.subr.bf16.mxu0 %v5805_v4  ;;  %v5813_v12 = vld [vmem:[%s7614_s2 + $0xd8] sm:$0xff]   ;;  %v5817_v16 = vld [vmem:[%s7614_s2 + $0xe0] sm:$0xff]   ;;  %v5821_v20 = vld [vmem:[%s7614_s2 + $0xe8] sm:$0xff]   ;;  %s5109_s29 = sshll.u32 %s7622_s26, 4  ;;  %s314_s26 = sld [smem:[#allocation2]]  ;;  %vm4294_vm5 = vcmask 1045509  }
  0x22   : > { %5152 = vmatprep.subr.bf16.mxu1 %v5806_v5  ;;  %v5814_v13 = vld [vmem:[%s7614_s2 + $0x58] sm:$0xff]   ;;  %v5818_v17 = vld [vmem:[%s7614_s2 + $0x60] sm:$0xff]   ;;  %v5822_v21 = vld [vmem:[%s7614_s2 + $0x68] sm:$0xff]   ;;  %s6301_s15 = scalar_lea.vmem %s7613_s1, %s5109_s29  ;;  %s4389_s28 = sshll.u32 %s7624_s25, 3  ;;  %vm4296_vm6 = vcmask 1046534   ;;  %vm4298_vm7 = vcmask 1047559  }
  0x23   : > { %v5815_v14 = vld [vmem:[%s7614_s2 + $0x98] sm:$0xff]   ;;  %v5819_v18 = vld [vmem:[%s7614_s2 + $0xa0] sm:$0xff]   ;;  %v5823_v22 = vld [vmem:[%s7614_s2 + $0xa8] sm:$0xff]   ;;  %v6315_v39 = vstv %s4391_s16  ;;  %s308_s8 = scalar_lea.vmem %s7618_s6, %s4389_s28 }
  0x24   : > { %5113 = vmatpush3.bf16.msra.mxu0 %v5807_v6  ;;  %v5816_v15 = vld [vmem:[%s7614_s2 + $0x18] sm:$0xff]   ;;  %v5820_v19 = vld [vmem:[%s7614_s2 + $0x20] sm:$0xff]   ;;  %v5824_v23 = vld [vmem:[%s7614_s2 + $0x28] sm:$0xff]  }
  0x25   : > { %5153 = vmatpush3.bf16.msra.mxu1 %v5808_v7  ;;  %5114 = vmatprep.subr.bf16.mxu0 %v5809_v8  ;;  %v5825_v24 = vld [vmem:[%s7614_s2 + $0xf0] sm:$0xff]   ;;  %v5829_v28 = vld [vmem:[%s7614_s2 + $0xf8] sm:$0xff]   ;;  %v318_v32 = vld [vmem:[%s6301_s15 + $0x8] sm:$0xff] }
  0x26   : > { %5154 = vmatprep.subr.bf16.mxu1 %v5810_v9  ;;  %v5826_v25 = vld [vmem:[%s7614_s2 + $0x70] sm:$0xff]   ;;  %v5830_v29 = vld [vmem:[%s7614_s2 + $0x78] sm:$0xff]   ;;  %v317_v34 = vld [vmem:[%s6301_s15] sm:$0xff] }
  0x27   : > { %v5827_v26 = vld [vmem:[%s7614_s2 + $0xb0] sm:$0xff]   ;;  %v5831_v30 = vld [vmem:[%s7614_s2 + $0xb8] sm:$0xff]   ;;  %v5833_v35 = vld [vmem:[%s7615_s3 + $0xc0] sm:$0xff]   ;;  %v6313_v38 = vstv %s314_s26  ;;  %s312_s26 = scalar_lea.vmem %s7619_s7, %s4389_s28 }
  0x28   : > { %5115 = vmatpush3.bf16.msra.mxu0 %v5811_v10  ;;  %v5828_v27 = vld [vmem:[%s7614_s2 + $0x30] sm:$0xff]   ;;  %v5832_v31 = vld [vmem:[%s7614_s2 + $0x38] sm:$0xff]   ;;  %v5834_v36 = vld [vmem:[%s7615_s3 + $0x40] sm:$0xff]   ;;  %v335_v40 = vsub.f32 %v318_v32, %v6313_v38  ;;  %v334_v42 = vsub.f32 %v317_v34, %v6313_v38 }
  0x29   : > { %5155 = vmatpush3.bf16.msra.mxu1 %v5812_v11  ;;  %5116 = vmatprep.subr.bf16.mxu0 %v5813_v12  ;;  %v320_v33 = vld [vmem:[%s6301_s15 + $0x18] sm:$0xff]  ;;  %v319_v37 = vld [vmem:[%s6301_s15 + $0x10] sm:$0xff]  ;;  %v322_v48 = vld [vmem:[%s6301_s15 + $0x28] sm:$0xff] }
  0x2a   : > { %5156 = vmatprep.subr.bf16.mxu1 %v5814_v13  ;;  %v337_v41 = vsub.f32 %v320_v33, %v6313_v38  ;;  %v336_v43 = vsub.f32 %v319_v37, %v6313_v38  ;;  %v352_v44 = vmul.f32 %v6315_v39, %v335_v40  ;;  %v351_v46 = vmul.f32 %v6315_v39, %v334_v42  ;;  %v324_v49 = vld [vmem:[%s6301_s15 + $0x38] sm:$0xff]  ;;  %v321_v50 = vld [vmem:[%s6301_s15 + $0x20] sm:$0xff]  ;;  %v323_v55 = vld [vmem:[%s6301_s15 + $0x30] sm:$0xff] }
  0x2b   : > { %v339_v56 = vsub.f32 %v322_v48, %v6313_v38  ;;  %v341_v57 = vsub.f32 %v324_v49, %v6313_v38  ;;  %v338_v58 = vsub.f32 %v321_v50, %v6313_v38  ;;  %v340_v59 = vsub.f32 %v323_v55, %v6313_v38  ;;  %v5836_v42 = vld [vmem:[%s7615_s3] sm:$0xff]   ;;  %v5838_v49 = vld [vmem:[%s7615_s3 + $0x48] sm:$0xff]  }
  0x2c   : > { %5117 = vmatpush3.bf16.msra.mxu0 %v5815_v14  ;;  %v354_v45 = vmul.f32 %v6315_v39, %v337_v41  ;;  %v353_v47 = vmul.f32 %v6315_v39, %v336_v43  ;;  %v368_v51 = vmax.f32 %v352_v44, 0.0  ;;  %v367_v53 = vmax.f32 %v351_v46, 0.0  ;;  %v5835_v41 = vld [vmem:[%s7615_s3 + $0x80] sm:$0xff]   ;;  %v326_v44 = vld [vmem:[%s6301_s15 + $0x48] sm:$0xff] }
  0x2d   : > { %5157 = vmatpush3.bf16.msra.mxu1 %v5816_v15  ;;  %5118 = vmatprep.subr.bf16.mxu0 %v5817_v16  ;;  %v356_v0 = vmul.f32 %v6315_v39, %v339_v56  ;;  %v358_v1 = vmul.f32 %v6315_v39, %v341_v57  ;;  %v355_v2 = vmul.f32 %v6315_v39, %v338_v58  ;;  %v5840_v57 = vld [vmem:[%s7615_s3 + $0x8] sm:$0xff]  }
  0x2e   : > { %5158 = vmatprep.subr.bf16.mxu1 %v5818_v17  ;;  %v370_v52 = vmax.f32 %v354_v45, 0.0  ;;  %v369_v54 = vmax.f32 %v353_v47, 0.0  ;;  %v384_v60 = vmin.f32 %v368_v51, 255.0  ;;  %v383_v62 = vmin.f32 %v367_v53, 255.0  ;;  %v328_v45 = vld [vmem:[%s6301_s15 + $0x58] sm:$0xff] }
  0x2f   : > { %v357_v3 = vmul.f32 %v6315_v39, %v340_v59  ;;  %v372_v8 = vmax.f32 %v356_v0, 0.0  ;;  %v374_v9 = vmax.f32 %v358_v1, 0.0  ;;  %v371_v10 = vmax.f32 %v355_v2, 0.0 }
  0x30   : > { %5119 = vmatpush3.bf16.msra.mxu0 %v5819_v18  ;;  %v386_v61 = vmin.f32 %v370_v52, 255.0  ;;  %v385_v63 = vmin.f32 %v369_v54, 255.0  ;;  %v5752_v4 = vtrunc.f32 %v384_v60  ;;  %v5750_v6 = vtrunc.f32 %v383_v62  ;;  %v5837_v52 = vld [vmem:[%s7615_s3 + $0xc8] sm:$0xff]  }
  0x31   : > { %5159 = vmatpush3.bf16.msra.mxu1 %v5820_v19  ;;  %5120 = vmatprep.subr.bf16.mxu0 %v5821_v20  ;;  %v373_v11 = vmax.f32 %v357_v3, 0.0  ;;  %v388_v16 = vmin.f32 %v372_v8, 255.0  ;;  %v390_v17 = vmin.f32 %v374_v9, 255.0  ;;  %v387_v18 = vmin.f32 %v371_v10, 255.0 }
  0x32   : > { %5160 = vmatprep.subr.bf16.mxu1 %v5822_v21  ;;  %v5756_v5 = vtrunc.f32 %v386_v61  ;;  %v5754_v7 = vtrunc.f32 %v385_v63  ;;  %v6337_v12 = vcvt.f32.s32 %v5752_v4  ;;  %v6341_v14 = vcvt.f32.s32 %v5750_v6  ;;  %v5839_v61 = vld [vmem:[%s7615_s3 + $0x88] sm:$0xff]   ;;  %v5841_v4 = vld [vmem:[%s7615_s3 + $0xd0] sm:$0xff]  }
  0x33   : > { %v389_v19 = vmin.f32 %v373_v11, 255.0  ;;  %v5760_v43 = vtrunc.f32 %v388_v16  ;;  %v5764_v50 = vtrunc.f32 %v390_v17  ;;  %v5758_v54 = vtrunc.f32 %v387_v18  ;;  %v5844_v16 = vld [vmem:[%s7615_s3 + $0x10] sm:$0xff]  }
  0x34   : > { %5121 = vmatpush3.bf16.msra.mxu0 %v5823_v22  ;;  %v6339_v13 = vcvt.f32.s32 %v5756_v5  ;;  %v6343_v15 = vcvt.f32.s32 %v5754_v7  ;;  %v520_v20 = vshra.s32 %v6337_v12, 1  ;;  %v416_v22 = vand.u32 1, %v6337_v12  ;;  %v5842_v5 = vld [vmem:[%s7615_s3 + $0x50] sm:$0xff]  }
  0x35   : > { %5161 = vmatpush3.bf16.msra.mxu1 %v5824_v23  ;;  %5122 = vmatprep.subr.bf16.mxu0 %v5825_v24  ;;  %v519_v24 = vshra.s32 %v6341_v14, 1  ;;  %v6374_v53 = vcvt.f32.s32 %v5760_v43  ;;  %v5762_v55 = vtrunc.f32 %v389_v19  ;;  %v6382_v58 = vcvt.f32.s32 %v5764_v50 }
  0x36   : > { %5162 = vmatprep.subr.bf16.mxu1 %v5826_v25  ;;  %v522_v21 = vshra.s32 %v6339_v13, 1  ;;  %v418_v23 = vand.u32 1, %v6339_v13  ;;  %v521_v25 = vshra.s32 %v6343_v15, 1  ;;  %v343_v59 = vsub.f32 %v326_v44, %v6313_v38 }
  0x37   : > { %v535_v32 = vand.u32 1, %v519_v24  ;;  %v345_v60 = vsub.f32 %v328_v45, %v6313_v38  ;;  %v524_v62 = vshra.s32 %v6374_v53, 1  ;;  %v420_v63 = vand.u32 1, %v6374_v53  ;;  %v5848_v45 = vld [vmem:[%s7615_s3 + $0x18] sm:$0xff]  }
  0x38   : > { %5123 = vmatpush3.bf16.msra.mxu0 %v5827_v26  ;;  %v415_v26 = vand.u32 1, %v6341_v14  ;;  %v537_v33 = vand.u32 1, %v521_v25  ;;  %v6392_v0 = vcvt.f32.s32 %v5758_v54  ;;  %v6394_v1 = vcvt.f32.s32 %v5762_v55  ;;  %v5846_v25 = vld [vmem:[%s7615_s3 + $0x58] sm:$0xff]   ;;  %v331_v55 = vld [vmem:[%s6301_s15 + $0x70] sm:$0xff] }
  0x39   : > { %5163 = vmatpush3.bf16.msra.mxu1 %v5828_v27  ;;  %5124 = vmatprep.subr.bf16.mxu0 %v5829_v28  ;;  %v417_v27 = vand.u32 1, %v6343_v15  ;;  %v536_v28 = vand.u32 1, %v520_v20  ;;  %v551_v46 = vcvt.s32.f32 %v535_v32  ;;  %v526_v2 = vshra.s32 %v6382_v58, 1  ;;  %v5843_v32 = vld [vmem:[%s7615_s3 + $0x90] sm:$0xff]  }
  0x3a   : > { %5164 = vmatprep.subr.bf16.mxu1 %v5830_v29  ;;  %v538_v29 = vand.u32 1, %v522_v21  ;;  %v431_v34 = vcvt.s32.f32 %v415_v26  ;;  %v553_v47 = vcvt.s32.f32 %v537_v33  ;;  %v422_v3 = vand.u32 1, %v6382_v58  ;;  %v325_v21 = vld [vmem:[%s6301_s15 + $0x40] sm:$0xff] }
  0x3b   : > { %v360_v6 = vmul.f32 %v6315_v39, %v343_v59  ;;  %v362_v7 = vmul.f32 %v6315_v39, %v345_v60  ;;  %v540_v8 = vand.u32 1, %v524_v62  ;;  %v436_v9 = vcvt.s32.f32 %v420_v63  ;;  %v5850_v59 = vld [vmem:[%s7615_s3 + $0x60] sm:$0xff]   ;;  %v5847_v62 = vld [vmem:[%s7615_s3 + $0x98] sm:$0xff]  }
  0x3c   : > { %5125 = vmatpush3.bf16.msra.mxu0 %v5831_v30  ;;  %v432_v30 = vcvt.s32.f32 %v416_v22  ;;  %v554_v37 = vcvt.s32.f32 %v538_v29  ;;  %v6376_v56 = vpack.c.bf16 %v553_v47, %v551_v46  ;;  %v523_v10 = vshra.s32 %v6392_v0, 1  ;;  %v329_v47 = vld [vmem:[%s6301_s15 + $0x60] sm:$0xff] }
  0x3d   : > { %5165 = vmatpush3.bf16.msra.mxu1 %v5832_v31  ;;  %5190 = vmatprep.subr.bf16.mxu0 %v5833_v35  ;;  %v434_v31 = vcvt.s32.f32 %v418_v23  ;;  %v433_v35 = vcvt.s32.f32 %v417_v27  ;;  %v525_v11 = vshra.s32 %v6394_v1, 1  ;;  %v542_v17 = vand.u32 1, %v526_v2  ;;  %v327_v27 = vld [vmem:[%s6301_s15 + $0x50] sm:$0xff] }
  0x3e   : > { %5230 = vmatprep.subr.bf16.mxu1 %v5834_v36  ;;  %v552_v36 = vcvt.s32.f32 %v536_v28  ;;  %v438_v18 = vcvt.s32.f32 %v422_v3  ;;  %v419_v19 = vand.u32 1, %v6392_v0  ;;  %v421_v20 = vand.u32 1, %v6394_v1 }
  0x3f   : > { %v6353_v40 = vpack.c.bf16 %v434_v31, %v432_v30  ;;  %v6363_v48 = vpack.c.bf16 %v433_v35, %v431_v34  ;;  %v556_v22 = vcvt.s32.f32 %v540_v8  ;;  %v539_v23 = vand.u32 1, %v523_v10  ;;  %v5845_v35 = vld [vmem:[%s7615_s3 + $0xd8] sm:$0xff]  }
  0x40   : > { %v6368_v51 = vpack.c.bf16 %v554_v37, %v552_v36  ;;  %v541_v24 = vand.u32 1, %v525_v11  ;;  %v376_v26 = vmax.f32 %v360_v6, 0.0  ;;  %v558_v28 = vcvt.s32.f32 %v542_v17  ;;  %v5849_v6 = vld [vmem:[%s7615_s3 + $0xe0] sm:$0xff]  }
  0x41   : > { %897 = vmatprep.mubr.bf16.mxu1 %v6353_v40  ;;  %v6419_v29 = vpack.c.bf16 %v438_v18, %v436_v9  ;;  %v435_v30 = vcvt.s32.f32 %v419_v19  ;;  %v437_v31 = vcvt.s32.f32 %v421_v20  ;;  %v555_v33 = vcvt.s32.f32 %v539_v23  ;;  %v5852_v18 = vld [vmem:[%s7615_s3 + $0x20] sm:$0xff]  }
  0x42   : > { %898 = vmatmul.mubr.bf16.vlgmr.msra.gmra.mrb[0].mxu1 %v6363_v48  ;;  %736 = vmatprep.mubr.bf16.mxu0 %v6368_v51  ;;  %v557_v34 = vcvt.s32.f32 %v541_v24  ;;  %v378_v36 = vmax.f32 %v362_v7, 0.0  ;;  %v392_v37 = vmin.f32 %v376_v26, 255.0  ;;  %v6429_v43 = vpack.c.bf16 %v558_v28, %v556_v22  ;;  %v5851_v20 = vld [vmem:[%s7615_s3 + $0xa0] sm:$0xff]   ;;  %v5853_v28 = vld [vmem:[%s7615_s3 + $0xe8] sm:$0xff]  }
  0x43   : > { %5231 = vmatpush3.bf16.msra.mxu1 %v5836_v42  ;;  %737 = vmatmul.mubr.bf16.vlgmr.msra.gmra.mrb[0].mxu0 %v6376_v56  ;;  %v332_v42 = vld [vmem:[%s6301_s15 + $0x78] sm:$0xff]  ;;  %v6432_v44 = vpack.c.bf16 %v437_v31, %v435_v30  ;;  %v342_v46 = vsub.f32 %v325_v21, %v6313_v38  ;;  %v344_v54 = vsub.f32 %v327_v27, %v6313_v38 }
  0x44   : > { %5232 = vmatprep.subr.bf16.mxu1 %v5838_v49  ;;  %5191 = vmatpush3.bf16.msra.mxu0 %v5835_v41  ;;  %v330_v41 = vld [vmem:[%s6301_s15 + $0x68] sm:$0xff]  ;;  %v6439_v49 = vpack.c.bf16 %v557_v34, %v555_v33  ;;  %v394_v50 = vmin.f32 %v378_v36, 255.0  ;;  %v348_v9 = vsub.f32 %v331_v55, %v6313_v38 }
  0x45   : > { %5192 = vmatprep.subr.bf16.mxu0 %v5837_v52  ;;  %905 = vmatprep.mubr.bf16.mxu1 %v6419_v29  ;;  %v5768_v52 = vtrunc.f32 %v392_v37  ;;  %v347_v60 = vsub.f32 %v330_v41, %v6313_v38  ;;  %v361_v3 = vmul.f32 %v6315_v39, %v344_v54 }
  0x46   : > { %744 = vmatprep.mubr.bf16.mxu0 %v6429_v43  ;;  %v5772_v2 = vtrunc.f32 %v394_v50  ;;  %v365_v41 = vmul.f32 %v6315_v39, %v348_v9 }
  0x47   : > { %5233 = vmatpush3.bf16.msra.mxu1 %v5840_v57  ;;  %v359_v57 = vmul.f32 %v6315_v39, %v342_v46  ;;  %v6455_v63 = vcvt.f32.s32 %v5768_v52  ;;  %v364_v7 = vmul.f32 %v6315_v39, %v347_v60  ;;  %v377_v17 = vmax.f32 %v361_v3, 0.0  ;;  %v5860_v3 = vld [vmem:[%s7615_s3 + $0x30] sm:$0xff]  }
  0x48   : > { %5234 = vmatprep.subr.bf16.mxu1 %v5842_v5  ;;  %5193 = vmatpush3.bf16.msra.mxu0 %v5839_v61  ;;  %v349_v61 = vsub.f32 %v332_v42, %v6313_v38  ;;  %v6465_v10 = vcvt.f32.s32 %v5772_v2  ;;  %v5858_v42 = vld [vmem:[%s7615_s3 + $0x70] sm:$0xff]  }
  0x49   : > { %5194 = vmatprep.subr.bf16.mxu0 %v5841_v4  ;;  %v346_v4 = vsub.f32 %v329_v47, %v6313_v38  ;;  %v375_v5 = vmax.f32 %v359_v57, 0.0  ;;  %v528_v11 = vshra.s32 %v6455_v63, 1  ;;  %v5854_v38 = vld [vmem:[%s7615_s3 + $0x68] sm:$0xff]   ;;  %v380_v21 = vmax.f32 %v364_v7, 0.0  ;;  %v5857_v2 = vld [vmem:[%s7615_s3 + $0xf0] sm:$0xff]  }
  0x4a   : > { %906 = vmatmul.mubr.bf16.gmra.mrb[4].mxu1 %v6432_v44  ;;  %v366_v8 = vmul.f32 %v6315_v39, %v349_v61  ;;  %v530_v24 = vshra.s32 %v6465_v10, 1  ;;  %v426_v26 = vand.u32 1, %v6465_v10  ;;  %v393_v30 = vmin.f32 %v377_v17, 255.0  ;;  %v5855_v47 = vld [vmem:[%s7615_s3 + $0xa8] sm:$0xff]   ;;  %v5862_v17 = vld [vmem:[%s7615_s3 + $0x78] sm:$0xff]  }
  0x4b   : > { %5235 = vmatpush3.bf16.msra.mxu1 %v5844_v16  ;;  %745 = vmatmul.mubr.bf16.gmra.mrb[4].mxu0 %v6439_v49  ;;  %v424_v16 = vand.u32 1, %v6455_v63  ;;  %v391_v19 = vmin.f32 %v375_v5, 255.0  ;;  %v363_v23 = vmul.f32 %v6315_v39, %v346_v4  ;;  %v396_v33 = vmin.f32 %v380_v21, 255.0 }
  0x4c   : > { %5236 = vmatprep.subr.bf16.mxu1 %v5846_v25  ;;  %5195 = vmatpush3.bf16.msra.mxu0 %v5843_v32  ;;  %v382_v22 = vmax.f32 %v366_v8, 0.0  ;;  %v544_v25 = vand.u32 1, %v528_v11  ;;  %v5856_v32 = vld [vmem:[%s7615_s3 + $0x28] sm:$0xff]   ;;  %v442_v37 = vcvt.s32.f32 %v426_v26  ;;  %v5770_v46 = vtrunc.f32 %v393_v30 }
  0x4d   : > { %5196 = vmatprep.subr.bf16.mxu0 %v5845_v35  ;;  %v440_v27 = vcvt.s32.f32 %v424_v16  ;;  %v5766_v31 = vtrunc.f32 %v391_v19  ;;  %v546_v35 = vand.u32 1, %v530_v24  ;;  %v5776_v50 = vtrunc.f32 %v396_v33 }
  0x4e   : > { %v398_v34 = vmin.f32 %v382_v22, 255.0  ;;  %v560_v36 = vcvt.s32.f32 %v544_v25  ;;  %v379_v57 = vmax.f32 %v363_v23, 0.0  ;;  %v6498_v39 = vcvt.f32.s32 %v5770_v46  ;;  %v5859_v25 = vld [vmem:[%s7615_s3 + $0xb0] sm:$0xff]   ;;  %v5866_v46 = vld [vmem:[%s7615_s3 + $0x140] sm:$0xff]  }
  0x4f   : > { %5237 = vmatpush3.bf16.msra.mxu1 %v5848_v45  ;;  %v6491_v45 = vcvt.f32.s32 %v5766_v31  ;;  %v562_v54 = vcvt.s32.f32 %v546_v35  ;;  %v6496_v55 = vpack.c.bf16 %v442_v37, %v440_v27  ;;  %v5861_v31 = vld [vmem:[%s7615_s3 + $0xf8] sm:$0xff]  }
  0x50   : > { %5238 = vmatprep.subr.bf16.mxu1 %v5850_v59  ;;  %5197 = vmatpush3.bf16.msra.mxu0 %v5847_v62  ;;  %v5780_v52 = vtrunc.f32 %v398_v34  ;;  %v381_v59 = vmax.f32 %v365_v41, 0.0  ;;  %v6502_v62 = vcvt.f32.s32 %v5776_v50  ;;  %v529_v8 = vshra.s32 %v6498_v39, 1 }
  0x51   : > { %5198 = vmatprep.subr.bf16.mxu0 %v5849_v6  ;;  %v527_v60 = vshra.s32 %v6491_v45, 1  ;;  %v423_v61 = vand.u32 1, %v6491_v45  ;;  %v6510_v4 = vpack.c.bf16 %v562_v54, %v560_v36  ;;  %913 = vmatprep.mubr.bf16.mxu1 %v6496_v55  ;;  %v395_v6 = vmin.f32 %v379_v57, 255.0  ;;  %v5863_v57 = vld [vmem:[%s7615_s3 + $0xb8] sm:$0xff]  }
  0x52   : > { %v6513_v5 = vcvt.f32.s32 %v5780_v52  ;;  %v397_v7 = vmin.f32 %v381_v59, 255.0  ;;  %v425_v11 = vand.u32 1, %v6498_v39  ;;  %v545_v21 = vand.u32 1, %v529_v8  ;;  %v5865_v59 = vld [vmem:[%s7614_s2 + $0x140] sm:$0xff]  }
  0x53   : > { %5239 = vmatpush3.bf16.msra.mxu1 %v5852_v18  ;;  %v543_v9 = vand.u32 1, %v527_v60  ;;  %v439_v16 = vcvt.s32.f32 %v423_v61  ;;  %752 = vmatprep.mubr.bf16.mxu0 %v6510_v4  ;;  %v532_v18 = vshra.s32 %v6502_v62, 1  ;;  %v5774_v24 = vtrunc.f32 %v395_v6 }
  0x54   : > { %5240 = vmatprep.subr.bf16.mxu1 %v5854_v38  ;;  %5199 = vmatpush3.bf16.msra.mxu0 %v5851_v20  ;;  %v534_v19 = vshra.s32 %v6513_v5, 1  ;;  %v428_v20 = vand.u32 1, %v6502_v62  ;;  %v430_v38 = vand.u32 1, %v6513_v5  ;;  %v441_v23 = vcvt.s32.f32 %v425_v11 }
  0x55   : > { %5200 = vmatprep.subr.bf16.mxu0 %v5853_v28  ;;  %v559_v22 = vcvt.s32.f32 %v543_v9  ;;  %v548_v26 = vand.u32 1, %v532_v18  ;;  %v561_v33 = vcvt.s32.f32 %v545_v21  ;;  %v6536_v35 = vcvt.f32.s32 %v5774_v24  ;;  %v5868_v18 = vld [vmem:[%s7615_s3 + $0x100] sm:$0xff]   ;;  %v5873_v21 = vld [vmem:[%s7614_s2 + $0x150] sm:$0xff]  }
  0x56   : > { %v550_v27 = vand.u32 1, %v534_v19  ;;  %v444_v28 = vcvt.s32.f32 %v428_v20  ;;  %v446_v30 = vcvt.s32.f32 %v430_v38  ;;  %v6534_v34 = vpack.c.bf16 %v441_v23, %v439_v16  ;;  %v5870_v19 = vld [vmem:[%s7615_s3 + $0x148] sm:$0xff]   ;;  %v5867_v20 = vld [vmem:[%s7614_s2 + $0x100] sm:$0xff]   ;;  %v5874_v38 = vld [vmem:[%s7615_s3 + $0x150] sm:$0xff]  }
  0x57   : > { %5241 = vmatpush3.bf16.msra.mxu1 %v5856_v32  ;;  %v5864_v32 = vld [vmem:[%s7615_s3 + $0x38] sm:$0xff]   ;;  %v5778_v36 = vtrunc.f32 %v397_v7  ;;  %v564_v37 = vcvt.s32.f32 %v548_v26  ;;  %v531_v52 = vshra.s32 %v6536_v35, 1  ;;  %v427_v54 = vand.u32 1, %v6536_v35 }
  0x58   : > { %5242 = vmatprep.subr.bf16.mxu1 %v5858_v42  ;;  %5201 = vmatpush3.bf16.msra.mxu0 %v5855_v47  ;;  %v566_v41 = vcvt.s32.f32 %v550_v27  ;;  %v6538_v42 = vpack.c.bf16 %v446_v30, %v444_v28  ;;  %v6543_v47 = vpack.c.bf16 %v561_v33, %v559_v22  ;;  %v1286_v22 = vshra.s32 %v6337_v12, 2  ;;  %v5877_v23 = vld [vmem:[%s7614_s2 + $0x158] sm:$0xff]  }
  0x59   : > { %5202 = vmatprep.subr.bf16.mxu0 %v5857_v2  ;;  %914 = vmatmul.mubr.bf16.gmra.mrb[8].mxu1 %v6534_v34  ;;  %v6546_v50 = vcvt.f32.s32 %v5778_v36  ;;  %v547_v2 = vand.u32 1, %v531_v52  ;;  %v443_v6 = vcvt.s32.f32 %v427_v54  ;;  %v1288_v24 = vshra.s32 %v6339_v13, 2  ;;  %v5879_v26 = vld [vmem:[%s7614_s2 + $0x118] sm:$0xff]   ;;  %v5885_v36 = vld [vmem:[%s7614_s2 + $0x168] sm:$0xff]  }
  0x5a   : > { %v6556_v60 = vpack.c.bf16 %v566_v41, %v564_v37  ;;  %921 = vmatprep.mubr.bf16.mxu1 %v6538_v42  ;;  %753 = vmatmul.mubr.bf16.gmra.mrb[8].mxu0 %v6543_v47  ;;  %v1302_v27 = vand.u32 1, %v1286_v22  ;;  %v1285_v30 = vshra.s32 %v6341_v14, 2  ;;  %v1290_v33 = vshra.s32 %v6374_v53, 2  ;;  %v5888_v41 = vld [vmem:[%s7615_s3 + $0x128] sm:$0xff]   ;;  %v5897_v22 = vld [vmem:[%s7614_s2 + $0x1c0] sm:$0xff]  }
  0x5b   : > { %5243 = vmatpush3.bf16.msra.mxu1 %v5860_v3  ;;  %v533_v61 = vshra.s32 %v6546_v50, 1  ;;  %v429_v3 = vand.u32 1, %v6546_v50  ;;  %v563_v8 = vcvt.s32.f32 %v547_v2  ;;  %v1304_v28 = vand.u32 1, %v1288_v24  ;;  %v5892_v2 = vld [vmem:[%s7615_s3 + $0x130] sm:$0xff]  }
  0x5c   : > { %5244 = vmatprep.subr.bf16.mxu1 %v5862_v17  ;;  %5203 = vmatpush3.bf16.msra.mxu0 %v5859_v25  ;;  %v5880_v25 = vld [vmem:[%s7615_s3 + $0x118] sm:$0xff]   ;;  %v1292_v37 = vshra.s32 %v6382_v58, 2  ;;  %v1301_v54 = vand.u32 1, %v1285_v30 }
  0x5d   : > { %5204 = vmatprep.subr.bf16.mxu0 %v5861_v31  ;;  %760 = vmatprep.mubr.bf16.mxu0 %v6556_v60  ;;  %v549_v7 = vand.u32 1, %v533_v61  ;;  %v445_v9 = vcvt.s32.f32 %v429_v3  ;;  %v5886_v31 = vld [vmem:[%s7615_s3 + $0x168] sm:$0xff]   ;;  %v1320_v52 = vcvt.s32.f32 %v1304_v28  ;;  %v1306_v61 = vand.u32 1, %v1290_v33 }
  0x5e   : > { %v5901_v28 = vld [vmem:[%s7614_s2 + $0x1c8] sm:$0xff]  }
  0x5f   : > { %5245 = vmatpush3.bf16.msra.mxu1 %v5864_v32  ;;  %v565_v11 = vcvt.s32.f32 %v549_v7  ;;  %v6563_v16 = vpack.c.bf16 %v445_v9, %v443_v6  ;;  %v5883_v32 = vld [vmem:[%s7614_s2 + $0x120] sm:$0xff]   ;;  %v1289_v6 = vshra.s32 %v6392_v0, 2  ;;  %v1291_v7 = vshra.s32 %v6394_v1, 2 }
  0x60   : > { %5310 = vmatprep.subr.bf16.mxu1 %v5866_v46  ;;  %5205 = vmatpush3.bf16.msra.mxu0 %v5863_v57  ;;  %v1318_v46 = vcvt.s32.f32 %v1302_v27  ;;  %v1294_v9 = vshra.s32 %v6455_v63, 2  ;;  %v5899_v27 = vld [vmem:[%s7614_s2 + $0x180] sm:$0xff]  }
  0x61   : > { %5270 = vmatprep.subr.bf16.mxu0 %v5865_v59  ;;  %v6565_v17 = vpack.c.bf16 %v565_v11, %v563_v8  ;;  %922 = vmatmul.mubr.bf16.gmra.mrb[12].mxu1 %v6563_v16  ;;  %v5887_v59 = vld [vmem:[%s7614_s2 + $0x128] sm:$0xff]   ;;  %v5891_v8 = vld [vmem:[%s7614_s2 + $0x130] sm:$0xff]   ;;  %v5893_v11 = vld [vmem:[%s7614_s2 + $0x178] sm:$0xff]  }
  0x62   : > { %1252 = vmatprep.mubr.bf16.mxu1 %v6353_v40  ;;  %v5869_v40 = vld [vmem:[%s7614_s2 + $0x148] sm:$0xff]   ;;  %v1334_v3 = vpack.c.bf16 %v1320_v52, %v1318_v46 }
  0x63   : > { %761 = vmatmul.mubr.bf16.gmra.mrb[12].mxu0 %v6565_v17  ;;  %v5903_v46 = vld [vmem:[%s7614_s2 + $0x188] sm:$0xff]  }
  0x64   : > { %1091 = vmatprep.mubr.bf16.mxu0 %v6368_v51  ;;  %v5872_v51 = vld [vmem:[%s7615_s3 + $0x108] sm:$0xff]  }
  0x69   : > { %1253 = vmatmul.mubr.bf16.vlgmr.msra.gmra.mrb[16].mxu1 %v6363_v48  ;;  %v5871_v48 = vld [vmem:[%s7614_s2 + $0x108] sm:$0xff]  }
  0x6a   : > { %5311 = vmatpush3.bf16.msra.mxu1 %v5868_v18  ;;  %1260 = vmatprep.mubr.bf16.mxu1 %v6419_v29  ;;  %v5878_v29 = vld [vmem:[%s7615_s3 + $0x158] sm:$0xff]   ;;  %v1317_v18 = vcvt.s32.f32 %v1301_v54 }
  0x6b   : > { %1092 = vmatmul.mubr.bf16.vlgmr.msra.gmra.mrb[16].mxu0 %v6376_v56  ;;  %5312 = vmatprep.subr.bf16.mxu1 %v5870_v19  ;;  %v5876_v56 = vld [vmem:[%s7615_s3 + $0x110] sm:$0xff]  }
  0x6c   : > { %5271 = vmatpush3.bf16.msra.mxu0 %v5867_v20  ;;  %1099 = vmatprep.mubr.bf16.mxu0 %v6429_v43  ;;  %v5875_v43 = vld [vmem:[%s7614_s2 + $0x110] sm:$0xff]   ;;  %v1296_v20 = vshra.s32 %v6465_v10, 2 }
  0x6d   : > { %5272 = vmatprep.subr.bf16.mxu0 %v5869_v40  ;;  %v5896_v40 = vld [vmem:[%s7615_s3 + $0x138] sm:$0xff]  }
  0x6e   : > { %5313 = vmatpush3.bf16.msra.mxu1 %v5872_v51  ;;  %v1322_v51 = vcvt.s32.f32 %v1306_v61 }
  0x6f   : > { %5314 = vmatprep.subr.bf16.mxu1 %v5874_v38 }
  0x70   : > { %5273 = vmatpush3.bf16.msra.mxu0 %v5871_v48  ;;  %v1305_v48 = vand.u32 1, %v1289_v6  ;;  %v1746_v6 = vshra.s32 %v6337_v12, 3 }
  0x71   : > { %1261 = vmatmul.mubr.bf16.gmra.mrb[20].mxu1 %v6432_v44  ;;  %5274 = vmatprep.subr.bf16.mxu0 %v5873_v21  ;;  %v5882_v44 = vld [vmem:[%s7615_s3 + $0x160] sm:$0xff]   ;;  %v1307_v21 = vand.u32 1, %v1291_v7 }
  0x72   : > { %5315 = vmatpush3.bf16.msra.mxu1 %v5876_v56  ;;  %1268 = vmatprep.mubr.bf16.mxu1 %v6496_v55  ;;  %v5881_v55 = vld [vmem:[%s7614_s2 + $0x160] sm:$0xff]   ;;  %v5895_v56 = vld [vmem:[%s7614_s2 + $0x138] sm:$0xff]  }
  0x73   : > { %1100 = vmatmul.mubr.bf16.gmra.mrb[20].mxu0 %v6439_v49  ;;  %5316 = vmatprep.subr.bf16.mxu1 %v5878_v29  ;;  %v5884_v49 = vld [vmem:[%s7615_s3 + $0x120] sm:$0xff]   ;;  %v1310_v29 = vand.u32 1, %v1294_v9  ;;  %v1323_v30 = vcvt.s32.f32 %v1307_v21  ;;  %v1748_v9 = vshra.s32 %v6339_v13, 3 }
  0x74   : > { %5275 = vmatpush3.bf16.msra.mxu0 %v5875_v43  ;;  %1107 = vmatprep.mubr.bf16.mxu0 %v6510_v4  ;;  %v1287_v4 = vshra.s32 %v6343_v15, 2  ;;  %v5913_v21 = vld [vmem:[%s7614_s2 + $0x1e0] sm:$0xff]  }
  0x75   : > { %5276 = vmatprep.subr.bf16.mxu0 %v5877_v23  ;;  %v5900_v23 = vld [vmem:[%s7615_s3 + $0x180] sm:$0xff]  }
  0x76   : > { %5317 = vmatpush3.bf16.msra.mxu1 %v5880_v25  ;;  %v1303_v57 = vand.u32 1, %v1287_v4  ;;  %v1293_v25 = vshra.s32 %v6491_v45, 2  ;;  %v5904_v4 = vld [vmem:[%s7615_s3 + $0x188] sm:$0xff]  }
  0x77   : > { %5318 = vmatprep.subr.bf16.mxu1 %v5882_v44  ;;  %v5902_v44 = vld [vmem:[%s7615_s3 + $0x1c8] sm:$0xff]  }
  0x78   : > { %5277 = vmatpush3.bf16.msra.mxu0 %v5879_v26  ;;  %v1319_v19 = vcvt.s32.f32 %v1303_v57  ;;  %v1295_v26 = vshra.s32 %v6498_v39, 2 }
  0x79   : > { %1269 = vmatmul.mubr.bf16.gmra.mrb[24].mxu1 %v6534_v34  ;;  %5278 = vmatprep.subr.bf16.mxu0 %v5881_v55  ;;  %v5890_v34 = vld [vmem:[%s7615_s3 + $0x170] sm:$0xff]   ;;  %v1298_v55 = vshra.s32 %v6502_v62, 2 }
  0x7a   : > { %5319 = vmatpush3.bf16.msra.mxu1 %v5884_v49  ;;  %1276 = vmatprep.mubr.bf16.mxu1 %v6538_v42  ;;  %v5889_v42 = vld [vmem:[%s7614_s2 + $0x170] sm:$0xff]   ;;  %v1333_v43 = vpack.c.bf16 %v1319_v19, %v1317_v18  ;;  %v1321_v49 = vcvt.s32.f32 %v1305_v48  ;;  %v1762_v48 = vand.u32 1, %v1746_v6  ;;  %v1756_v6 = vshra.s32 %v6465_v10, 3 }
  0x7b   : > { %1108 = vmatmul.mubr.bf16.gmra.mrb[24].mxu0 %v6543_v47  ;;  %5320 = vmatprep.subr.bf16.mxu1 %v5886_v31  ;;  %v1308_v47 = vand.u32 1, %v1292_v37  ;;  %v1300_v31 = vshra.s32 %v6513_v5, 2  ;;  %v5906_v37 = vld [vmem:[%s7615_s3 + $0x1d0] sm:$0xff]   ;;  %v1314_v52 = vand.u32 1, %v1298_v55  ;;  %v1752_v55 = vshra.s32 %v6382_v58, 3 }
  0x7c   : > { %5279 = vmatpush3.bf16.msra.mxu0 %v5883_v32  ;;  %1115 = vmatprep.mubr.bf16.mxu0 %v6556_v60  ;;  %v5894_v60 = vld [vmem:[%s7615_s3 + $0x178] sm:$0xff]   ;;  %v1326_v32 = vcvt.s32.f32 %v1310_v29  ;;  %v1335_v54 = vpack.c.bf16 %v1323_v30, %v1321_v49  ;;  %v5916_v29 = vld [vmem:[%s7615_s3 + $0x1a0] sm:$0xff]   ;;  %v1778_v49 = vcvt.s32.f32 %v1762_v48 }
  0x7d   : > { %5280 = vmatprep.subr.bf16.mxu0 %v5885_v36  ;;  %v1324_v38 = vcvt.s32.f32 %v1308_v47  ;;  %v1309_v36 = vand.u32 1, %v1293_v25  ;;  %v1316_v57 = vand.u32 1, %v1300_v31  ;;  %v5910_v47 = vld [vmem:[%s7615_s3 + $0x1d8] sm:$0xff]   ;;  %v1330_v18 = vcvt.s32.f32 %v1314_v52  ;;  %v5924_v52 = vld [vmem:[%s7615_s3 + $0x1b0] sm:$0xff]   ;;  %v5932_v48 = vld [vmem:[%s7615_s3 + $0x200] sm:$0xff]  }
  0x7e   : > { %5321 = vmatpush3.bf16.msra.mxu1 %v5888_v41  ;;  %v1311_v41 = vand.u32 1, %v1295_v26  ;;  %v1750_v25 = vshra.s32 %v6374_v53, 3 }
  0x7f   : > { %5322 = vmatprep.subr.bf16.mxu1 %v5890_v34  ;;  %v1336_v24 = vpack.c.bf16 %v1324_v38, %v1322_v51  ;;  %v5905_v34 = vld [vmem:[%s7614_s2 + $0x1d0] sm:$0xff]   ;;  %v1325_v7 = vcvt.s32.f32 %v1309_v36  ;;  %v1332_v19 = vcvt.s32.f32 %v1316_v57  ;;  %v5911_v38 = vld [vmem:[%s7614_s2 + $0x198] sm:$0xff]  }
  0x80   : > { %5281 = vmatpush3.bf16.msra.mxu0 %v5887_v59  ;;  %v5908_v59 = vld [vmem:[%s7615_s3 + $0x190] sm:$0xff]   ;;  %v1766_v36 = vand.u32 1, %v1750_v25  ;;  %v5926_v57 = vld [vmem:[%s7615_s3 + $0x1f8] sm:$0xff]   ;;  %v1760_v25 = vshra.s32 %v6513_v5, 3 }
  0x81   : > { %1277 = vmatmul.mubr.bf16.gmra.mrb[28].mxu1 %v6563_v16  ;;  %5282 = vmatprep.subr.bf16.mxu0 %v5889_v42  ;;  %v5898_v16 = vld [vmem:[%s7615_s3 + $0x1c0] sm:$0xff]   ;;  %v1297_v42 = vshra.s32 %v6536_v35, 2 }
  0x82   : > { %5323 = vmatpush3.bf16.msra.mxu1 %v5892_v2  ;;  %1704 = vmatprep.mubr.bf16.mxu1 %v1334_v3  ;;  %v1299_v2 = vshra.s32 %v6546_v50, 2 }
  0x83   : > { %1116 = vmatmul.mubr.bf16.gmra.mrb[28].mxu0 %v6565_v17  ;;  %5324 = vmatprep.subr.bf16.mxu1 %v5894_v60  ;;  %v1312_v17 = vand.u32 1, %v1296_v20  ;;  %v5909_v60 = vld [vmem:[%s7614_s2 + $0x1d8] sm:$0xff]   ;;  %v1313_v20 = vand.u32 1, %v1297_v42  ;;  %v1754_v42 = vshra.s32 %v6455_v63, 3 }
  0x84   : > { %5283 = vmatpush3.bf16.msra.mxu0 %v5891_v8  ;;  %1502 = vmatprep.mubr.bf16.mxu0 %v1334_v3  ;;  %v5907_v3 = vld [vmem:[%s7614_s2 + $0x190] sm:$0xff]   ;;  %v1327_v8 = vcvt.s32.f32 %v1311_v41  ;;  %v1315_v51 = vand.u32 1, %v1299_v2 }
  0x85   : > { %5284 = vmatprep.subr.bf16.mxu0 %v5893_v11  ;;  %v1328_v33 = vcvt.s32.f32 %v1312_v17  ;;  %v5912_v11 = vld [vmem:[%s7615_s3 + $0x198] sm:$0xff]   ;;  %v5918_v17 = vld [vmem:[%s7615_s3 + $0x1e8] sm:$0xff]   ;;  %v1329_v26 = vcvt.s32.f32 %v1313_v20  ;;  %v5921_v41 = vld [vmem:[%s7614_s2 + $0x1f0] sm:$0xff]   ;;  %v1770_v20 = vand.u32 1, %v1754_v42  ;;  %v2208_v42 = vshra.s32 %v6339_v13, 4 }
  0x86   : > { %5325 = vmatpush3.bf16.msra.mxu1 %v5896_v40  ;;  %v5914_v40 = vld [vmem:[%s7615_s3 + $0x1e0] sm:$0xff]  }
  0x87   : > { %5390 = vmatprep.subr.bf16.mxu1 %v5898_v16  ;;  %v1338_v61 = vpack.c.bf16 %v1328_v33, %v1326_v32  ;;  %v1337_v16 = vpack.c.bf16 %v1327_v8, %v1325_v7  ;;  %v5919_v33 = vld [vmem:[%s7614_s2 + $0x1a8] sm:$0xff]   ;;  %v1782_v7 = vcvt.s32.f32 %v1766_v36  ;;  %v5940_v36 = vld [vmem:[%s7615_s3 + $0x210] sm:$0xff]  }
  0x88   : > { %5285 = vmatpush3.bf16.msra.mxu0 %v5895_v56  ;;  %v1764_v56 = vand.u32 1, %v1748_v9 }
  0x89   : > { %1705 = vmatmul.mubr.bf16.vlgmr.msra.gmra.mrb[32].mxu1 %v1333_v43  ;;  %5350 = vmatprep.subr.bf16.mxu0 %v5897_v22  ;;  %v1745_v22 = vshra.s32 %v6341_v14, 3 }
  0x8a   : > { %5391 = vmatpush3.bf16.msra.mxu1 %v5900_v23  ;;  %1712 = vmatprep.mubr.bf16.mxu1 %v1336_v24  ;;  %v1747_v23 = vshra.s32 %v6343_v15, 3  ;;  %v1780_v30 = vcvt.s32.f32 %v1764_v56  ;;  %v5934_v56 = vld [vmem:[%s7615_s3 + $0x248] sm:$0xff]  }
  0x8b   : > { %1503 = vmatmul.mubr.bf16.vlgmr.msra.gmra.mrb[32].mxu0 %v1333_v43  ;;  %5392 = vmatprep.subr.bf16.mxu1 %v5902_v44  ;;  %v1340_v43 = vpack.c.bf16 %v1332_v19, %v1330_v18  ;;  %v5917_v44 = vld [vmem:[%s7614_s2 + $0x1e8] sm:$0xff]   ;;  %v1761_v31 = vand.u32 1, %v1745_v22  ;;  %v5927_v19 = vld [vmem:[%s7614_s2 + $0x1b8] sm:$0xff]   ;;  %v1758_v22 = vshra.s32 %v6502_v62, 3 }
  0x8c   : > { %5351 = vmatpush3.bf16.msra.mxu0 %v5899_v27  ;;  %1510 = vmatprep.mubr.bf16.mxu0 %v1336_v24  ;;  %v5915_v24 = vld [vmem:[%s7614_s2 + $0x1a0] sm:$0xff]   ;;  %v1331_v27 = vcvt.s32.f32 %v1315_v51  ;;  %v1763_v32 = vand.u32 1, %v1747_v23 }
  0x8d   : > { %5352 = vmatprep.subr.bf16.mxu0 %v5901_v28  ;;  %v5920_v28 = vld [vmem:[%s7615_s3 + $0x1a8] sm:$0xff]   ;;  %v1777_v2 = vcvt.s32.f32 %v1761_v31  ;;  %v5929_v51 = vld [vmem:[%s7614_s2 + $0x240] sm:$0xff]   ;;  %v1774_v31 = vand.u32 1, %v1758_v22  ;;  %v2212_v22 = vshra.s32 %v6382_v58, 4 }
  0x8e   : > { %5393 = vmatpush3.bf16.msra.mxu1 %v5904_v4  ;;  %v5922_v4 = vld [vmem:[%s7615_s3 + $0x1f0] sm:$0xff]  }
  0x8f   : > { %5394 = vmatprep.subr.bf16.mxu1 %v5906_v37  ;;  %v1339_v37 = vpack.c.bf16 %v1331_v27, %v1329_v26  ;;  %v1786_v26 = vcvt.s32.f32 %v1770_v20  ;;  %v5948_v20 = vld [vmem:[%s7615_s3 + $0x220] sm:$0xff]  }
  0x90   : > { %5353 = vmatpush3.bf16.msra.mxu0 %v5903_v46  ;;  %v1768_v46 = vand.u32 1, %v1752_v55 }
  0x91   : > { %1713 = vmatmul.mubr.bf16.gmra.mrb[36].mxu1 %v1335_v54  ;;  %5354 = vmatprep.subr.bf16.mxu0 %v5905_v34  ;;  %v1749_v34 = vshra.s32 %v6392_v0, 3 }
  0x92   : > { %5395 = vmatpush3.bf16.msra.mxu1 %v5908_v59  ;;  %1720 = vmatprep.mubr.bf16.mxu1 %v1338_v61  ;;  %v1751_v59 = vshra.s32 %v6394_v1, 3  ;;  %v1784_v8 = vcvt.s32.f32 %v1768_v46  ;;  %v5942_v46 = vld [vmem:[%s7615_s3 + $0x258] sm:$0xff]  }
  0x93   : > { %1511 = vmatmul.mubr.bf16.gmra.mrb[36].mxu0 %v1335_v54  ;;  %5396 = vmatprep.subr.bf16.mxu1 %v5910_v47  ;;  %v1794_v54 = vpack.c.bf16 %v1780_v30, %v1778_v49  ;;  %v5925_v47 = vld [vmem:[%s7614_s2 + $0x1f8] sm:$0xff]   ;;  %v1765_v9 = vand.u32 1, %v1749_v34  ;;  %v5935_v30 = vld [vmem:[%s7614_s2 + $0x208] sm:$0xff]   ;;  %v2206_v34 = vshra.s32 %v6337_v12, 4 }
  0x94   : > { %5355 = vmatpush3.bf16.msra.mxu0 %v5907_v3  ;;  %1518 = vmatprep.mubr.bf16.mxu0 %v1338_v61  ;;  %v5923_v61 = vld [vmem:[%s7614_s2 + $0x1b0] sm:$0xff]   ;;  %v1779_v3 = vcvt.s32.f32 %v1763_v32  ;;  %v1767_v18 = vand.u32 1, %v1751_v59 }
  0x95   : > { %5356 = vmatprep.subr.bf16.mxu0 %v5909_v60  ;;  %v5928_v60 = vld [vmem:[%s7615_s3 + $0x1b8] sm:$0xff]   ;;  %v1781_v23 = vcvt.s32.f32 %v1765_v9  ;;  %v5937_v32 = vld [vmem:[%s7614_s2 + $0x250] sm:$0xff]   ;;  %v2222_v9 = vand.u32 1, %v2206_v34  ;;  %v2216_v34 = vshra.s32 %v6465_v10, 4 }
  0x96   : > { %5397 = vmatpush3.bf16.msra.mxu1 %v5912_v11  ;;  %v5930_v11 = vld [vmem:[%s7615_s3 + $0x240] sm:$0xff]  }
  0x97   : > { %5398 = vmatprep.subr.bf16.mxu1 %v5914_v40  ;;  %v1793_v40 = vpack.c.bf16 %v1779_v3, %v1777_v2  ;;  %v1790_v2 = vcvt.s32.f32 %v1774_v31  ;;  %v5956_v31 = vld [vmem:[%s7615_s3 + $0x230] sm:$0xff]  }
  0x98   : > { %5357 = vmatpush3.bf16.msra.mxu0 %v5911_v38  ;;  %v1772_v38 = vand.u32 1, %v1756_v6 }
  0x99   : > { %1721 = vmatmul.mubr.bf16.gmra.mrb[40].mxu1 %v1337_v16  ;;  %5358 = vmatprep.subr.bf16.mxu0 %v5913_v21  ;;  %v1753_v21 = vshra.s32 %v6491_v45, 3 }
  0x9a   : > { %5399 = vmatpush3.bf16.msra.mxu1 %v5916_v29  ;;  %1728 = vmatprep.mubr.bf16.mxu1 %v1340_v43  ;;  %v1755_v29 = vshra.s32 %v6498_v39, 3  ;;  %v1788_v27 = vcvt.s32.f32 %v1772_v38  ;;  %v5950_v38 = vld [vmem:[%s7615_s3 + $0x268] sm:$0xff]  }
  0x9b   : > { %1519 = vmatmul.mubr.bf16.gmra.mrb[40].mxu0 %v1337_v16  ;;  %5400 = vmatprep.subr.bf16.mxu1 %v5918_v17  ;;  %v1796_v16 = vpack.c.bf16 %v1784_v8, %v1782_v7  ;;  %v5933_v17 = vld [vmem:[%s7614_s2 + $0x248] sm:$0xff]   ;;  %v1769_v55 = vand.u32 1, %v1753_v21  ;;  %v5943_v8 = vld [vmem:[%s7614_s2 + $0x218] sm:$0xff]   ;;  %v2210_v21 = vshra.s32 %v6374_v53, 4 }
  0x9c   : > { %5359 = vmatpush3.bf16.msra.mxu0 %v5915_v24  ;;  %1526 = vmatprep.mubr.bf16.mxu0 %v1340_v43  ;;  %v5931_v43 = vld [vmem:[%s7614_s2 + $0x200] sm:$0xff]   ;;  %v1783_v24 = vcvt.s32.f32 %v1767_v18  ;;  %v1771_v49 = vand.u32 1, %v1755_v29 }
  0x9d   : > { %5360 = vmatprep.subr.bf16.mxu0 %v5917_v44  ;;  %v5936_v44 = vld [vmem:[%s7615_s3 + $0x208] sm:$0xff]   ;;  %v1785_v59 = vcvt.s32.f32 %v1769_v55  ;;  %v5945_v18 = vld [vmem:[%s7614_s2 + $0x260] sm:$0xff]   ;;  %v2226_v55 = vand.u32 1, %v2210_v21  ;;  %v2220_v21 = vshra.s32 %v6513_v5, 4 }
  0x9e   : > { %5401 = vmatpush3.bf16.msra.mxu1 %v5920_v28  ;;  %v5938_v28 = vld [vmem:[%s7615_s3 + $0x250] sm:$0xff]  }
  0x9f   : > { %5402 = vmatprep.subr.bf16.mxu1 %v5922_v4  ;;  %v1795_v4 = vpack.c.bf16 %v1783_v24, %v1781_v23  ;;  %v2238_v23 = vcvt.s32.f32 %v2222_v9  ;;  %v5964_v9 = vld [vmem:[%s7615_s3 + $0x280] sm:$0xff]  }
  0xa0   : > { %5361 = vmatpush3.bf16.msra.mxu0 %v5919_v33  ;;  %v1776_v33 = vand.u32 1, %v1760_v25 }
  0xa1   : > { %1729 = vmatmul.mubr.bf16.gmra.mrb[44].mxu1 %v1339_v37  ;;  %5362 = vmatprep.subr.bf16.mxu0 %v5921_v41  ;;  %v1757_v41 = vshra.s32 %v6536_v35, 3 }
  0xa2   : > { %5403 = vmatpush3.bf16.msra.mxu1 %v5924_v52  ;;  %2164 = vmatprep.mubr.bf16.mxu1 %v1794_v54  ;;  %v1759_v52 = vshra.s32 %v6546_v50, 3  ;;  %v1792_v3 = vcvt.s32.f32 %v1776_v33  ;;  %v5958_v33 = vld [vmem:[%s7615_s3 + $0x278] sm:$0xff]  }
  0xa3   : > { %1527 = vmatmul.mubr.bf16.gmra.mrb[44].mxu0 %v1339_v37  ;;  %5404 = vmatprep.subr.bf16.mxu1 %v5926_v57  ;;  %v1798_v37 = vpack.c.bf16 %v1788_v27, %v1786_v26  ;;  %v5941_v57 = vld [vmem:[%s7614_s2 + $0x258] sm:$0xff]   ;;  %v1773_v6 = vand.u32 1, %v1757_v41  ;;  %v5951_v27 = vld [vmem:[%s7614_s2 + $0x228] sm:$0xff]   ;;  %v2214_v41 = vshra.s32 %v6455_v63, 4 }
  0xa4   : > { %5363 = vmatpush3.bf16.msra.mxu0 %v5923_v61  ;;  %1962 = vmatprep.mubr.bf16.mxu0 %v1794_v54  ;;  %v5939_v54 = vld [vmem:[%s7614_s2 + $0x210] sm:$0xff]   ;;  %v1787_v61 = vcvt.s32.f32 %v1771_v49  ;;  %v1775_v7 = vand.u32 1, %v1759_v52 }
  0xa5   : > { %5364 = vmatprep.subr.bf16.mxu0 %v5925_v47  ;;  %v5944_v47 = vld [vmem:[%s7615_s3 + $0x218] sm:$0xff]   ;;  %v1789_v29 = vcvt.s32.f32 %v1773_v6  ;;  %v5953_v49 = vld [vmem:[%s7614_s2 + $0x270] sm:$0xff]   ;;  %v2230_v6 = vand.u32 1, %v2214_v41  ;;  %v2668_v41 = vshra.s32 %v6339_v13, 5 }
  0xa6   : > { %5405 = vmatpush3.bf16.msra.mxu1 %v5928_v60  ;;  %v5946_v60 = vld [vmem:[%s7615_s3 + $0x260] sm:$0xff]  }
  0xa7   : > { %5470 = vmatprep.subr.bf16.mxu1 %v5930_v11  ;;  %v1797_v11 = vpack.c.bf16 %v1787_v61, %v1785_v59  ;;  %v2242_v59 = vcvt.s32.f32 %v2226_v55  ;;  %v5972_v55 = vld [vmem:[%s7615_s3 + $0x290] sm:$0xff]  }
  0xa8   : > { %5365 = vmatpush3.bf16.msra.mxu0 %v5927_v19  ;;  %v2224_v19 = vand.u32 1, %v2208_v42 }
  0xa9   : > { %2165 = vmatmul.mubr.bf16.vlgmr.msra.gmra.mrb[48].mxu1 %v1793_v40  ;;  %5430 = vmatprep.subr.bf16.mxu0 %v5929_v51  ;;  %v2205_v51 = vshra.s32 %v6341_v14, 4 }
  0xaa   : > { %5471 = vmatpush3.bf16.msra.mxu1 %v5932_v48  ;;  %2172 = vmatprep.mubr.bf16.mxu1 %v1796_v16  ;;  %v2207_v48 = vshra.s32 %v6343_v15, 4  ;;  %v2240_v24 = vcvt.s32.f32 %v2224_v19  ;;  %v5966_v19 = vld [vmem:[%s7615_s3 + $0x2c8] sm:$0xff]  }
  0xab   : > { %1963 = vmatmul.mubr.bf16.vlgmr.msra.gmra.mrb[48].mxu0 %v1793_v40  ;;  %5472 = vmatprep.subr.bf16.mxu1 %v5934_v56  ;;  %v1800_v40 = vpack.c.bf16 %v1792_v3, %v1790_v2  ;;  %v5949_v56 = vld [vmem:[%s7614_s2 + $0x268] sm:$0xff]   ;;  %v2221_v25 = vand.u32 1, %v2205_v51  ;;  %v5959_v3 = vld [vmem:[%s7614_s2 + $0x238] sm:$0xff]   ;;  %v2218_v51 = vshra.s32 %v6502_v62, 4 }
  0xac   : > { %5431 = vmatpush3.bf16.msra.mxu0 %v5931_v43  ;;  %1970 = vmatprep.mubr.bf16.mxu0 %v1796_v16  ;;  %v5947_v16 = vld [vmem:[%s7614_s2 + $0x220] sm:$0xff]   ;;  %v1791_v43 = vcvt.s32.f32 %v1775_v7  ;;  %v2223_v26 = vand.u32 1, %v2207_v48 }
  0xad   : > { %5432 = vmatprep.subr.bf16.mxu0 %v5933_v17  ;;  %v5952_v17 = vld [vmem:[%s7615_s3 + $0x228] sm:$0xff]   ;;  %v2237_v52 = vcvt.s32.f32 %v2221_v25  ;;  %v5961_v7 = vld [vmem:[%s7614_s2 + $0x2c0] sm:$0xff]   ;;  %v2234_v25 = vand.u32 1, %v2218_v51  ;;  %v2672_v51 = vshra.s32 %v6382_v58, 5 }
  0xae   : > { %5473 = vmatpush3.bf16.msra.mxu1 %v5936_v44  ;;  %v5954_v44 = vld [vmem:[%s7615_s3 + $0x270] sm:$0xff]  }
  0xaf   : > { %5474 = vmatprep.subr.bf16.mxu1 %v5938_v28  ;;  %v1799_v28 = vpack.c.bf16 %v1791_v43, %v1789_v29  ;;  %v2246_v29 = vcvt.s32.f32 %v2230_v6  ;;  %v5980_v6 = vld [vmem:[%s7615_s3 + $0x2a0] sm:$0xff]  }
  0xb0   : > { %5433 = vmatpush3.bf16.msra.mxu0 %v5935_v30  ;;  %v2228_v30 = vand.u32 1, %v2212_v22 }
  0xb1   : > { %2173 = vmatmul.mubr.bf16.gmra.mrb[52].mxu1 %v1795_v4  ;;  %5434 = vmatprep.subr.bf16.mxu0 %v5937_v32  ;;  %v2209_v32 = vshra.s32 %v6392_v0, 4 }
  0xb2   : > { %5475 = vmatpush3.bf16.msra.mxu1 %v5940_v36  ;;  %2180 = vmatprep.mubr.bf16.mxu1 %v1798_v37  ;;  %v2211_v36 = vshra.s32 %v6394_v1, 4  ;;  %v2244_v61 = vcvt.s32.f32 %v2228_v30  ;;  %v5974_v30 = vld [vmem:[%s7615_s3 + $0x2d8] sm:$0xff]  }
  0xb3   : > { %1971 = vmatmul.mubr.bf16.gmra.mrb[52].mxu0 %v1795_v4  ;;  %5476 = vmatprep.subr.bf16.mxu1 %v5942_v46  ;;  %v2254_v4 = vpack.c.bf16 %v2240_v24, %v2238_v23  ;;  %v5957_v46 = vld [vmem:[%s7614_s2 + $0x278] sm:$0xff]   ;;  %v2225_v42 = vand.u32 1, %v2209_v32  ;;  %v5967_v24 = vld [vmem:[%s7614_s2 + $0x288] sm:$0xff]   ;;  %v2666_v32 = vshra.s32 %v6337_v12, 5 }
  0xb4   : > { %5435 = vmatpush3.bf16.msra.mxu0 %v5939_v54  ;;  %1978 = vmatprep.mubr.bf16.mxu0 %v1798_v37  ;;  %v5955_v37 = vld [vmem:[%s7614_s2 + $0x230] sm:$0xff]   ;;  %v2239_v54 = vcvt.s32.f32 %v2223_v26  ;;  %v2227_v2 = vand.u32 1, %v2211_v36 }
  0xb5   : > { %5436 = vmatprep.subr.bf16.mxu0 %v5941_v57  ;;  %v5960_v57 = vld [vmem:[%s7615_s3 + $0x238] sm:$0xff]   ;;  %v2241_v48 = vcvt.s32.f32 %v2225_v42  ;;  %v5969_v26 = vld [vmem:[%s7614_s2 + $0x2d0] sm:$0xff]   ;;  %v2682_v42 = vand.u32 1, %v2666_v32  ;;  %v2676_v32 = vshra.s32 %v6465_v10, 5 }
  0xb6   : > { %5477 = vmatpush3.bf16.msra.mxu1 %v5944_v47  ;;  %v5962_v47 = vld [vmem:[%s7615_s3 + $0x2c0] sm:$0xff]  }
  0xb7   : > { %5478 = vmatprep.subr.bf16.mxu1 %v5946_v60  ;;  %v2253_v60 = vpack.c.bf16 %v2239_v54, %v2237_v52  ;;  %v2250_v52 = vcvt.s32.f32 %v2234_v25  ;;  %v5988_v25 = vld [vmem:[%s7615_s3 + $0x2b0] sm:$0xff]  }
  0xb8   : > { %5437 = vmatpush3.bf16.msra.mxu0 %v5943_v8  ;;  %v2232_v8 = vand.u32 1, %v2216_v34 }
  0xb9   : > { %2181 = vmatmul.mubr.bf16.gmra.mrb[56].mxu1 %v1797_v11  ;;  %5438 = vmatprep.subr.bf16.mxu0 %v5945_v18  ;;  %v2213_v18 = vshra.s32 %v6491_v45, 4 }
  0xba   : > { %5479 = vmatpush3.bf16.msra.mxu1 %v5948_v20  ;;  %2188 = vmatprep.mubr.bf16.mxu1 %v1800_v40  ;;  %v2215_v20 = vshra.s32 %v6498_v39, 4  ;;  %v2248_v43 = vcvt.s32.f32 %v2232_v8  ;;  %v5982_v8 = vld [vmem:[%s7615_s3 + $0x2e8] sm:$0xff]  }
  0xbb   : > { %1979 = vmatmul.mubr.bf16.gmra.mrb[56].mxu0 %v1797_v11  ;;  %5480 = vmatprep.subr.bf16.mxu1 %v5950_v38  ;;  %v2256_v11 = vpack.c.bf16 %v2244_v61, %v2242_v59  ;;  %v5965_v38 = vld [vmem:[%s7614_s2 + $0x2c8] sm:$0xff]   ;;  %v2229_v22 = vand.u32 1, %v2213_v18  ;;  %v5975_v61 = vld [vmem:[%s7614_s2 + $0x298] sm:$0xff]   ;;  %v2670_v18 = vshra.s32 %v6374_v53, 5 }
  0xbc   : > { %5439 = vmatpush3.bf16.msra.mxu0 %v5947_v16  ;;  %1986 = vmatprep.mubr.bf16.mxu0 %v1800_v40  ;;  %v5963_v40 = vld [vmem:[%s7614_s2 + $0x280] sm:$0xff]   ;;  %v2243_v16 = vcvt.s32.f32 %v2227_v2  ;;  %v2231_v23 = vand.u32 1, %v2215_v20 }
  0xbd   : > { %5440 = vmatprep.subr.bf16.mxu0 %v5949_v56  ;;  %v5968_v56 = vld [vmem:[%s7615_s3 + $0x288] sm:$0xff]   ;;  %v2245_v36 = vcvt.s32.f32 %v2229_v22  ;;  %v5977_v2 = vld [vmem:[%s7614_s2 + $0x2e0] sm:$0xff]   ;;  %v2686_v22 = vand.u32 1, %v2670_v18  ;;  %v2680_v18 = vshra.s32 %v6513_v5, 5 }
  0xbe   : > { %5481 = vmatpush3.bf16.msra.mxu1 %v5952_v17  ;;  %v5970_v17 = vld [vmem:[%s7615_s3 + $0x2d0] sm:$0xff]  }
  0xbf   : > { %5482 = vmatprep.subr.bf16.mxu1 %v5954_v44  ;;  %v2255_v44 = vpack.c.bf16 %v2243_v16, %v2241_v48  ;;  %v2698_v48 = vcvt.s32.f32 %v2682_v42  ;;  %v5996_v42 = vld [vmem:[%s7615_s3 + $0x300] sm:$0xff]  }
  0xc0   : > { %5441 = vmatpush3.bf16.msra.mxu0 %v5951_v27  ;;  %v2236_v27 = vand.u32 1, %v2220_v21 }
  0xc1   : > { %2189 = vmatmul.mubr.bf16.gmra.mrb[60].mxu1 %v1799_v28  ;;  %5442 = vmatprep.subr.bf16.mxu0 %v5953_v49  ;;  %v2217_v49 = vshra.s32 %v6536_v35, 4 }
  0xc2   : > { %5483 = vmatpush3.bf16.msra.mxu1 %v5956_v31  ;;  %2624 = vmatprep.mubr.bf16.mxu1 %v2254_v4  ;;  %v2219_v31 = vshra.s32 %v6546_v50, 4  ;;  %v2252_v54 = vcvt.s32.f32 %v2236_v27  ;;  %v5990_v27 = vld [vmem:[%s7615_s3 + $0x2f8] sm:$0xff]  }
  0xc3   : > { %1987 = vmatmul.mubr.bf16.gmra.mrb[60].mxu0 %v1799_v28  ;;  %5484 = vmatprep.subr.bf16.mxu1 %v5958_v33  ;;  %v2258_v28 = vpack.c.bf16 %v2248_v43, %v2246_v29  ;;  %v5973_v33 = vld [vmem:[%s7614_s2 + $0x2d8] sm:$0xff]   ;;  %v2233_v34 = vand.u32 1, %v2217_v49  ;;  %v5983_v43 = vld [vmem:[%s7614_s2 + $0x2a8] sm:$0xff]   ;;  %v2674_v49 = vshra.s32 %v6455_v63, 5 }
  0xc4   : > { %5443 = vmatpush3.bf16.msra.mxu0 %v5955_v37  ;;  %2422 = vmatprep.mubr.bf16.mxu0 %v2254_v4  ;;  %v5971_v4 = vld [vmem:[%s7614_s2 + $0x290] sm:$0xff]   ;;  %v2247_v37 = vcvt.s32.f32 %v2231_v23  ;;  %v2235_v59 = vand.u32 1, %v2219_v31 }
  0xc5   : > { %5444 = vmatprep.subr.bf16.mxu0 %v5957_v46  ;;  %v5976_v46 = vld [vmem:[%s7615_s3 + $0x298] sm:$0xff]   ;;  %v2249_v20 = vcvt.s32.f32 %v2233_v34  ;;  %v5985_v23 = vld [vmem:[%s7614_s2 + $0x2f0] sm:$0xff]   ;;  %v2690_v34 = vand.u32 1, %v2674_v49  ;;  %v3128_v49 = vshra.s32 %v6339_v13, 6 }
  0xc6   : > { %5485 = vmatpush3.bf16.msra.mxu1 %v5960_v57  ;;  %v5978_v57 = vld [vmem:[%s7615_s3 + $0x2e0] sm:$0xff]  }
  0xc7   : > { %5550 = vmatprep.subr.bf16.mxu1 %v5962_v47  ;;  %v2257_v47 = vpack.c.bf16 %v2247_v37, %v2245_v36  ;;  %v2702_v36 = vcvt.s32.f32 %v2686_v22  ;;  %v6004_v22 = vld [vmem:[%s7615_s3 + $0x310] sm:$0xff]  }
  0xc8   : > { %5445 = vmatpush3.bf16.msra.mxu0 %v5959_v3  ;;  %v2684_v3 = vand.u32 1, %v2668_v41 }
  0xc9   : > { %2625 = vmatmul.mubr.bf16.vlgmr.msra.gmra.mrb[64].mxu1 %v2253_v60  ;;  %5510 = vmatprep.subr.bf16.mxu0 %v5961_v7  ;;  %v2665_v7 = vshra.s32 %v6341_v14, 5 }
  0xca   : > { %5551 = vmatpush3.bf16.msra.mxu1 %v5964_v9  ;;  %2632 = vmatprep.mubr.bf16.mxu1 %v2256_v11  ;;  %v2667_v9 = vshra.s32 %v6343_v15, 5  ;;  %v2700_v16 = vcvt.s32.f32 %v2684_v3  ;;  %v5998_v3 = vld [vmem:[%s7615_s3 + $0x348] sm:$0xff]  }
  0xcb   : > { %2423 = vmatmul.mubr.bf16.vlgmr.msra.gmra.mrb[64].mxu0 %v2253_v60  ;;  %5552 = vmatprep.subr.bf16.mxu1 %v5966_v19  ;;  %v2260_v60 = vpack.c.bf16 %v2252_v54, %v2250_v52  ;;  %v5981_v19 = vld [vmem:[%s7614_s2 + $0x2e8] sm:$0xff]   ;;  %v2681_v21 = vand.u32 1, %v2665_v7  ;;  %v5991_v54 = vld [vmem:[%s7614_s2 + $0x2b8] sm:$0xff]   ;;  %v2678_v7 = vshra.s32 %v6502_v62, 5 }
  0xcc   : > { %5511 = vmatpush3.bf16.msra.mxu0 %v5963_v40  ;;  %2430 = vmatprep.mubr.bf16.mxu0 %v2256_v11  ;;  %v5979_v11 = vld [vmem:[%s7614_s2 + $0x2a0] sm:$0xff]   ;;  %v2251_v40 = vcvt.s32.f32 %v2235_v59  ;;  %v2683_v29 = vand.u32 1, %v2667_v9 }
  0xcd   : > { %5512 = vmatprep.subr.bf16.mxu0 %v5965_v38  ;;  %v5984_v38 = vld [vmem:[%s7615_s3 + $0x2a8] sm:$0xff]   ;;  %v2697_v31 = vcvt.s32.f32 %v2681_v21  ;;  %v5993_v59 = vld [vmem:[%s7614_s2 + $0x340] sm:$0xff]   ;;  %v2694_v21 = vand.u32 1, %v2678_v7  ;;  %v3132_v7 = vshra.s32 %v6382_v58, 6 }
  0xce   : > { %5553 = vmatpush3.bf16.msra.mxu1 %v5968_v56  ;;  %v5986_v56 = vld [vmem:[%s7615_s3 + $0x2f0] sm:$0xff]  }
  0xcf   : > { %5554 = vmatprep.subr.bf16.mxu1 %v5970_v17  ;;  %v2259_v17 = vpack.c.bf16 %v2251_v40, %v2249_v20  ;;  %v2706_v20 = vcvt.s32.f32 %v2690_v34  ;;  %v6012_v34 = vld [vmem:[%s7615_s3 + $0x320] sm:$0xff]  }
  0xd0   : > { %5513 = vmatpush3.bf16.msra.mxu0 %v5967_v24  ;;  %v2688_v24 = vand.u32 1, %v2672_v51 }
  0xd1   : > { %2633 = vmatmul.mubr.bf16.gmra.mrb[68].mxu1 %v2255_v44  ;;  %5514 = vmatprep.subr.bf16.mxu0 %v5969_v26  ;;  %v2669_v26 = vshra.s32 %v6392_v0, 5 }
  0xd2   : > { %5555 = vmatpush3.bf16.msra.mxu1 %v5972_v55  ;;  %2640 = vmatprep.mubr.bf16.mxu1 %v2258_v28  ;;  %v2671_v55 = vshra.s32 %v6394_v1, 5  ;;  %v2704_v37 = vcvt.s32.f32 %v2688_v24  ;;  %v6006_v24 = vld [vmem:[%s7615_s3 + $0x358] sm:$0xff]  }
  0xd3   : > { %2431 = vmatmul.mubr.bf16.gmra.mrb[68].mxu0 %v2255_v44  ;;  %5556 = vmatprep.subr.bf16.mxu1 %v5974_v30  ;;  %v2714_v44 = vpack.c.bf16 %v2700_v16, %v2698_v48  ;;  %v5989_v30 = vld [vmem:[%s7614_s2 + $0x2f8] sm:$0xff]   ;;  %v2685_v41 = vand.u32 1, %v2669_v26  ;;  %v5999_v16 = vld [vmem:[%s7614_s2 + $0x308] sm:$0xff]   ;;  %v3126_v26 = vshra.s32 %v6337_v12, 6 }
  0xd4   : > { %5515 = vmatpush3.bf16.msra.mxu0 %v5971_v4  ;;  %2438 = vmatprep.mubr.bf16.mxu0 %v2258_v28  ;;  %v5987_v28 = vld [vmem:[%s7614_s2 + $0x2b0] sm:$0xff]   ;;  %v2699_v4 = vcvt.s32.f32 %v2683_v29  ;;  %v2687_v52 = vand.u32 1, %v2671_v55 }
  0xd5   : > { %5516 = vmatprep.subr.bf16.mxu0 %v5973_v33  ;;  %v5992_v33 = vld [vmem:[%s7615_s3 + $0x2b8] sm:$0xff]   ;;  %v2701_v9 = vcvt.s32.f32 %v2685_v41  ;;  %v6001_v29 = vld [vmem:[%s7614_s2 + $0x350] sm:$0xff]   ;;  %v3142_v41 = vand.u32 1, %v3126_v26  ;;  %v3136_v26 = vshra.s32 %v6465_v10, 6 }
  0xd6   : > { %5557 = vmatpush3.bf16.msra.mxu1 %v5976_v46  ;;  %v5994_v46 = vld [vmem:[%s7615_s3 + $0x340] sm:$0xff]  }
  0xd7   : > { %5558 = vmatprep.subr.bf16.mxu1 %v5978_v57  ;;  %v2713_v57 = vpack.c.bf16 %v2699_v4, %v2697_v31  ;;  %v2710_v31 = vcvt.s32.f32 %v2694_v21  ;;  %v6020_v21 = vld [vmem:[%s7615_s3 + $0x330] sm:$0xff]  }
  0xd8   : > { %5517 = vmatpush3.bf16.msra.mxu0 %v5975_v61  ;;  %v2692_v61 = vand.u32 1, %v2676_v32 }
  0xd9   : > { %2641 = vmatmul.mubr.bf16.gmra.mrb[72].mxu1 %v2257_v47  ;;  %5518 = vmatprep.subr.bf16.mxu0 %v5977_v2  ;;  %v2673_v2 = vshra.s32 %v6491_v45, 5 }
  0xda   : > { %5559 = vmatpush3.bf16.msra.mxu1 %v5980_v6  ;;  %2648 = vmatprep.mubr.bf16.mxu1 %v2260_v60  ;;  %v2675_v6 = vshra.s32 %v6498_v39, 5  ;;  %v2708_v40 = vcvt.s32.f32 %v2692_v61  ;;  %v6014_v61 = vld [vmem:[%s7615_s3 + $0x368] sm:$0xff]  }
  0xdb   : > { %2439 = vmatmul.mubr.bf16.gmra.mrb[72].mxu0 %v2257_v47  ;;  %5560 = vmatprep.subr.bf16.mxu1 %v5982_v8  ;;  %v2716_v47 = vpack.c.bf16 %v2704_v37, %v2702_v36  ;;  %v5997_v8 = vld [vmem:[%s7614_s2 + $0x348] sm:$0xff]   ;;  %v2689_v51 = vand.u32 1, %v2673_v2  ;;  %v6007_v37 = vld [vmem:[%s7614_s2 + $0x318] sm:$0xff]   ;;  %v3130_v2 = vshra.s32 %v6374_v53, 6 }
  0xdc   : > { %5519 = vmatpush3.bf16.msra.mxu0 %v5979_v11  ;;  %2446 = vmatprep.mubr.bf16.mxu0 %v2260_v60  ;;  %v5995_v60 = vld [vmem:[%s7614_s2 + $0x300] sm:$0xff]   ;;  %v2703_v11 = vcvt.s32.f32 %v2687_v52  ;;  %v2691_v48 = vand.u32 1, %v2675_v6 }
  0xdd   : > { %5520 = vmatprep.subr.bf16.mxu0 %v5981_v19  ;;  %v6000_v19 = vld [vmem:[%s7615_s3 + $0x308] sm:$0xff]   ;;  %v2705_v55 = vcvt.s32.f32 %v2689_v51  ;;  %v6009_v52 = vld [vmem:[%s7614_s2 + $0x360] sm:$0xff]   ;;  %v3146_v51 = vand.u32 1, %v3130_v2  ;;  %v3140_v2 = vshra.s32 %v6513_v5, 6 }
  0xde   : > { %5561 = vmatpush3.bf16.msra.mxu1 %v5984_v38  ;;  %v6002_v38 = vld [vmem:[%s7615_s3 + $0x350] sm:$0xff]  }
  0xdf   : > { %5562 = vmatprep.subr.bf16.mxu1 %v5986_v56  ;;  %v2715_v56 = vpack.c.bf16 %v2703_v11, %v2701_v9  ;;  %v3158_v9 = vcvt.s32.f32 %v3142_v41  ;;  %v6028_v41 = vld [vmem:[%s7615_s3 + $0x380] sm:$0xff]  }
  0xe0   : > { %5521 = vmatpush3.bf16.msra.mxu0 %v5983_v43  ;;  %v2696_v43 = vand.u32 1, %v2680_v18 }
  0xe1   : > { %2649 = vmatmul.mubr.bf16.gmra.mrb[76].mxu1 %v2259_v17  ;;  %5522 = vmatprep.subr.bf16.mxu0 %v5985_v23  ;;  %v2677_v23 = vshra.s32 %v6536_v35, 5 }
  0xe2   : > { %5563 = vmatpush3.bf16.msra.mxu1 %v5988_v25  ;;  %3084 = vmatprep.mubr.bf16.mxu1 %v2714_v44  ;;  %v2679_v25 = vshra.s32 %v6546_v50, 5  ;;  %v2712_v4 = vcvt.s32.f32 %v2696_v43  ;;  %v6022_v43 = vld [vmem:[%s7615_s3 + $0x378] sm:$0xff]  }
  0xe3   : > { %2447 = vmatmul.mubr.bf16.gmra.mrb[76].mxu0 %v2259_v17  ;;  %5564 = vmatprep.subr.bf16.mxu1 %v5990_v27  ;;  %v2718_v17 = vpack.c.bf16 %v2708_v40, %v2706_v20  ;;  %v6005_v27 = vld [vmem:[%s7614_s2 + $0x358] sm:$0xff]   ;;  %v2693_v32 = vand.u32 1, %v2677_v23  ;;  %v6015_v40 = vld [vmem:[%s7614_s2 + $0x328] sm:$0xff]   ;;  %v3134_v23 = vshra.s32 %v6455_v63, 6 }
  0xe4   : > { %5523 = vmatpush3.bf16.msra.mxu0 %v5987_v28  ;;  %2882 = vmatprep.mubr.bf16.mxu0 %v2714_v44  ;;  %v6003_v44 = vld [vmem:[%s7614_s2 + $0x310] sm:$0xff]   ;;  %v2707_v28 = vcvt.s32.f32 %v2691_v48  ;;  %v2695_v36 = vand.u32 1, %v2679_v25 }
  0xe5   : > { %5524 = vmatprep.subr.bf16.mxu0 %v5989_v30  ;;  %v6008_v30 = vld [vmem:[%s7615_s3 + $0x318] sm:$0xff]   ;;  %v2709_v6 = vcvt.s32.f32 %v2693_v32  ;;  %v6017_v48 = vld [vmem:[%s7614_s2 + $0x370] sm:$0xff]   ;;  %v3150_v32 = vand.u32 1, %v3134_v23 }
  0xe6   : > { %5565 = vmatpush3.bf16.msra.mxu1 %v5992_v33  ;;  %v6010_v33 = vld [vmem:[%s7615_s3 + $0x360] sm:$0xff]  }
  0xe7   : > { %5630 = vmatprep.subr.bf16.mxu1 %v5994_v46  ;;  %v2717_v46 = vpack.c.bf16 %v2707_v28, %v2705_v55  ;;  %v3162_v55 = vcvt.s32.f32 %v3146_v51  ;;  %v6036_v51 = vld [vmem:[%s7615_s3 + $0x390] sm:$0xff]  }
  0xe8   : > { %5525 = vmatpush3.bf16.msra.mxu0 %v5991_v54  ;;  %v3144_v54 = vand.u32 1, %v3128_v49 }
  0xe9   : > { %3085 = vmatmul.mubr.bf16.vlgmr.msra.gmra.mrb[80].mxu1 %v2713_v57  ;;  %5590 = vmatprep.subr.bf16.mxu0 %v5993_v59  ;;  %v3125_v59 = vshra.s32 %v6341_v14, 6 }
  0xea   : > { %5631 = vmatpush3.bf16.msra.mxu1 %v5996_v42  ;;  %3092 = vmatprep.mubr.bf16.mxu1 %v2716_v47  ;;  %v3127_v42 = vshra.s32 %v6343_v15, 6  ;;  %v3160_v11 = vcvt.s32.f32 %v3144_v54  ;;  %v6030_v54 = vld [vmem:[%s7615_s3 + $0x3c8] sm:$0xff]  }
  0xeb   : > { %2883 = vmatmul.mubr.bf16.vlgmr.msra.gmra.mrb[80].mxu0 %v2713_v57  ;;  %5632 = vmatprep.subr.bf16.mxu1 %v5998_v3  ;;  %v2720_v57 = vpack.c.bf16 %v2712_v4, %v2710_v31  ;;  %v6013_v3 = vld [vmem:[%s7614_s2 + $0x368] sm:$0xff]   ;;  %v3141_v18 = vand.u32 1, %v3125_v59  ;;  %v6023_v4 = vld [vmem:[%s7614_s2 + $0x338] sm:$0xff]   ;;  %v3138_v59 = vshra.s32 %v6502_v62, 6 }
  0xec   : > { %5591 = vmatpush3.bf16.msra.mxu0 %v5995_v60  ;;  %2890 = vmatprep.mubr.bf16.mxu0 %v2716_v47  ;;  %v6011_v47 = vld [vmem:[%s7614_s2 + $0x320] sm:$0xff]   ;;  %v2711_v60 = vcvt.s32.f32 %v2695_v36  ;;  %v3143_v20 = vand.u32 1, %v3127_v42 }
  0xed   : > { %5592 = vmatprep.subr.bf16.mxu0 %v5997_v8  ;;  %v6016_v8 = vld [vmem:[%s7615_s3 + $0x328] sm:$0xff]   ;;  %v3157_v25 = vcvt.s32.f32 %v3141_v18  ;;  %v6025_v36 = vld [vmem:[%s7614_s2 + $0x3c0] sm:$0xff]   ;;  %v3154_v18 = vand.u32 1, %v3138_v59 }
  0xee   : > { %5633 = vmatpush3.bf16.msra.mxu1 %v6000_v19  ;;  %v6018_v19 = vld [vmem:[%s7615_s3 + $0x370] sm:$0xff]  }
  0xef   : > { %5634 = vmatprep.subr.bf16.mxu1 %v6002_v38  ;;  %v2719_v38 = vpack.c.bf16 %v2711_v60, %v2709_v6  ;;  %v3166_v6 = vcvt.s32.f32 %v3150_v32  ;;  %v6039_v32 = vld [vmem:[%s7614_s2 + $0x398] sm:$0xff]  }
  0xf0   : > { %5593 = vmatpush3.bf16.msra.mxu0 %v5999_v16  ;;  %v3148_v16 = vand.u32 1, %v3132_v7 }
  0xf1   : > { %3093 = vmatmul.mubr.bf16.gmra.mrb[84].mxu1 %v2715_v56  ;;  %5594 = vmatprep.subr.bf16.mxu0 %v6001_v29  ;;  %v3129_v29 = vshra.s32 %v6392_v0, 6 }
  0xf2   : > { %5635 = vmatpush3.bf16.msra.mxu1 %v6004_v22  ;;  %3100 = vmatprep.mubr.bf16.mxu1 %v2718_v17  ;;  %v3131_v22 = vshra.s32 %v6394_v1, 6  ;;  %v3164_v28 = vcvt.s32.f32 %v3148_v16  ;;  %v6035_v16 = vld [vmem:[%s7614_s2 + $0x390] sm:$0xff]  }
  0xf3   : > { %2891 = vmatmul.mubr.bf16.gmra.mrb[84].mxu0 %v2715_v56  ;;  %5636 = vmatprep.subr.bf16.mxu1 %v6006_v24  ;;  %v3174_v56 = vpack.c.bf16 %v3160_v11, %v3158_v9  ;;  %v6021_v24 = vld [vmem:[%s7614_s2 + $0x378] sm:$0xff]   ;;  %v3145_v49 = vand.u32 1, %v3129_v29  ;;  %v6031_v11 = vld [vmem:[%s7614_s2 + $0x388] sm:$0xff]  }
  0xf4   : > { %5595 = vmatpush3.bf16.msra.mxu0 %v6003_v44  ;;  %2898 = vmatprep.mubr.bf16.mxu0 %v2718_v17  ;;  %v6019_v17 = vld [vmem:[%s7614_s2 + $0x330] sm:$0xff]   ;;  %v3159_v44 = vcvt.s32.f32 %v3143_v20  ;;  %v3147_v31 = vand.u32 1, %v3131_v22 }
  0xf5   : > { %5596 = vmatprep.subr.bf16.mxu0 %v6005_v27  ;;  %v6024_v27 = vld [vmem:[%s7615_s3 + $0x338] sm:$0xff]   ;;  %v3161_v42 = vcvt.s32.f32 %v3145_v49  ;;  %v6033_v20 = vld [vmem:[%s7614_s2 + $0x3d0] sm:$0xff]   ;;  %v3588_v49 = vshra.s32 %v6339_v13, 7  ;;  %v6041_v13 = vld [vmem:[%s7614_s2 + $0x3e0] sm:$0xff]  }
  0xf6   : > { %5637 = vmatpush3.bf16.msra.mxu1 %v6008_v30  ;;  %v6026_v30 = vld [vmem:[%s7615_s3 + $0x3c0] sm:$0xff]  }
  0xf7   : > { %5638 = vmatprep.subr.bf16.mxu1 %v6010_v33  ;;  %v3173_v33 = vpack.c.bf16 %v3159_v44, %v3157_v25  ;;  %v3139_v25 = vshra.s32 %v6546_v50, 6  ;;  %v6040_v44 = vld [vmem:[%s7615_s3 + $0x398] sm:$0xff]  }
  0xf8   : > { %5597 = vmatpush3.bf16.msra.mxu0 %v6007_v37  ;;  %v3152_v37 = vand.u32 1, %v3136_v26 }
  0xf9   : > { %3101 = vmatmul.mubr.bf16.gmra.mrb[88].mxu1 %v2717_v46  ;;  %5598 = vmatprep.subr.bf16.mxu0 %v6009_v52  ;;  %v3133_v52 = vshra.s32 %v6491_v45, 6 }
  0xfa   : > { %5639 = vmatpush3.bf16.msra.mxu1 %v6012_v34  ;;  %3108 = vmatprep.mubr.bf16.mxu1 %v2720_v57  ;;  %v3135_v34 = vshra.s32 %v6498_v39, 6  ;;  %v3168_v60 = vcvt.s32.f32 %v3152_v37 }
  0xfb   : > { %2899 = vmatmul.mubr.bf16.gmra.mrb[88].mxu0 %v2717_v46  ;;  %5640 = vmatprep.subr.bf16.mxu1 %v6014_v61  ;;  %v3176_v46 = vpack.c.bf16 %v3164_v28, %v3162_v55  ;;  %v6029_v61 = vld [vmem:[%s7614_s2 + $0x3c8] sm:$0xff]   ;;  %v3149_v7 = vand.u32 1, %v3133_v52  ;;  %v3586_v28 = vshra.s32 %v6337_v12, 7 }
  0xfc   : > { %5599 = vmatpush3.bf16.msra.mxu0 %v6011_v47  ;;  %2906 = vmatprep.mubr.bf16.mxu0 %v2720_v57  ;;  %v6027_v57 = vld [vmem:[%s7614_s2 + $0x380] sm:$0xff]   ;;  %v3163_v47 = vcvt.s32.f32 %v3147_v31  ;;  %v3151_v9 = vand.u32 1, %v3135_v34 }
  0xfd   : > { %5600 = vmatprep.subr.bf16.mxu0 %v6013_v3  ;;  %v6032_v3 = vld [vmem:[%s7615_s3 + $0x388] sm:$0xff]   ;;  %v6044_v34 = vld [vmem:[%s7615_s3 + $0x3a0] sm:$0xff]  }
  0xfe   : > { %5641 = vmatpush3.bf16.msra.mxu1 %v6016_v8  ;;  %v6034_v8 = vld [vmem:[%s7615_s3 + $0x3d0] sm:$0xff]  }
  0xff   : > { %5642 = vmatprep.subr.bf16.mxu1 %v6018_v19  ;;  %v3175_v19 = vpack.c.bf16 %v3163_v47, %v3161_v42  ;;  %v3604_v42 = vand.u32 1, %v3588_v49  ;;  %v6046_v47 = vld [vmem:[%s7615_s3 + $0x3e8] sm:$0xff]   ;;  %v6054_v49 = vld [vmem:[%s7615_s3 + $0x3f8] sm:$0xff]  }
 0x100   : > { %5601 = vmatpush3.bf16.msra.mxu0 %v6015_v40  ;;  %v3156_v40 = vand.u32 1, %v3140_v2  ;;  %v6043_v2 = vld [vmem:[%s7614_s2 + $0x3a0] sm:$0xff]  }
 0x101   : > { %3109 = vmatmul.mubr.bf16.gmra.mrb[92].mxu1 %v2719_v38  ;;  %5602 = vmatprep.subr.bf16.mxu0 %v6017_v48  ;;  %v6038_v48 = vld [vmem:[%s7615_s3 + $0x3d8] sm:$0xff]  }
 0x102   : > { %5643 = vmatpush3.bf16.msra.mxu1 %v6020_v21  ;;  %3544 = vmatprep.mubr.bf16.mxu1 %v3174_v56  ;;  %v3165_v21 = vcvt.s32.f32 %v3149_v7  ;;  %v3172_v23 = vcvt.s32.f32 %v3156_v40  ;;  %v3590_v40 = vshra.s32 %v6374_v53, 7 }
 0x103   : > { %2907 = vmatmul.mubr.bf16.gmra.mrb[92].mxu0 %v2719_v38  ;;  %5644 = vmatprep.subr.bf16.mxu1 %v6022_v43  ;;  %v3178_v38 = vpack.c.bf16 %v3168_v60, %v3166_v6  ;;  %v6037_v43 = vld [vmem:[%s7614_s2 + $0x3d8] sm:$0xff]   ;;  %v6045_v6 = vld [vmem:[%s7614_s2 + $0x3e8] sm:$0xff]  }
 0x104   : > { %5603 = vmatpush3.bf16.msra.mxu0 %v6019_v17  ;;  %3342 = vmatprep.mubr.bf16.mxu0 %v3174_v56  ;;  %v3167_v56 = vcvt.s32.f32 %v3151_v9  ;;  %v3170_v17 = vcvt.s32.f32 %v3154_v18  ;;  %v3587_v9 = vshra.s32 %v6343_v15, 7 }
 0x105   : > { %5604 = vmatprep.subr.bf16.mxu0 %v6021_v24  ;;  %v3137_v24 = vshra.s32 %v6536_v35, 6 }
 0x106   : > { %5645 = vmatpush3.bf16.msra.mxu1 %v6024_v27  ;;  %v3177_v12 = vpack.c.bf16 %v3167_v56, %v3165_v21 }
 0x107   : > { %5710 = vmatprep.subr.bf16.mxu1 %v6026_v30  ;;  %v6042_v30 = vld [vmem:[%s7615_s3 + $0x3e0] sm:$0xff]   ;;  %v3153_v52 = vand.u32 1, %v3137_v24  ;;  %v6052_v24 = vld [vmem:[%s7615_s3 + $0x3b0] sm:$0xff]  }
 0x108   : > { %5605 = vmatpush3.bf16.msra.mxu0 %v6023_v4 }
 0x109   : > { %3545 = vmatmul.mubr.bf16.vlgmr.msra.gmra.mrb[96].mxu1 %v3173_v33  ;;  %5670 = vmatprep.subr.bf16.mxu0 %v6025_v36  ;;  %v3169_v60 = vcvt.s32.f32 %v3153_v52  ;;  %v3596_v52 = vshra.s32 %v6465_v10, 7 }
 0x10a   : > { %5711 = vmatpush3.bf16.msra.mxu1 %v6028_v41  ;;  %3552 = vmatprep.mubr.bf16.mxu1 %v3176_v46 }
 0x10b   : > { %3343 = vmatmul.mubr.bf16.vlgmr.msra.gmra.mrb[96].mxu0 %v3173_v33  ;;  %5712 = vmatprep.subr.bf16.mxu1 %v6030_v54  ;;  %v3155_v54 = vand.u32 1, %v3139_v25 }
 0x10c   : > { %5671 = vmatpush3.bf16.msra.mxu0 %v6027_v57  ;;  %3350 = vmatprep.mubr.bf16.mxu0 %v3176_v46  ;;  %v3180_v46 = vpack.c.bf16 %v3172_v23, %v3170_v17  ;;  %v3603_v23 = vand.u32 1, %v3587_v9 }
 0x10d   : > { %5672 = vmatprep.subr.bf16.mxu0 %v6029_v61  ;;  %v3602_v61 = vand.u32 1, %v3586_v28  ;;  %v3171_v7 = vcvt.s32.f32 %v3155_v54 }
 0x10e   : > { %5713 = vmatpush3.bf16.msra.mxu1 %v6032_v3 }
 0x10f   : > { %5714 = vmatprep.subr.bf16.mxu1 %v6034_v8  ;;  %v3585_v8 = vshra.s32 %v6341_v14, 7  ;;  %v6050_v14 = vld [vmem:[%s7615_s3 + $0x3f0] sm:$0xff]   ;;  %v3179_v53 = vpack.c.bf16 %v3171_v7, %v3169_v60  ;;  %v3595_v60 = vshra.s32 %v6498_v39, 7  ;;  %v7270_v39 = vld [vmem:[%s308_s8] sm:$0xff] }
 0x110   : > { %5673 = vmatpush3.bf16.msra.mxu0 %v6031_v11  ;;  %v6048_v11 = vld [vmem:[%s7615_s3 + $0x3a8] sm:$0xff]  }
 0x111   : > { %3553 = vmatmul.mubr.bf16.gmra.mrb[100].mxu1 %v3175_v19  ;;  %5674 = vmatprep.subr.bf16.mxu0 %v6033_v20  ;;  %v3620_v20 = vcvt.s32.f32 %v3604_v42  ;;  %v3601_v17 = vand.u32 1, %v3585_v8 }
 0x112   : > { %5715 = vmatpush3.bf16.msra.mxu1 %v6036_v51  ;;  %3560 = vmatprep.mubr.bf16.mxu1 %v3178_v38  ;;  %v3592_v51 = vshra.s32 %v6382_v58, 7  ;;  %v6049_v58 = vld [vmem:[%s7614_s2 + $0x3f0] sm:$0xff]  }
 0x113   : > { %3351 = vmatmul.mubr.bf16.gmra.mrb[100].mxu0 %v3175_v19  ;;  %5716 = vmatprep.subr.bf16.mxu1 %v6038_v48  ;;  %v3618_v19 = vcvt.s32.f32 %v3602_v61  ;;  %v6047_v48 = vld [vmem:[%s7614_s2 + $0x3a8] sm:$0xff]  }
 0x114   : > { %5675 = vmatpush3.bf16.msra.mxu0 %v6035_v16  ;;  %3358 = vmatprep.mubr.bf16.mxu0 %v3178_v38 }
 0x115   : > { %v5166_v29 = vpop.f32.mrb[0].mxu1  ;;  %5676 = vmatprep.subr.bf16.mxu0 %v6037_v43 }
 0x116   : > { %v5167_v22 = vpop.f32.mrb[1].mxu1  ;;  %v5126_v26 = vpop.f32.mrb[0].mxu0  ;;  %5717 = vmatpush3.bf16.msra.mxu1 %v6040_v44 }
 0x117   : > { %v5168_v27 = vadd.f32 %v5167_v22, %v5166_v29  ;;  %v5169_v55 = vpop.f32.mrb[2].mxu1  ;;  %v5127_v31 = vpop.f32.mrb[1].mxu0  ;;  %5718 = vmatprep.subr.bf16.mxu1 %v6042_v30 }
 0x118   : > { %v5170_v4 = vpop.f32.mrb[3].mxu1  ;;  %v5128_v33 = vadd.f32 %v5127_v31, %v5126_v26  ;;  %v5129_v36 = vpop.f32.mrb[2].mxu0  ;;  %5677 = vmatpush3.bf16.msra.mxu0 %v6039_v32  ;;  %v3634_v26 = vpack.c.bf16 %v3620_v20, %v3618_v19  ;;  %v6051_v31 = vld [vmem:[%s7614_s2 + $0x3b0] sm:$0xff]   ;;  %v6053_v32 = vld [vmem:[%s7614_s2 + $0x3f8] sm:$0xff]  }
 0x119   : > { %v5171_v37 = vadd.f32 %v5170_v4, %v5169_v55  ;;  %v5130_v41 = vpop.f32.mrb[3].mxu0  ;;  %3561 = vmatmul.mubr.bf16.gmra.mrb[104].mxu1 %v3177_v12  ;;  %5678 = vmatprep.subr.bf16.mxu0 %v6041_v13  ;;  %v3608_v55 = vand.u32 1, %v3592_v51  ;;  %v3589_v4 = vshra.s32 %v6392_v0, 7  ;;  %v6056_v13 = vld [vmem:[%s7615_s3 + $0x3b8] sm:$0xff]  }
 0x11a   : > { %v7198_v57 = vadd.f32 %v5168_v27, %v5128_v33  ;;  %v5131_v59 = vadd.f32 %v5130_v41, %v5129_v36  ;;  %5719 = vmatpush3.bf16.msra.mxu1 %v6044_v34  ;;  %3568 = vmatprep.mubr.bf16.mxu1 %v3180_v46  ;;  %v3606_v27 = vand.u32 1, %v3590_v40  ;;  %v3617_v36 = vcvt.s32.f32 %v3601_v17 }
 0x11b   : > { %3359 = vmatmul.mubr.bf16.gmra.mrb[104].mxu0 %v3177_v12  ;;  %5720 = vmatprep.subr.bf16.mxu1 %v6046_v47  ;;  %v3591_v12 = vshra.s32 %v6394_v1, 7  ;;  %v3624_v0 = vcvt.s32.f32 %v3608_v55  ;;  %v6055_v1 = vld [vmem:[%s7614_s2 + $0x3b8] sm:$0xff]   ;;  %v3605_v54 = vand.u32 1, %v3589_v4  ;;  %v3612_v47 = vand.u32 1, %v3596_v52 }
 0x11c   : > { %v7206_v3 = vadd.f32 %v5171_v37, %v5131_v59  ;;  %5679 = vmatpush3.bf16.msra.mxu0 %v6043_v2  ;;  %3366 = vmatprep.mubr.bf16.mxu0 %v3180_v46  ;;  %v3619_v37 = vcvt.s32.f32 %v3603_v23  ;;  %v3622_v41 = vcvt.s32.f32 %v3606_v27  ;;  %v3594_v46 = vshra.s32 %v6455_v63, 7 }
 0x11d   : > { %v5172_v18 = vpop.f32.mrb[4].mxu1  ;;  %5680 = vmatprep.subr.bf16.mxu0 %v6045_v6  ;;  %v3607_v59 = vand.u32 1, %v3591_v12  ;;  %v4157_v63 = vlaneseq  ;;  %v3621_v10 = vcvt.s32.f32 %v3605_v54  ;;  %v3593_v6 = vshra.s32 %v6491_v45, 7 }
 0x11e   : > { %v5132_v15 = vpop.f32.mrb[4].mxu0  ;;  %v5173_v38 = vpop.f32.mrb[5].mxu1  ;;  %5721 = vmatpush3.bf16.msra.mxu1 %v6048_v11  ;;  %v3633_v34 = vpack.c.bf16 %v3619_v37, %v3617_v36  ;;  %v3636_v61 = vpack.c.bf16 %v3624_v0, %v3622_v41  ;;  %v3610_v42 = vand.u32 1, %v3594_v46  ;;  %v3628_v9 = vcvt.s32.f32 %v3612_v47 }
 0x11f   : > { %v5133_v16 = vpop.f32.mrb[5].mxu0  ;;  %v5174_v21 = vadd.f32 %v5173_v38, %v5172_v18  ;;  %v5175_v56 = vpop.f32.mrb[6].mxu1  ;;  %5722 = vmatprep.subr.bf16.mxu1 %v6050_v14  ;;  %v3623_v2 = vcvt.s32.f32 %v3607_v59  ;;  %v7259_v7 = vshrl.u32 %v4157_v63, 7  ;;  %v3598_v11 = vshra.s32 %v6502_v62, 7 }
 0x120   : > { %v5134_v29 = vadd.f32 %v5133_v16, %v5132_v15  ;;  %v5135_v43 = vpop.f32.mrb[6].mxu0  ;;  %v5176_v22 = vpop.f32.mrb[7].mxu1  ;;  %5681 = vmatpush3.bf16.msra.mxu0 %v6047_v48  ;;  %v3626_v8 = vcvt.s32.f32 %v3610_v42  ;;  %v3600_v18 = vshra.s32 %v6513_v5, 7  ;;  %v3609_v51 = vand.u32 1, %v3593_v6 }
 0x121   : > { %v5136_v25 = vpop.f32.mrb[7].mxu0  ;;  %v5177_v44 = vadd.f32 %v5176_v22, %v5175_v56  ;;  %3569 = vmatmul.mubr.bf16.gmra.mrb[108].mxu1 %v3179_v53  ;;  %5682 = vmatprep.subr.bf16.mxu0 %v6049_v58  ;;  %v4159_v45 = vsub.s32 0, %v7259_v7  ;;  %v3635_v40 = vpack.c.bf16 %v3623_v2, %v3621_v10  ;;  %v3611_v14 = vand.u32 1, %v3595_v60 }
 0x122   : > { %v7230_v28 = vadd.f32 %v5174_v21, %v5134_v29  ;;  %v5137_v30 = vadd.f32 %v5136_v25, %v5135_v43  ;;  %5723 = vmatpush3.bf16.msra.mxu1 %v6052_v24  ;;  %4004 = vmatprep.mubr.bf16.mxu1 %v3634_v26  ;;  %v3638_v48 = vpack.c.bf16 %v3628_v9, %v3626_v8  ;;  %v3614_v16 = vand.u32 1, %v3598_v11 }
 0x123   : > { %3367 = vmatmul.mubr.bf16.gmra.mrb[108].mxu0 %v3179_v53  ;;  %5724 = vmatprep.subr.bf16.mxu1 %v6054_v49  ;;  %v4160_v62 = vrot.slane %v7270_v39, %v4159_v45  ;;  %v3616_v21 = vand.u32 1, %v3600_v18  ;;  %v4166_v58 = vsub.s32 1, %v7259_v7  ;;  %v3597_v17 = vshra.s32 %v6536_v35, 7 }
 0x124   : > { %v7242_v33 = vadd.f32 %v5177_v44, %v5137_v30  ;;  %5683 = vmatpush3.bf16.msra.mxu0 %v6051_v31  ;;  %3802 = vmatprep.mubr.bf16.mxu0 %v3634_v26  ;;  %v3625_v24 = vcvt.s32.f32 %v3609_v51  ;;  %v3627_v25 = vcvt.s32.f32 %v3611_v14  ;;  %v3599_v44 = vshra.s32 %v6546_v50, 7 }
 0x125   : > { %5684 = vmatprep.subr.bf16.mxu0 %v6053_v32  ;;  %4162 = vbcast.lane.b32.xlu0 %v4160_v62, 256  ;;  %v4167_v26 = vrot.slane %v7270_v39, %v4166_v58  ;;  %v3630_v49 = vcvt.s32.f32 %v3614_v16  ;;  %v3632_v30 = vcvt.s32.f32 %v3616_v21  ;;  %v4173_v31 = vsub.s32 2, %v7259_v7 }
 0x126   : > { %5725 = vmatpush3.bf16.msra.mxu1 %v6056_v13  ;;  %v3637_v36 = vpack.c.bf16 %v3627_v25, %v3625_v24  ;;  %v3613_v37 = vand.u32 1, %v3597_v17  ;;  %v3615_v50 = vand.u32 1, %v3599_v44  ;;  %v4180_v54 = vsub.s32 3, %v7259_v7 }
 0x127   : > { %v4174_v12 = vrot.slane %v7270_v39, %v4173_v31  ;;  %v3640_v46 = vpack.c.bf16 %v3632_v30, %v3630_v49  ;;  %v4187_v18 = vsub.s32 4, %v7259_v7  ;;  %v4194_v62 = vsub.s32 5, %v7259_v7 }
 0x128   : > { %5685 = vmatpush3.bf16.msra.mxu0 %v6055_v1  ;;  %v3629_v47 = vcvt.s32.f32 %v3613_v37  ;;  %v3631_v63 = vcvt.s32.f32 %v3615_v50  ;;  %v4181_v10 = vrot.slane %v7270_v39, %v4180_v54 }
 0x129   : > { %4005 = vmatmul.mubr.bf16.vlgmr.msra.gmra.mrb[112].mxu1 %v3633_v34  ;;  %4169 = vbcast.lane.b32.xlu0 %v4167_v26, 256  ;;  %v4188_v14 = vrot.slane %v7270_v39, %v4187_v18  ;;  %v4195_v16 = vrot.slane %v7270_v39, %v4194_v62  ;;  %v4208_v26 = vsub.s32 7, %v7259_v7 }
 0x12a   : > { %4012 = vmatprep.mubr.bf16.mxu1 %v3636_v61  ;;  %4176 = vbcast.lane.b32.xlu1 %v4174_v12, 256  ;;  %v3639_v11 = vpack.c.bf16 %v3631_v63, %v3629_v47 }
 0x12b   : > { %3803 = vmatmul.mubr.bf16.vlgmr.msra.gmra.mrb[112].mxu0 %v3633_v34 }
 0x12c   : > { %v5178_v19 = vpop.f32.mrb[8].mxu1  ;;  %3810 = vmatprep.mubr.bf16.mxu0 %v3636_v61 }
 0x12d   : > { %v5179_v20 = vpop.f32.mrb[9].mxu1  ;;  %v5138_v5 = vpop.f32.mrb[8].mxu0  ;;  %4190 = vbcast.lane.b32.xlu0 %v4188_v14, 256 }
 0x12e   : > { %v5180_v15 = vadd.f32 %v5179_v20, %v5178_v19  ;;  %v5181_v38 = vpop.f32.mrb[10].mxu1  ;;  %v5139_v56 = vpop.f32.mrb[9].mxu0  ;;  %4183 = vbcast.lane.b32.xlu1 %v4181_v10, 256 }
 0x12f   : > { %v5182_v53 = vpop.f32.mrb[11].mxu1  ;;  %v5140_v29 = vadd.f32 %v5139_v56, %v5138_v5  ;;  %v5141_v43 = vpop.f32.mrb[10].mxu0 }
 0x130   : > { %v5183_v22 = vadd.f32 %v5182_v53, %v5181_v38  ;;  %v5142_v23 = vpop.f32.mrb[11].mxu0 }
 0x131   : > { %4013 = vmatmul.mubr.bf16.gmra.mrb[116].mxu1 %v3635_v40  ;;  %v7277_v27 = vadd.f32 %v5180_v15, %v5140_v29  ;;  %v5143_v55 = vadd.f32 %v5142_v23, %v5141_v43  ;;  %v4201_v43 = vsub.s32 6, %v7259_v7 }
 0x132   : > { %4020 = vmatprep.mubr.bf16.mxu1 %v3638_v48  ;;  %4197 = vbcast.lane.b32.xlu1 %v4195_v16, 256 }
 0x133   : > { %3811 = vmatmul.mubr.bf16.gmra.mrb[116].mxu0 %v3635_v40  ;;  %v7280_v4 = vadd.f32 %v5183_v22, %v5143_v55  ;;  %v4202_v44 = vrot.slane %v7270_v39, %v4201_v43 }
 0x134   : > { %v5184_v35 = vpop.f32.mrb[12].mxu1  ;;  %3818 = vmatprep.mubr.bf16.mxu0 %v3638_v48 }
 0x135   : > { %v5185_v32 = vpop.f32.mrb[13].mxu1  ;;  %4204 = vbcast.lane.b32.xlu0 %v4202_v44, 256 }
 0x136   : > { %v5144_v13 = vpop.f32.mrb[12].mxu0  ;;  %v5186_v41 = vadd.f32 %v5185_v32, %v5184_v35  ;;  %v5187_v0 = vpop.f32.mrb[14].mxu1  ;;  %v4209_v35 = vrot.slane %v7270_v39, %v4208_v26 }
 0x137   : > { %v5145_v52 = vpop.f32.mrb[13].mxu0  ;;  %v5188_v1 = vpop.f32.mrb[15].mxu1 }
 0x138   : > { %v5146_v34 = vadd.f32 %v5145_v52, %v5144_v13  ;;  %v5147_v59 = vpop.f32.mrb[14].mxu0  ;;  %v5189_v61 = vadd.f32 %v5188_v1, %v5187_v0  ;;  %4211 = vbcast.lane.b32.xlu1 %v4209_v35, 256 }
 0x139   : > { %v5148_v42 = vpop.f32.mrb[15].mxu0  ;;  %4021 = vmatmul.mubr.bf16.gmra.mrb[120].mxu1 %v3637_v36 }
 0x13a   : > { %v7285_v2 = vadd.f32 %v5186_v41, %v5146_v34  ;;  %v5149_v6 = vadd.f32 %v5148_v42, %v5147_v59  ;;  %4028 = vmatprep.mubr.bf16.mxu1 %v3640_v46 }
 0x13b   : > { %3819 = vmatmul.mubr.bf16.gmra.mrb[120].mxu0 %v3637_v36 }
 0x13c   : > { %v7287_v60 = vadd.f32 %v5189_v61, %v5149_v6  ;;  %v5246_v8 = vpop.f32.mrb[16].mxu1  ;;  %3826 = vmatprep.mubr.bf16.mxu0 %v3640_v46 }
 0x13d   : > { %v5247_v9 = vpop.f32.mrb[17].mxu1 }
 0x13e   : > { %v5206_v45 = vpop.f32.mrb[16].mxu0  ;;  %v5248_v19 = vadd.f32 %v5247_v9, %v5246_v8  ;;  %v5249_v20 = vpop.f32.mrb[18].mxu1 }
 0x13f   : > { %v5207_v40 = vpop.f32.mrb[17].mxu0  ;;  %v5250_v51 = vpop.f32.mrb[19].mxu1 }
 0x140   : > { %v5208_v5 = vadd.f32 %v5207_v40, %v5206_v45  ;;  %v5209_v15 = vpop.f32.mrb[18].mxu0  ;;  %v5251_v38 = vadd.f32 %v5250_v51, %v5249_v20 }
 0x141   : > { %v5210_v48 = vpop.f32.mrb[19].mxu0  ;;  %4029 = vmatmul.mubr.bf16.gmra.mrb[124].mxu1 %v3639_v11 }
 0x142   : > { %v1255_v21 = vadd.f32 %v5248_v19, %v5208_v5  ;;  %v5211_v56 = vadd.f32 %v5210_v48, %v5209_v15 }
 0x143   : > { %3827 = vmatmul.mubr.bf16.gmra.mrb[124].mxu0 %v3639_v11 }
 0x144   : > { %v7293_v53 = vadd.f32 %v5251_v38, %v5211_v56  ;;  %v5252_v58 = vpop.f32.mrb[20].mxu1 }
 0x145   : > { %v5253_v29 = vpop.f32.mrb[21].mxu1 }
 0x146   : > { %v5212_v22 = vpop.f32.mrb[20].mxu0  ;;  %v5254_v17 = vadd.f32 %v5253_v29, %v5252_v58  ;;  %v5255_v23 = vpop.f32.mrb[22].mxu1 }
 0x147   : > { %v5213_v24 = vpop.f32.mrb[21].mxu0  ;;  %v5256_v25 = vpop.f32.mrb[23].mxu1 }
 0x148   : > { %v5214_v55 = vadd.f32 %v5213_v24, %v5212_v22  ;;  %v5215_v49 = vpop.f32.mrb[22].mxu0  ;;  %v5257_v30 = vadd.f32 %v5256_v25, %v5255_v23 }
 0x149   : > { %v5216_v31 = vpop.f32.mrb[23].mxu0 }
 0x14a   : > { %v1263_v32 = vadd.f32 %v5254_v17, %v5214_v55  ;;  %v5217_v36 = vadd.f32 %v5216_v31, %v5215_v49 }
 0x14c   : > { %v1266_v37 = vadd.f32 %v5257_v30, %v5217_v36  ;;  %v5258_v50 = vpop.f32.mrb[24].mxu1 }
 0x14d   : > { %v5259_v12 = vpop.f32.mrb[25].mxu1 }
 0x14e   : > { %v5218_v13 = vpop.f32.mrb[24].mxu0  ;;  %v5260_v41 = vadd.f32 %v5259_v12, %v5258_v50  ;;  %v5261_v0 = vpop.f32.mrb[26].mxu1 }
 0x14f   : > { %v5219_v46 = vpop.f32.mrb[25].mxu0  ;;  %v5262_v52 = vpop.f32.mrb[27].mxu1 }
 0x150   : > { %v5220_v1 = vadd.f32 %v5219_v46, %v5218_v13  ;;  %v5221_v7 = vpop.f32.mrb[26].mxu0  ;;  %v5263_v54 = vadd.f32 %v5262_v52, %v5261_v0 }
 0x151   : > { %v5222_v34 = vpop.f32.mrb[27].mxu0 }
 0x152   : > { %v1271_v59 = vadd.f32 %v5260_v41, %v5220_v1  ;;  %v5223_v61 = vadd.f32 %v5222_v34, %v5221_v7 }
 0x154   : > { %v1274_v42 = vadd.f32 %v5263_v54, %v5223_v61  ;;  %v5264_v47 = vpop.f32.mrb[28].mxu1 }
 0x155   : > { %v5265_v39 = vpop.f32.mrb[29].mxu1 }
 0x156   : > { %v5224_v63 = vpop.f32.mrb[28].mxu0  ;;  %v5266_v10 = vadd.f32 %v5265_v39, %v5264_v47  ;;  %v5267_v6 = vpop.f32.mrb[30].mxu1 }
 0x157   : > { %v5225_v8 = vpop.f32.mrb[29].mxu0  ;;  %v5268_v9 = vpop.f32.mrb[31].mxu1 }
 0x158   : > { %v5226_v11 = vadd.f32 %v5225_v8, %v5224_v63  ;;  %v5227_v18 = vpop.f32.mrb[30].mxu0  ;;  %v5269_v45 = vadd.f32 %v5268_v9, %v5267_v6 }
 0x159   : > { %v5228_v19 = vpop.f32.mrb[31].mxu0 }
 0x15a   : > { %v1279_v20 = vadd.f32 %v5266_v10, %v5226_v11  ;;  %v5229_v40 = vadd.f32 %v5228_v19, %v5227_v18 }
 0x15c   : > { %v7299_v51 = vadd.f32 %v5269_v45, %v5229_v40  ;;  %v5326_v14 = vpop.f32.mrb[32].mxu1 }
 0x15d   : > { %v5327_v62 = vpop.f32.mrb[33].mxu1 }
 0x15e   : > { %v5286_v5 = vpop.f32.mrb[32].mxu0  ;;  %v5328_v15 = vadd.f32 %v5327_v62, %v5326_v14  ;;  %v5329_v38 = vpop.f32.mrb[34].mxu1 }
 0x15f   : > { %v5287_v48 = vpop.f32.mrb[33].mxu0  ;;  %v5330_v16 = vpop.f32.mrb[35].mxu1 }
 0x160   : > { %v5288_v56 = vadd.f32 %v5287_v48, %v5286_v5  ;;  %v7301_v58 = vadd.f32 %v5328_v15, %v1255_v21  ;;  %v5289_v29 = vpop.f32.mrb[34].mxu0  ;;  %v5331_v43 = vadd.f32 %v5330_v16, %v5329_v38 }
 0x161   : > { %v5290_v22 = vpop.f32.mrb[35].mxu0 }
 0x162   : > { %v7304_v17 = vadd.f32 %v5288_v56, %v7198_v57  ;;  %v5291_v23 = vadd.f32 %v5290_v22, %v5289_v29  ;;  %v7307_v24 = vadd.f32 %v5331_v43, %v7293_v53 }
 0x164   : > { %v7310_v25 = vadd.f32 %v5291_v23, %v7206_v3  ;;  %v5332_v44 = vpop.f32.mrb[36].mxu1 }
 0x165   : > { %v5333_v26 = vpop.f32.mrb[37].mxu1 }
 0x166   : > { %v5292_v55 = vpop.f32.mrb[36].mxu0  ;;  %v5334_v49 = vadd.f32 %v5333_v26, %v5332_v44  ;;  %v5335_v30 = vpop.f32.mrb[38].mxu1 }
 0x167   : > { %v5293_v21 = vpop.f32.mrb[37].mxu0  ;;  %v5336_v31 = vpop.f32.mrb[39].mxu1 }
 0x168   : > { %v5294_v35 = vadd.f32 %v5293_v21, %v5292_v55  ;;  %v7312_v36 = vadd.f32 %v5334_v49, %v1263_v32  ;;  %v5295_v50 = vpop.f32.mrb[38].mxu0  ;;  %v5337_v57 = vadd.f32 %v5336_v31, %v5335_v30 }
 0x169   : > { %v5296_v12 = vpop.f32.mrb[39].mxu0 }
 0x16a   : > { %v7315_v13 = vadd.f32 %v5294_v35, %v7230_v28  ;;  %v5297_v53 = vadd.f32 %v5296_v12, %v5295_v50  ;;  %v7317_v41 = vadd.f32 %v5337_v57, %v1266_v37 }
 0x16c   : > { %v7320_v3 = vadd.f32 %v5297_v53, %v7242_v33  ;;  %v5338_v0 = vpop.f32.mrb[40].mxu1 }
 0x16d   : > { %v5339_v46 = vpop.f32.mrb[41].mxu1 }
 0x16e   : > { %v5298_v52 = vpop.f32.mrb[40].mxu0  ;;  %v5340_v1 = vadd.f32 %v5339_v46, %v5338_v0  ;;  %v5341_v7 = vpop.f32.mrb[42].mxu1 }
 0x16f   : > { %v5299_v54 = vpop.f32.mrb[41].mxu0  ;;  %v5342_v32 = vpop.f32.mrb[43].mxu1 }
 0x170   : > { %v5300_v34 = vadd.f32 %v5299_v54, %v5298_v52  ;;  %v7322_v61 = vadd.f32 %v5340_v1, %v1271_v59  ;;  %v5301_v47 = vpop.f32.mrb[42].mxu0  ;;  %v5343_v39 = vadd.f32 %v5342_v32, %v5341_v7 }
 0x171   : > { %v5302_v28 = vpop.f32.mrb[43].mxu0 }
 0x172   : > { %v7325_v63 = vadd.f32 %v5300_v34, %v7277_v27  ;;  %v5303_v37 = vadd.f32 %v5302_v28, %v5301_v47  ;;  %v7327_v10 = vadd.f32 %v5343_v39, %v1274_v42 }
 0x174   : > { %v7330_v33 = vadd.f32 %v5303_v37, %v7280_v4  ;;  %v5344_v6 = vpop.f32.mrb[44].mxu1 }
 0x175   : > { %v5345_v8 = vpop.f32.mrb[45].mxu1 }
 0x176   : > { %v5304_v9 = vpop.f32.mrb[44].mxu0  ;;  %v5346_v11 = vadd.f32 %v5345_v8, %v5344_v6  ;;  %v5347_v18 = vpop.f32.mrb[46].mxu1 }
 0x177   : > { %v5305_v45 = vpop.f32.mrb[45].mxu0  ;;  %v5348_v59 = vpop.f32.mrb[47].mxu1 }
 0x178   : > { %v5306_v19 = vadd.f32 %v5305_v45, %v5304_v9  ;;  %v7332_v40 = vadd.f32 %v5346_v11, %v1279_v20  ;;  %v5307_v14 = vpop.f32.mrb[46].mxu0  ;;  %v5349_v62 = vadd.f32 %v5348_v59, %v5347_v18 }
 0x179   : > { %v5308_v27 = vpop.f32.mrb[47].mxu0 }
 0x17a   : > { %v7335_v5 = vadd.f32 %v5306_v19, %v7285_v2  ;;  %v5309_v42 = vadd.f32 %v5308_v27, %v5307_v14  ;;  %v7338_v4 = vadd.f32 %v5349_v62, %v7299_v51 }
 0x17c   : > { %v7341_v15 = vadd.f32 %v5309_v42, %v7287_v60  ;;  %v5406_v38 = vpop.f32.mrb[48].mxu1 }
 0x17d   : > { %v5407_v48 = vpop.f32.mrb[49].mxu1 }
 0x17e   : > { %v5366_v16 = vpop.f32.mrb[48].mxu0  ;;  %v5408_v56 = vadd.f32 %v5407_v48, %v5406_v38  ;;  %v5409_v29 = vpop.f32.mrb[50].mxu1 }
 0x17f   : > { %v5367_v20 = vpop.f32.mrb[49].mxu0  ;;  %v5410_v43 = vpop.f32.mrb[51].mxu1 }
 0x180   : > { %v5368_v22 = vadd.f32 %v5367_v20, %v5366_v16  ;;  %v7344_v23 = vadd.f32 %v5408_v56, %v7301_v58  ;;  %v5369_v2 = vpop.f32.mrb[50].mxu0  ;;  %v5411_v44 = vadd.f32 %v5410_v43, %v5409_v29 }
 0x181   : > { %v5370_v26 = vpop.f32.mrb[51].mxu0 }
 0x182   : > { %v7347_v51 = vadd.f32 %v5368_v22, %v7304_v17  ;;  %v5371_v55 = vadd.f32 %v5370_v26, %v5369_v2  ;;  %v7350_v60 = vadd.f32 %v5411_v44, %v7307_v24 }
 0x184   : > { %v7353_v49 = vadd.f32 %v5371_v55, %v7310_v25  ;;  %v5412_v30 = vpop.f32.mrb[52].mxu1 }
 0x185   : > { %v5413_v21 = vpop.f32.mrb[53].mxu1 }
 0x186   : > { %v5372_v31 = vpop.f32.mrb[52].mxu0  ;;  %v5414_v35 = vadd.f32 %v5413_v21, %v5412_v30  ;;  %v5415_v50 = vpop.f32.mrb[54].mxu1 }
 0x187   : > { %v5373_v58 = vpop.f32.mrb[53].mxu0  ;;  %v5416_v57 = vpop.f32.mrb[55].mxu1 }
 0x188   : > { %v5374_v12 = vadd.f32 %v5373_v58, %v5372_v31  ;;  %v7356_v53 = vadd.f32 %v5414_v35, %v7312_v36  ;;  %v5375_v17 = vpop.f32.mrb[54].mxu0  ;;  %v5417_v0 = vadd.f32 %v5416_v57, %v5415_v50 }
 0x189   : > { %v5376_v46 = vpop.f32.mrb[55].mxu0 }
 0x18a   : > { %v7359_v24 = vadd.f32 %v5374_v12, %v7315_v13  ;;  %v5377_v52 = vadd.f32 %v5376_v46, %v5375_v17  ;;  %v7362_v25 = vadd.f32 %v5417_v0, %v7317_v41 }
 0x18c   : > { %v7365_v1 = vadd.f32 %v5377_v52, %v7320_v3  ;;  %v5418_v7 = vpop.f32.mrb[56].mxu1 }
 0x18d   : > { %v5419_v54 = vpop.f32.mrb[57].mxu1 }
 0x18e   : > { %v5378_v32 = vpop.f32.mrb[56].mxu0  ;;  %v5420_v34 = vadd.f32 %v5419_v54, %v5418_v7  ;;  %v5421_v47 = vpop.f32.mrb[58].mxu1 }
 0x18f   : > { %v5379_v36 = vpop.f32.mrb[57].mxu0  ;;  %v5422_v39 = vpop.f32.mrb[59].mxu1 }
 0x190   : > { %v5380_v28 = vadd.f32 %v5379_v36, %v5378_v32  ;;  %v7368_v37 = vadd.f32 %v5420_v34, %v7322_v61  ;;  %v5381_v13 = vpop.f32.mrb[58].mxu0  ;;  %v5423_v6 = vadd.f32 %v5422_v39, %v5421_v47 }
 0x191   : > { %v5382_v8 = vpop.f32.mrb[59].mxu0 }
 0x192   : > { %v7371_v41 = vadd.f32 %v5380_v28, %v7325_v63  ;;  %v5383_v9 = vadd.f32 %v5382_v8, %v5381_v13  ;;  %v7374_v3 = vadd.f32 %v5423_v6, %v7327_v10 }
 0x194   : > { %v7377_v11 = vadd.f32 %v5383_v9, %v7330_v33  ;;  %v5424_v18 = vpop.f32.mrb[60].mxu1 }
 0x195   : > { %v5425_v45 = vpop.f32.mrb[61].mxu1 }
 0x196   : > { %v5384_v59 = vpop.f32.mrb[60].mxu0  ;;  %v5426_v19 = vadd.f32 %v5425_v45, %v5424_v18  ;;  %v5427_v14 = vpop.f32.mrb[62].mxu1 }
 0x197   : > { %v5385_v61 = vpop.f32.mrb[61].mxu0  ;;  %v5428_v62 = vpop.f32.mrb[63].mxu1 }
 0x198   : > { %v5386_v27 = vadd.f32 %v5385_v61, %v5384_v59  ;;  %v7380_v42 = vadd.f32 %v5426_v19, %v7332_v40  ;;  %v5387_v63 = vpop.f32.mrb[62].mxu0  ;;  %v5429_v38 = vadd.f32 %v5428_v62, %v5427_v14 }
 0x199   : > { %v5388_v48 = vpop.f32.mrb[63].mxu0 }
 0x19a   : > { %v7383_v10 = vadd.f32 %v5386_v27, %v7335_v5  ;;  %v5389_v16 = vadd.f32 %v5388_v48, %v5387_v63  ;;  %v7386_v33 = vadd.f32 %v5429_v38, %v7338_v4 }
 0x19c   : > { %v7389_v56 = vadd.f32 %v5389_v16, %v7341_v15  ;;  %v5486_v29 = vpop.f32.mrb[64].mxu1 }
 0x19d   : > { %v5487_v20 = vpop.f32.mrb[65].mxu1 }
 0x19e   : > { %v5446_v43 = vpop.f32.mrb[64].mxu0  ;;  %v5488_v22 = vadd.f32 %v5487_v20, %v5486_v29  ;;  %v5489_v2 = vpop.f32.mrb[66].mxu1 }
 0x19f   : > { %v5447_v40 = vpop.f32.mrb[65].mxu0  ;;  %v5490_v44 = vpop.f32.mrb[67].mxu1 }
 0x1a0   : > { %v5448_v26 = vadd.f32 %v5447_v40, %v5446_v43  ;;  %v7392_v55 = vadd.f32 %v5488_v22, %v7344_v23  ;;  %v5449_v5 = vpop.f32.mrb[66].mxu0  ;;  %v5491_v30 = vadd.f32 %v5490_v44, %v5489_v2 }
 0x1a1   : > { %v5450_v21 = vpop.f32.mrb[67].mxu0 }
 0x1a2   : > { %v7395_v4 = vadd.f32 %v5448_v26, %v7347_v51  ;;  %v5451_v31 = vadd.f32 %v5450_v21, %v5449_v5  ;;  %v7398_v15 = vadd.f32 %v5491_v30, %v7350_v60 }
 0x1a4   : > { %v7401_v35 = vadd.f32 %v5451_v31, %v7353_v49  ;;  %v5492_v50 = vpop.f32.mrb[68].mxu1 }
 0x1a5   : > { %v5493_v58 = vpop.f32.mrb[69].mxu1 }
 0x1a6   : > { %v5452_v57 = vpop.f32.mrb[68].mxu0  ;;  %v5494_v12 = vadd.f32 %v5493_v58, %v5492_v50  ;;  %v5495_v17 = vpop.f32.mrb[70].mxu1 }
 0x1a7   : > { %v5453_v23 = vpop.f32.mrb[69].mxu0  ;;  %v5496_v0 = vpop.f32.mrb[71].mxu1 }
 0x1a8   : > { %v5454_v46 = vadd.f32 %v5453_v23, %v5452_v57  ;;  %v7404_v52 = vadd.f32 %v5494_v12, %v7356_v53  ;;  %v5455_v51 = vpop.f32.mrb[70].mxu0  ;;  %v5497_v7 = vadd.f32 %v5496_v0, %v5495_v17 }
 0x1a9   : > { %v5456_v54 = vpop.f32.mrb[71].mxu0 }
 0x1aa   : > { %v7407_v60 = vadd.f32 %v5454_v46, %v7359_v24  ;;  %v5457_v32 = vadd.f32 %v5456_v54, %v5455_v51  ;;  %v7410_v49 = vadd.f32 %v5497_v7, %v7362_v25 }
 0x1ac   : > { %v7413_v34 = vadd.f32 %v5457_v32, %v7365_v1  ;;  %v5498_v47 = vpop.f32.mrb[72].mxu1 }
 0x1ad   : > { %v5499_v36 = vpop.f32.mrb[73].mxu1 }
 0x1ae   : > { %v5458_v39 = vpop.f32.mrb[72].mxu0  ;;  %v5500_v28 = vadd.f32 %v5499_v36, %v5498_v47  ;;  %v5501_v13 = vpop.f32.mrb[74].mxu1 }
 0x1af   : > { %v5459_v53 = vpop.f32.mrb[73].mxu0  ;;  %v5502_v6 = vpop.f32.mrb[75].mxu1 }
 0x1b0   : > { %v5460_v8 = vadd.f32 %v5459_v53, %v5458_v39  ;;  %v7416_v9 = vadd.f32 %v5500_v28, %v7368_v37  ;;  %v5461_v24 = vpop.f32.mrb[74].mxu0  ;;  %v5503_v18 = vadd.f32 %v5502_v6, %v5501_v13 }
 0x1b1   : > { %v5462_v45 = vpop.f32.mrb[75].mxu0 }
 0x1b2   : > { %v7419_v25 = vadd.f32 %v5460_v8, %v7371_v41  ;;  %v5463_v59 = vadd.f32 %v5462_v45, %v5461_v24  ;;  %v7422_v1 = vadd.f32 %v5503_v18, %v7374_v3 }
 0x1b4   : > { %v7425_v19 = vadd.f32 %v5463_v59, %v7377_v11  ;;  %v5504_v14 = vpop.f32.mrb[76].mxu1 }
 0x1b5   : > { %v5505_v61 = vpop.f32.mrb[77].mxu1 }
 0x1b6   : > { %v5464_v62 = vpop.f32.mrb[76].mxu0  ;;  %v5506_v27 = vadd.f32 %v5505_v61, %v5504_v14  ;;  %v5507_v63 = vpop.f32.mrb[78].mxu1 }
 0x1b7   : > { %v5465_v37 = vpop.f32.mrb[77].mxu0  ;;  %v5508_v38 = vpop.f32.mrb[79].mxu1 }
 0x1b8   : > { %v5466_v48 = vadd.f32 %v5465_v37, %v5464_v62  ;;  %v7428_v16 = vadd.f32 %v5506_v27, %v7380_v42  ;;  %v5467_v41 = vpop.f32.mrb[78].mxu0  ;;  %v5509_v29 = vadd.f32 %v5508_v38, %v5507_v63 }
 0x1b9   : > { %v5468_v20 = vpop.f32.mrb[79].mxu0 }
 0x1ba   : > { %v7431_v3 = vadd.f32 %v5466_v48, %v7383_v10  ;;  %v5469_v43 = vadd.f32 %v5468_v20, %v5467_v41  ;;  %v7434_v11 = vadd.f32 %v5509_v29, %v7386_v33 }
 0x1bc   : > { %v7437_v22 = vadd.f32 %v5469_v43, %v7389_v56  ;;  %v5566_v2 = vpop.f32.mrb[80].mxu1 }
 0x1bd   : > { %v5567_v40 = vpop.f32.mrb[81].mxu1 }
 0x1be   : > { %v5526_v44 = vpop.f32.mrb[80].mxu0  ;;  %v5568_v26 = vadd.f32 %v5567_v40, %v5566_v2  ;;  %v5569_v5 = vpop.f32.mrb[82].mxu1 }
 0x1bf   : > { %v5527_v42 = vpop.f32.mrb[81].mxu0  ;;  %v5570_v30 = vpop.f32.mrb[83].mxu1 }
 0x1c0   : > { %v5528_v21 = vadd.f32 %v5527_v42, %v5526_v44  ;;  %v7440_v31 = vadd.f32 %v5568_v26, %v7392_v55  ;;  %v5529_v10 = vpop.f32.mrb[82].mxu0  ;;  %v5571_v50 = vadd.f32 %v5570_v30, %v5569_v5 }
 0x1c1   : > { %v5530_v58 = vpop.f32.mrb[83].mxu0 }
 0x1c2   : > { %v7443_v33 = vadd.f32 %v5528_v21, %v7395_v4  ;;  %v5531_v57 = vadd.f32 %v5530_v58, %v5529_v10  ;;  %v7446_v56 = vadd.f32 %v5571_v50, %v7398_v15 }
 0x1c4   : > { %v7449_v12 = vadd.f32 %v5531_v57, %v7401_v35  ;;  %v5572_v17 = vpop.f32.mrb[84].mxu1 }
 0x1c5   : > { %v5573_v23 = vpop.f32.mrb[85].mxu1 }
 0x1c6   : > { %v5532_v0 = vpop.f32.mrb[84].mxu0  ;;  %v5574_v46 = vadd.f32 %v5573_v23, %v5572_v17  ;;  %v5575_v51 = vpop.f32.mrb[86].mxu1 }
 0x1c7   : > { %v5533_v55 = vpop.f32.mrb[85].mxu0  ;;  %v5576_v7 = vpop.f32.mrb[87].mxu1 }
 0x1c8   : > { %v5534_v54 = vadd.f32 %v5533_v55, %v5532_v0  ;;  %v7452_v32 = vadd.f32 %v5574_v46, %v7404_v52  ;;  %v5535_v4 = vpop.f32.mrb[86].mxu0  ;;  %v5577_v47 = vadd.f32 %v5576_v7, %v5575_v51 }
 0x1c9   : > { %v5536_v36 = vpop.f32.mrb[87].mxu0 }
 0x1ca   : > { %v7455_v15 = vadd.f32 %v5534_v54, %v7407_v60  ;;  %v5537_v39 = vadd.f32 %v5536_v36, %v5535_v4  ;;  %v7458_v35 = vadd.f32 %v5577_v47, %v7410_v49 }
 0x1cc   : > { %v7461_v28 = vadd.f32 %v5537_v39, %v7413_v34  ;;  %v5578_v13 = vpop.f32.mrb[88].mxu1 }
 0x1cd   : > { %v5579_v53 = vpop.f32.mrb[89].mxu1 }
 0x1ce   : > { %v5538_v6 = vpop.f32.mrb[88].mxu0  ;;  %v5580_v8 = vadd.f32 %v5579_v53, %v5578_v13  ;;  %v5581_v24 = vpop.f32.mrb[90].mxu1 }
 0x1cf   : > { %v5539_v52 = vpop.f32.mrb[89].mxu0  ;;  %v5582_v18 = vpop.f32.mrb[91].mxu1 }
 0x1d0   : > { %v5540_v45 = vadd.f32 %v5539_v52, %v5538_v6  ;;  %v7464_v59 = vadd.f32 %v5580_v8, %v7416_v9  ;;  %v5541_v60 = vpop.f32.mrb[90].mxu0  ;;  %v5583_v14 = vadd.f32 %v5582_v18, %v5581_v24 }
 0x1d1   : > { %v5542_v61 = vpop.f32.mrb[91].mxu0 }
 0x1d2   : > { %v7467_v49 = vadd.f32 %v5540_v45, %v7419_v25  ;;  %v5543_v62 = vadd.f32 %v5542_v61, %v5541_v60  ;;  %v7470_v34 = vadd.f32 %v5583_v14, %v7422_v1 }
 0x1d4   : > { %v7473_v27 = vadd.f32 %v5543_v62, %v7425_v19  ;;  %v5584_v63 = vpop.f32.mrb[92].mxu1 }
 0x1d5   : > { %v5585_v37 = vpop.f32.mrb[93].mxu1 }
 0x1d6   : > { %v5544_v38 = vpop.f32.mrb[92].mxu0  ;;  %v5586_v48 = vadd.f32 %v5585_v37, %v5584_v63  ;;  %v5587_v41 = vpop.f32.mrb[94].mxu1 }
 0x1d7   : > { %v5545_v9 = vpop.f32.mrb[93].mxu0  ;;  %v5588_v29 = vpop.f32.mrb[95].mxu1 }
 0x1d8   : > { %v5546_v20 = vadd.f32 %v5545_v9, %v5544_v38  ;;  %v7476_v43 = vadd.f32 %v5586_v48, %v7428_v16  ;;  %v5547_v25 = vpop.f32.mrb[94].mxu0  ;;  %v5589_v2 = vadd.f32 %v5588_v29, %v5587_v41 }
 0x1d9   : > { %v5548_v40 = vpop.f32.mrb[95].mxu0 }
 0x1da   : > { %v7479_v1 = vadd.f32 %v5546_v20, %v7431_v3  ;;  %v5549_v44 = vadd.f32 %v5548_v40, %v5547_v25  ;;  %v7482_v19 = vadd.f32 %v5589_v2, %v7434_v11 }
 0x1dc   : > { %v7485_v26 = vadd.f32 %v5549_v44, %v7437_v22  ;;  %v5646_v5 = vpop.f32.mrb[96].mxu1 }
 0x1dd   : > { %v5647_v42 = vpop.f32.mrb[97].mxu1 }
 0x1de   : > { %v5606_v30 = vpop.f32.mrb[96].mxu0  ;;  %v5648_v21 = vadd.f32 %v5647_v42, %v5646_v5  ;;  %v5649_v10 = vpop.f32.mrb[98].mxu1 }
 0x1df   : > { %v5607_v16 = vpop.f32.mrb[97].mxu0  ;;  %v5650_v50 = vpop.f32.mrb[99].mxu1 }
 0x1e0   : > { %v5608_v58 = vadd.f32 %v5607_v16, %v5606_v30  ;;  %v7488_v57 = vadd.f32 %v5648_v21, %v7440_v31  ;;  %v5609_v3 = vpop.f32.mrb[98].mxu0  ;;  %v5651_v17 = vadd.f32 %v5650_v50, %v5649_v10 }
 0x1e1   : > { %v5610_v23 = vpop.f32.mrb[99].mxu0 }
 0x1e2   : > { %v7491_v11 = vadd.f32 %v5608_v58, %v7443_v33  ;;  %v5611_v0 = vadd.f32 %v5610_v23, %v5609_v3  ;;  %v7494_v22 = vadd.f32 %v5651_v17, %v7446_v56 }
 0x1e4   : > { %v7497_v46 = vadd.f32 %v5611_v0, %v7449_v12  ;;  %v5652_v51 = vpop.f32.mrb[100].mxu1 }
 0x1e5   : > { %v5653_v55 = vpop.f32.mrb[101].mxu1 }
 0x1e6   : > { %v5612_v7 = vpop.f32.mrb[100].mxu0  ;;  %v5654_v54 = vadd.f32 %v5653_v55, %v5652_v51  ;;  %v5655_v4 = vpop.f32.mrb[102].mxu1  ;;  %v7536_v55 = vstv %s4392_s9 }
 0x1e7   : > { %v5613_v31 = vpop.f32.mrb[101].mxu0  ;;  %v5656_v47 = vpop.f32.mrb[103].mxu1 }
 0x1e8   : > { %v5614_v36 = vadd.f32 %v5613_v31, %v5612_v7  ;;  %v7500_v39 = vadd.f32 %v5654_v54, %v7452_v32  ;;  %v5615_v33 = vpop.f32.mrb[102].mxu0  ;;  %v5657_v13 = vadd.f32 %v5656_v47, %v5655_v4  ;;  %v7543_v4 = vld [vmem:[%s7616_s4] ss:$0 sm:$0xff] }
 0x1e9   : > { %v5616_v53 = vpop.f32.mrb[103].mxu0 }
 0x1ea   : > { %v7503_v56 = vadd.f32 %v5614_v36, %v7455_v15  ;;  %v5617_v6 = vadd.f32 %v5616_v53, %v5615_v33  ;;  %v7506_v12 = vadd.f32 %v5657_v13, %v7458_v35 }
 0x1ec   : > { %v7509_v8 = vadd.f32 %v5617_v6, %v7461_v28  ;;  %v5658_v24 = vpop.f32.mrb[104].mxu1 }
 0x1ed   : > { %v5659_v52 = vpop.f32.mrb[105].mxu1 }
 0x1ee   : > { %v5618_v18 = vpop.f32.mrb[104].mxu0  ;;  %v5660_v45 = vadd.f32 %v5659_v52, %v5658_v24  ;;  %v5661_v60 = vpop.f32.mrb[106].mxu1 }
 0x1ef   : > { %v5619_v32 = vpop.f32.mrb[105].mxu0  ;;  %v5662_v14 = vpop.f32.mrb[107].mxu1 }
 0x1f0   : > { %v5620_v61 = vadd.f32 %v5619_v32, %v5618_v18  ;;  %v7512_v62 = vadd.f32 %v5660_v45, %v7464_v59  ;;  %v5621_v15 = vpop.f32.mrb[106].mxu0  ;;  %v5663_v63 = vadd.f32 %v5662_v14, %v5661_v60 }
 0x1f1   : > { %v5622_v37 = vpop.f32.mrb[107].mxu0 }
 0x1f2   : > { %v7515_v35 = vadd.f32 %v5620_v61, %v7467_v49  ;;  %v5623_v38 = vadd.f32 %v5622_v37, %v5621_v15  ;;  %v7518_v28 = vadd.f32 %v5663_v63, %v7470_v34 }
 0x1f4   : > { %v7521_v48 = vadd.f32 %v5623_v38, %v7473_v27  ;;  %v5664_v41 = vpop.f32.mrb[108].mxu1 }
 0x1f5   : > { %v5665_v9 = vpop.f32.mrb[109].mxu1 }
 0x1f6   : > { %v5624_v29 = vpop.f32.mrb[108].mxu0  ;;  %v5666_v20 = vadd.f32 %v5665_v9, %v5664_v41  ;;  %v5667_v25 = vpop.f32.mrb[110].mxu1 }
 0x1f7   : > { %v5625_v59 = vpop.f32.mrb[109].mxu0  ;;  %v5668_v2 = vpop.f32.mrb[111].mxu1 }
 0x1f8   : > { %v5626_v40 = vadd.f32 %v5625_v59, %v5624_v29  ;;  %v7524_v44 = vadd.f32 %v5666_v20, %v7476_v43  ;;  %v5627_v49 = vpop.f32.mrb[110].mxu0  ;;  %v5669_v5 = vadd.f32 %v5668_v2, %v5667_v25 }
 0x1f9   : > { %v5628_v42 = vpop.f32.mrb[111].mxu0 }
 0x1fa   : > { %v7527_v34 = vadd.f32 %v5626_v40, %v7479_v1  ;;  %v5629_v27 = vadd.f32 %v5628_v42, %v5627_v49  ;;  %v7530_v30 = vadd.f32 %v5669_v5, %v7482_v19 }
 0x1fc   : > { %v7533_v21 = vadd.f32 %v5629_v27, %v7485_v26  ;;  %v5726_v10 = vpop.f32.mrb[112].mxu1 }
 0x1fd   : > { %v5727_v16 = vpop.f32.mrb[113].mxu1 }
 0x1fe   : > { %v5686_v50 = vpop.f32.mrb[112].mxu0  ;;  %v5728_v58 = vadd.f32 %v5727_v16, %v5726_v10  ;;  %v5729_v43 = vpop.f32.mrb[114].mxu1 }
 0x1ff   : > { %v5687_v3 = vpop.f32.mrb[113].mxu0  ;;  %v5730_v17 = vpop.f32.mrb[115].mxu1 }
 0x200   : > { %v5688_v23 = vadd.f32 %v5687_v3, %v5686_v50  ;;  %v4037_v0 = vadd.f32 %v5728_v58, %v7488_v57  ;;  %v5689_v51 = vpop.f32.mrb[114].mxu0  ;;  %v5731_v1 = vadd.f32 %v5730_v17, %v5729_v43 }
 0x201   : > { %v5690_v7 = vpop.f32.mrb[115].mxu0 }
 0x202   : > { %v3835_v19 = vadd.f32 %v5688_v23, %v7491_v11  ;;  %v5691_v54 = vadd.f32 %v5690_v7, %v5689_v51  ;;  %v4038_v26 = vadd.f32 %v5731_v1, %v7494_v22  ;;  %v4117_v29 = vmul.f32 %v7536_v55, %v4037_v0 }
 0x204   : > { %v4046_v31 = vmul.f32 %v7536_v55, %v3835_v19  ;;  %v3836_v47 = vadd.f32 %v5691_v54, %v7497_v46  ;;  %v5732_v57 = vpop.f32.mrb[116].mxu1  ;;  %v4118_v25 = vmul.f32 %v7536_v55, %v4038_v26 }
 0x205   : > { %v5733_v36 = vpop.f32.mrb[117].mxu1 }
 0x206   : > { %v4061_v33 = vadd.f32 %v7543_v4, %v4046_v31  ;;  %v4047_v13 = vmul.f32 %v7536_v55, %v3836_v47  ;;  %v5692_v53 = vpop.f32.mrb[116].mxu0  ;;  %v5735_v11 = vpop.f32.mrb[118].mxu1  ;;  %v5734_v24 = vadd.f32 %v5733_v36, %v5732_v57 }
 0x207   : > { %v5693_v6 = vpop.f32.mrb[117].mxu0  ;;  %v5736_v22 = vpop.f32.mrb[119].mxu1 }
 0x208   : > { %v5098_v52 = vmul.f32 -1.442695, %v4061_v33  ;;  %v4062_v18 = vadd.f32 %v7543_v4, %v4047_v13  ;;  %v5694_v45 = vadd.f32 %v5693_v6, %v5692_v53  ;;  %v5695_v60 = vpop.f32.mrb[118].mxu0  ;;  %v4039_v32 = vadd.f32 %v5734_v24, %v7500_v39  ;;  %v7559_v39 = vld [vmem:[%s7617_s5] ss:$0 sm:$0xff] }
 0x209   : > { %v5696_v14 = vpop.f32.mrb[119].mxu0  ;;  %v5737_v46 = vadd.f32 %v5736_v22, %v5735_v11  ;;  %v4132_v50 = vadd.f32 %v7559_v39, %v4117_v29  ;;  %v4133_v3 = vadd.f32 %v7559_v39, %v4118_v25 }
 0x20a   : > { %6057 = vpow2.f32 %v5098_v52  ;;  %v5099_v61 = vmul.f32 -1.442695, %v4062_v18  ;;  %v3837_v15 = vadd.f32 %v5694_v45, %v7503_v56  ;;  %v5697_v63 = vadd.f32 %v5696_v14, %v5695_v60 }
 0x20b   : > { %v4040_v37 = vadd.f32 %v5737_v46, %v7506_v12  ;;  %v4119_v47 = vmul.f32 %v7536_v55, %v4039_v32 }
 0x20c   : > { %6059 = vpow2.f32 %v5099_v61  ;;  %v4048_v38 = vmul.f32 %v7536_v55, %v3837_v15  ;;  %v3838_v41 = vadd.f32 %v5697_v63, %v7509_v8  ;;  %v5738_v9 = vpop.f32.mrb[120].mxu1 }
 0x20d   : > { %v5739_v20 = vpop.f32.mrb[121].mxu1  ;;  %v4120_v13 = vmul.f32 %v7536_v55, %v4040_v37  ;;  %v4134_v32 = vadd.f32 %v7559_v39, %v4119_v47 }
 0x20e   : > { %v4063_v56 = vadd.f32 %v7543_v4, %v4048_v38  ;;  %v4049_v12 = vmul.f32 %v7536_v55, %v3838_v41  ;;  %v5698_v59 = vpop.f32.mrb[120].mxu0  ;;  %v5740_v2 = vadd.f32 %v5739_v20, %v5738_v9  ;;  %v5741_v40 = vpop.f32.mrb[122].mxu1 }
 0x20f   : > { %v5699_v49 = vpop.f32.mrb[121].mxu0  ;;  %v5742_v8 = vpop.f32.mrb[123].mxu1  ;;  %v4135_v37 = vadd.f32 %v7559_v39, %v4120_v13 }
 0x210   : > { %v5100_v5 = vmul.f32 -1.442695, %v4063_v56  ;;  %v4064_v42 = vadd.f32 %v7543_v4, %v4049_v12  ;;  %v5700_v27 = vadd.f32 %v5699_v49, %v5698_v59  ;;  %v4041_v10 = vadd.f32 %v5740_v2, %v7512_v62  ;;  %v5701_v16 = vpop.f32.mrb[122].mxu0  ;;  %v4163_v9 = vpop.permute.xlu0 %4162 }
 0x211   : > { %v5702_v58 = vpop.f32.mrb[123].mxu0  ;;  %v5743_v43 = vadd.f32 %v5742_v8, %v5741_v40 }
 0x212   : > { %6061 = vpow2.f32 %v5100_v5  ;;  %v5101_v17 = vmul.f32 -1.442695, %v4064_v42  ;;  %v3839_v23 = vadd.f32 %v5700_v27, %v7515_v35  ;;  %v5703_v0 = vadd.f32 %v5702_v58, %v5701_v16 }
 0x213   : > { %v4042_v51 = vadd.f32 %v5743_v43, %v7518_v28  ;;  %v4121_v20 = vmul.f32 %v7536_v55, %v4041_v10 }
 0x214   : > { %v6058_v1 = vpop.eup %6057  ;;  %6063 = vpow2.f32 %v5101_v17  ;;  %v4050_v7 = vmul.f32 %v7536_v55, %v3839_v23  ;;  %v5744_v19 = vpop.f32.mrb[124].mxu1  ;;  %v3840_v54 = vadd.f32 %v5703_v0, %v7521_v48 }
 0x215   : > { %v4093_v62 = vadd.f32 1.0, %v6058_v1  ;;  %6065 = vtanh.f32 %v4132_v50  ;;  %v5745_v26 = vpop.f32.mrb[125].mxu1  ;;  %v4122_v40 = vmul.f32 %v7536_v55, %v4042_v51  ;;  %v4136_v49 = vadd.f32 %v7559_v39, %v4121_v20  ;;  %v4170_v27 = vpop.permute.xlu0 %4169 }
 0x216   : > { %v6060_v31 = vpop.eup %6059  ;;  %6067 = vtanh.f32 %v4133_v3  ;;  %v4065_v57 = vadd.f32 %v7543_v4, %v4050_v7  ;;  %v5704_v35 = vpop.f32.mrb[124].mxu0  ;;  %v5746_v36 = vadd.f32 %v5745_v26, %v5744_v19  ;;  %v4051_v53 = vmul.f32 %v7536_v55, %v3840_v54 }
 0x217   : > { %v5747_v33 = vpop.f32.mrb[126].mxu1  ;;  %6069 = vrcp.f32 %v4093_v62  ;;  %v4094_v28 = vadd.f32 1.0, %v6060_v31  ;;  %v5705_v11 = vpop.f32.mrb[125].mxu0  ;;  %v4137_v43 = vadd.f32 %v7559_v39, %v4122_v40 }
 0x218   : > { %v5748_v6 = vpop.f32.mrb[127].mxu1  ;;  %v5102_v24 = vmul.f32 -1.442695, %v4065_v57  ;;  %v5706_v48 = vadd.f32 %v5705_v11, %v5704_v35  ;;  %v4043_v22 = vadd.f32 %v5746_v36, %v7524_v44  ;;  %v5707_v52 = vpop.f32.mrb[126].mxu0  ;;  %v4066_v45 = vadd.f32 %v7543_v4, %v4051_v53 }
 0x219   : > { %v5749_v18 = vadd.f32 %v5748_v6, %v5747_v33  ;;  %6071 = vrcp.f32 %v4094_v28  ;;  %v5708_v60 = vpop.f32.mrb[127].mxu0 }
 0x21a   : > { %6073 = vpow2.f32 %v5102_v24  ;;  %v3841_v14 = vadd.f32 %v5706_v48, %v7527_v34  ;;  %v5709_v46 = vadd.f32 %v5708_v60, %v5707_v52  ;;  %v5103_v61 = vmul.f32 -1.442695, %v4066_v45 }
 0x21b   : > { %v4044_v15 = vadd.f32 %v5749_v18, %v7530_v30  ;;  %v4123_v3 = vmul.f32 %v7536_v55, %v4043_v22 }
 0x21c   : > { %v6062_v63 = vpop.eup %6061  ;;  %v4052_v44 = vmul.f32 %v7536_v55, %v3841_v14  ;;  %v3842_v38 = vadd.f32 %v5709_v46, %v7533_v21  ;;  %6075 = vpow2.f32 %v5103_v61 }
 0x21d   : > { %v4095_v41 = vadd.f32 1.0, %v6062_v63  ;;  %6077 = vtanh.f32 %v4134_v32  ;;  %v4124_v19 = vmul.f32 %v7536_v55, %v4044_v15  ;;  %v4138_v57 = vadd.f32 %v7559_v39, %v4123_v3 }
 0x21e   : > { %v6064_v29 = vpop.eup %6063  ;;  %v4067_v34 = vadd.f32 %v7543_v4, %v4052_v44  ;;  %v4053_v25 = vmul.f32 %v7536_v55, %v3842_v38  ;;  %v4191_v44 = vpop.permute.xlu0 %4190 }
 0x21f   : > { %v6066_v56 = vpop.eup %6065  ;;  %6079 = vrcp.f32 %v4095_v41  ;;  %v4096_v30 = vadd.f32 1.0, %v6064_v29  ;;  %v4139_v11 = vadd.f32 %v7559_v39, %v4124_v19 }
 0x220   : > { %v6068_v12 = vpop.eup %6067  ;;  %6081 = vtanh.f32 %v4135_v37  ;;  %v5104_v59 = vmul.f32 -1.442695, %v4067_v34  ;;  %v4068_v2 = vadd.f32 %v7543_v4, %v4053_v25  ;;  %v4177_v4 = vpop.permute.xlu1 %4176 }
 0x221   : > { %v6070_v21 = vpop.eup %6069  ;;  %6083 = vrcp.f32 %v4096_v30 }
 0x222   : > { %6085 = vpow2.f32 %v5104_v59  ;;  %v5105_v8 = vmul.f32 -1.442695, %v4068_v2  ;;  %v4148_v5 = vmul.f32 %v6070_v21, %v6066_v56 }
 0x223   : > { %v6072_v42 = vpop.eup %6071 }
 0x224   : > { %v6074_v10 = vpop.eup %6073  ;;  %6087 = vpow2.f32 %v5105_v8  ;;  %v4213_v16 = vmul.f32 %v4163_v9, %v4148_v5  ;;  %v4149_v50 = vmul.f32 %v6072_v42, %v6068_v12  ;;  %v4184_v13 = vpop.permute.xlu1 %4183 }
 0x225   : > { %v4097_v58 = vadd.f32 1.0, %v6074_v10  ;;  %6089 = vtanh.f32 %v4136_v49 }
 0x226   : > { %v4222_v17 = vsel %vm4221_vm0, %v4213_v16, 0.0  ;;  %v4214_v23 = vmul.f32 %v4170_v27, %v4149_v50  ;;  %v6076_v0 = vpop.eup %6075 }
 0x227   : > { %6091 = vrcp.f32 %v4097_v58  ;;  %v4223_v51 = vrot.slane %v4222_v17, 4  ;;  %v6078_v1 = vpop.eup %6077  ;;  %v4098_v7 = vadd.f32 1.0, %v6076_v0 }
 0x228   : > { %v4229_v62 = vsel %vm4221_vm0, %v4214_v23, 0.0  ;;  %6093 = vtanh.f32 %v4137_v43  ;;  %v4198_v12 = vpop.permute.xlu1 %4197 }
 0x229   : > { %v6080_v54 = vpop.eup %6079  ;;  %v4224_v26 = vadd.f32 %v4223_v51, %v4222_v17  ;;  %v4230_v31 = vrot.slane %v4229_v62, 4  ;;  %6095 = vrcp.f32 %v4098_v7 }
 0x22a   : > { %v6082_v47 = vpop.eup %6081  ;;  %v4150_v35 = vmul.f32 %v6080_v54, %v6078_v1  ;;  %6097 = vtanh.f32 %v4138_v57 }
 0x22b   : > { %v6084_v36 = vpop.eup %6083  ;;  %v4225_v33 = vrot.slane %v4224_v26, 2  ;;  %v4231_v28 = vadd.f32 %v4230_v31, %v4229_v62 }
 0x22c   : > { %v6086_v53 = vpop.eup %6085  ;;  %v4215_v6 = vmul.f32 %v4177_v4, %v4150_v35  ;;  %v4151_v55 = vmul.f32 %v6084_v36, %v6082_v47  ;;  %v4205_v4 = vpop.permute.xlu0 %4204 }
 0x22d   : > { %v4099_v24 = vadd.f32 1.0, %v6086_v53  ;;  %v4226_v48 = vadd.f32 %v4225_v33, %v4224_v26  ;;  %v4232_v22 = vrot.slane %v4231_v28, 2  ;;  %v4212_v19 = vpop.permute.xlu1 %4211 }
 0x22e   : > { %v6088_v52 = vpop.eup %6087  ;;  %v4236_v18 = vsel %vm4221_vm0, %v4215_v6, 0.0  ;;  %v4216_v45 = vmul.f32 %v4184_v13, %v4151_v55 }
 0x22f   : > { %6099 = vrcp.f32 %v4099_v24  ;;  %v4100_v60 = vadd.f32 1.0, %v6088_v52  ;;  %v4227_v32 = vrot.slane %v4226_v48, 1  ;;  %v4233_v14 = vadd.f32 %v4232_v22, %v4231_v28  ;;  %v6090_v46 = vpop.eup %6089 }
 0x230   : > { %6101 = vtanh.f32 %v4139_v11  ;;  %v4237_v61 = vrot.slane %v4236_v18, 4  ;;  %v4243_v15 = vsel %vm4221_vm0, %v4216_v45, 0.0 }
 0x231   : > { %v6092_v39 = vpop.eup %6091  ;;  %6103 = vrcp.f32 %v4100_v60  ;;  %v4234_v63 = vrot.slane %v4233_v14, 1  ;;  %v4244_v37 = vrot.slane %v4243_v15, 4  ;;  %v4228_v29 = vadd.f32 %v4227_v32, %v4226_v48 }
 0x232   : > { %v4238_v38 = vadd.f32 %v4237_v61, %v4236_v18  ;;  %v4152_v41 = vmul.f32 %v6092_v39, %v6090_v46  ;;  %v6094_v9 = vpop.eup %6093 }
 0x233   : > { %v4235_v20 = vadd.f32 %v4234_v63, %v4233_v14  ;;  %v4245_v34 = vadd.f32 %v4244_v37, %v4243_v15  ;;  %v6096_v25 = vpop.eup %6095 }
 0x234   : > { %v4239_v56 = vrot.slane %v4238_v38, 2  ;;  %v4217_v30 = vmul.f32 %v4191_v44, %v4152_v41  ;;  %v4153_v21 = vmul.f32 %v6096_v25, %v6094_v9  ;;  %v6098_v27 = vpop.eup %6097 }
 0x235   : > { %v4287_v59 = vsel %vm4286_vm1, %v4235_v20, %v4228_v29  ;;  %v4246_v2 = vrot.slane %v4245_v34, 2 }
 0x236   : > { %v4240_v40 = vadd.f32 %v4239_v56, %v4238_v38  ;;  %v4250_v49 = vsel %vm4221_vm0, %v4217_v30, 0.0  ;;  %v4218_v42 = vmul.f32 %v4198_v12, %v4153_v21 }
 0x237   : > { %v4247_v8 = vadd.f32 %v4246_v2, %v4245_v34  ;;  %v4251_v5 = vrot.slane %v4250_v49, 4 }
 0x238   : > { %v4241_v10 = vrot.slane %v4240_v40, 1  ;;  %v4257_v43 = vsel %vm4221_vm0, %v4218_v42, 0.0 }
 0x239   : > { %v6100_v16 = vpop.eup %6099  ;;  %v4248_v50 = vrot.slane %v4247_v8, 1  ;;  %v4252_v58 = vadd.f32 %v4251_v5, %v4250_v49  ;;  %v4258_v23 = vrot.slane %v4257_v43, 4 }
 0x23a   : > { %v6102_v3 = vpop.eup %6101  ;;  %v4242_v17 = vadd.f32 %v4241_v10, %v4240_v40  ;;  %v4154_v0 = vmul.f32 %v6100_v16, %v6098_v27 }
 0x23b   : > { %v6104_v51 = vpop.eup %6103  ;;  %v4249_v1 = vadd.f32 %v4248_v50, %v4247_v8  ;;  %v4253_v7 = vrot.slane %v4252_v58, 2  ;;  %v4259_v54 = vadd.f32 %v4258_v23, %v4257_v43 }
 0x23c   : > { %v4289_v62 = vsel %vm4288_vm2, %v4242_v17, %v4287_v59  ;;  %v4219_v26 = vmul.f32 %v4205_v4, %v4154_v0  ;;  %v4155_v31 = vmul.f32 %v6104_v51, %v6102_v3 }
 0x23d   : > { %v4291_v47 = vsel %vm4290_vm3, %v4249_v1, %v4289_v62  ;;  %v4254_v57 = vadd.f32 %v4253_v7, %v4252_v58  ;;  %v4260_v35 = vrot.slane %v4259_v54, 2 }
 0x23e   : > { %v4264_v36 = vsel %vm4221_vm0, %v4219_v26, 0.0  ;;  %v4220_v33 = vmul.f32 %v4212_v19, %v4155_v31 }
 0x23f   : > { %v4255_v28 = vrot.slane %v4254_v57, 1  ;;  %v4265_v13 = vrot.slane %v4264_v36, 4  ;;  %v4261_v53 = vadd.f32 %v4260_v35, %v4259_v54 }
 0x240   : > { %v4271_v11 = vsel %vm4221_vm0, %v4220_v33, 0.0 }
 0x241   : > { %v4256_v6 = vadd.f32 %v4255_v28, %v4254_v57  ;;  %v4266_v55 = vadd.f32 %v4265_v13, %v4264_v36  ;;  %v4272_v24 = vrot.slane %v4271_v11, 4  ;;  %v4262_v48 = vrot.slane %v4261_v53, 1 }
 0x243   : > { %v4293_v22 = vsel %vm4292_vm4, %v4256_v6, %v4291_v47  ;;  %v4267_v52 = vrot.slane %v4266_v55, 2  ;;  %v4273_v18 = vadd.f32 %v4272_v24, %v4271_v11  ;;  %v4263_v45 = vadd.f32 %v4262_v48, %v4261_v53 }
 0x245   : > { %v4268_v60 = vadd.f32 %v4267_v52, %v4266_v55  ;;  %v4274_v32 = vrot.slane %v4273_v18, 2  ;;  %v4295_v14 = vsel %vm4294_vm5, %v4263_v45, %v4293_v22 }
 0x247   : > { %v4269_v46 = vrot.slane %v4268_v60, 1  ;;  %v4275_v61 = vadd.f32 %v4274_v32, %v4273_v18 }
 0x249   : > { %v4270_v15 = vadd.f32 %v4269_v46, %v4268_v60  ;;  %v4276_v39 = vrot.slane %v4275_v61, 1 }
 0x24b   : > { %v4297_v63 = vsel %vm4296_vm6, %v4270_v15, %v4295_v14  ;;  %v4277_v37 = vadd.f32 %v4276_v39, %v4275_v61 }
 0x24d   : > { %v4299_v44 = vsel %vm4298_vm7, %v4277_v37, %v4297_v63 }
 0x24e   : > { %4301 = vst.msk [vmem:[%s312_s26] sm:$0xff] %vm4221_vm0, %v4299_v44 }
 0x24f PF: > { %s18_s24 = sadd.s32 1, %s6130_s24  }
 0x250   : > { %p15_p2 = scmp.ge.s32.totalorder %s18_s24, 4  }
 0x252   :  { %17 = sbr.rel (!%p15_p2) target bundleno = 1 (0x1), region = 100 }
 0x259   :  { %4321 = vsyncpa [#allocation3], 1 }
 0x25a   :  { %4323 = vsyncpa [#allocation3 + $0x1], 1 }

</bundles_post_ra>
